<compile_context>
chip_gen: v6e
topology: v6e:2x2x1
jax: 0.10.0
libtpu: 0.0.40
codegen_flags: <defaults>
</compile_context>

<pallas_src>
import jax
import jax.numpy as jnp
from jax import lax
from jax.experimental import pallas as pl
from jax.experimental.pallas import tpu as pltpu


_LANE = 128    # lane width (last dim)
_SUBLANE = 8   # sublane width (second-to-last dim)


def _round_up(n, m):
    return ((n + m - 1) // m) * m


def _make_rnn_kernel(T, T_pad):
    """Kernel factory closed over the static real / padded time extents."""

    hp = lax.Precision.HIGHEST  # extra MXU passes are free at ~1% utilization

    def kernel(x_ref, wxt_ref, wht_ref, wyt_ref, bh_ref, by_ref,
               hs_ref, y_ref):
        # x_ref:   (T_pad, I_pad)
        # wxt_ref: (I_pad, H_pad)   = Wx^T (zero padded)
        # wht_ref: (H_pad, H_pad)   = Wh^T (zero padded)
        # wyt_ref: (H_pad, O_pad)   = Wy^T (zero padded)
        # bh_ref:  (1, H_pad)
        # by_ref:  (1, O_pad)
        # hs_ref:  (T_pad, H_pad)   all hidden states, one row per step
        # y_ref:   (1, O_pad)       last-step output
        h_pad = wht_ref.shape[0]

        wht = wht_ref[...]
        wyt = wyt_ref[...]

        # Hoisted input projection + bias: one dense matmul instead of T
        # degenerate (1,K)@(K,N) matmuls on the serial critical path.
        xproj = (jnp.dot(x_ref[...], wxt_ref[...],
                         precision=hp,
                         preferred_element_type=jnp.float32)
                 + bh_ref[...])                                  # (T_pad, H_pad)

        # Recurrence, fully unrolled (T is small & static); h stays in vregs
        # (f32 carry: keeps tanh on the EUP and avoids cast traffic on v5e).
        h = jnp.zeros((1, h_pad), jnp.float32)
        rows = []
        for t in range(T):
            pre = xproj[t:t + 1, :] + jnp.dot(
                h, wht, precision=hp, preferred_element_type=jnp.float32)
            h = jnp.tanh(pre)
            rows.append(h)
        if T_pad > T:
            # Padded rows are explicitly zero (never leak the bh-only rows of
            # xproj for t >= T into hs).
            rows.append(jnp.zeros((T_pad - T, h_pad), jnp.float32))

        # Single sublane/lane-dense store of every hidden state.
        hs_ref[...] = jnp.concatenate(rows, axis=0)

        # Final output projection (only the last step's y is returned).
        y_ref[...] = (jnp.dot(h, wyt, precision=hp,
                              preferred_element_type=jnp.float32)
                      + by_ref[...])

    return kernel


def make_rnn_forward(Wx, Wh, Wy, bh, by):
    """Pads / transposes the weights ONCE and returns a jitted forward(x).

    Weights in the PyTorch shapes:
      Wx (hidden, input), Wh (hidden, hidden), Wy (output, hidden),
      bh (hidden, 1), by (output, 1).
    forward(x): x (T, input_size) ->
      (hidden_states (hidden, T, 1), y_T (output, 1)).
    """
    hidden_size, input_size = Wx.shape
    output_size = Wy.shape[0]

    I_p = _round_up(input_size, _LANE)
    H_p = _round_up(hidden_size, _LANE)
    O_p = _round_up(output_size, _LANE)

    f32 = jnp.float32
    # One-time zero-padding (exact: padded hidden units stay identically zero
    # through the recurrence and never affect real ones).
    wxt_p = jnp.zeros((I_p, H_p), f32).at[:input_size, :hidden_size].set(
        jnp.asarray(Wx, f32).T)
    wht_p = jnp.zeros((H_p, H_p), f32).at[:hidden_size, :hidden_size].set(
        jnp.asarray(Wh, f32).T)
    wyt_p = jnp.zeros((H_p, O_p), f32).at[:hidden_size, :output_size].set(
        jnp.asarray(Wy, f32).T)
    bh_p = jnp.zeros((1, H_p), f32).at[:, :hidden_size].set(
        jnp.asarray(bh, f32).T)
    by_p = jnp.zeros((1, O_p), f32).at[:, :output_size].set(
        jnp.asarray(by, f32).T)
    # Materialize the padded params now so they are not re-built per call.
    wxt_p, wht_p, wyt_p, bh_p, by_p = jax.block_until_ready(
        (wxt_p, wht_p, wyt_p, bh_p, by_p))

    full = lambda shape: pl.BlockSpec(shape, lambda: (0,) * len(shape))

    @jax.jit
    def forward(x):
        T = x.shape[0]
        T_p = _round_up(T, _SUBLANE)

        # Only x needs per-call padding (fused into the jitted call).
        x_p = jnp.zeros((T_p, I_p), f32).at[:T, :input_size].set(
            x.astype(f32))

        hs_p, y_p = pl.pallas_call(
            _make_rnn_kernel(T, T_p),
            out_shape=(
                jax.ShapeDtypeStruct((T_p, H_p), f32),
                jax.ShapeDtypeStruct((1, O_p), f32),
            ),
            grid_spec=pltpu.PrefetchScalarGridSpec(
                num_scalar_prefetch=0,
                grid=(),
                in_specs=[
                    full((T_p, I_p)),
                    full((I_p, H_p)),
                    full((H_p, H_p)),
                    full((H_p, O_p)),
                    full((1, H_p)),
                    full((1, O_p)),
                ],
                out_specs=[
                    full((T_p, H_p)),
                    full((1, O_p)),
                ],
            ),
        )(x_p, wxt_p, wht_p, wyt_p, bh_p, by_p)

        hs = hs_p[:T, :hidden_size]              # (T, hidden), row-vector states
        hidden_states = hs.T[:, :, None]         # (hidden, T, 1) -- PyTorch layout
        y_last = y_p[0, :output_size][:, None]   # (output, 1)
        return hidden_states, y_last

    return forward


def _rnn_reference(x, Wx, Wh, Wy, bh, by):
    """Pure-JAX reference mirroring the PyTorch loop (HIGHEST precision)."""
    hp = lax.Precision.HIGHEST
    T = x.shape[0]
    hidden_size = Wx.shape[0]
    h = jnp.zeros((hidden_size, 1), jnp.float32)
    hs = []
    y = None
    for t in range(T):
        x_t = x[t].reshape(-1, 1)
        h = jnp.tanh(jnp.dot(Wx, x_t, precision=hp)
                     + jnp.dot(Wh, h, precision=hp) + bh)
        y = jnp.dot(Wy, h, precision=hp) + by
        hs.append(h)
    return jnp.stack(hs, axis=1), y


if __name__ == "__main__":
    key = jax.random.PRNGKey(0)
    T, input_size, hidden_size, output_size = 8, 16, 32, 8

    k1, k2, k3, k4 = jax.random.split(key, 4)
    # Scaled random weights keep the recurrence well-conditioned; the forward
    # semantics of the module do not depend on the init scale.
    x = jax.random.normal(k1, (T, input_size), jnp.float32)
    Wx = jax.random.normal(k2, (hidden_size, input_size), jnp.float32) / jnp.sqrt(input_size)
    Wh = jax.random.normal(k3, (hidden_size, hidden_size), jnp.float32) * (0.5 / jnp.sqrt(hidden_size))
    Wy = jax.random.normal(k4, (output_size, hidden_size), jnp.float32) / jnp.sqrt(hidden_size)
    bh = jnp.zeros((hidden_size, 1), jnp.float32)
    by = jnp.zeros((output_size, 1), jnp.float32)

    # Weight padding happens once here, not per forward call.
    rnn_forward = make_rnn_forward(Wx, Wh, Wy, bh, by)

    hs, y = rnn_forward(x)
    jax.block_until_ready((hs, y))

    hs_ref, y_ref = _rnn_reference(x, Wx, Wh, Wy, bh, by)
    assert hs.shape == (hidden_size, T, 1)
    assert y.shape == (output_size, 1)
    # Kernel dots run at Precision.HIGHEST, so a tight tolerance against the
    # HIGHEST-precision pure-JAX reference holds across the T-step recurrence.
    assert jnp.allclose(hs, hs_ref, atol=1e-5, rtol=1e-5), \
        float(jnp.max(jnp.abs(hs - hs_ref)))
    assert jnp.allclose(y, y_ref, atol=1e-5, rtol=1e-5), \
        float(jnp.max(jnp.abs(y - y_ref)))

    print("KERNEL_OK")
</pallas_src>

<mosaic_0001>
module attributes {stable_mosaic.version = 11 : i64} {
  func.func @kernel(%arg0: memref<8x128xf32, #tpu.memory_space<vmem>>, %arg1: memref<128x128xf32, #tpu.memory_space<vmem>>, %arg2: memref<128x128xf32, #tpu.memory_space<vmem>>, %arg3: memref<128x128xf32, #tpu.memory_space<vmem>>, %arg4: memref<1x128xf32, #tpu.memory_space<vmem>>, %arg5: memref<1x128xf32, #tpu.memory_space<vmem>>, %arg6: memref<8x128xf32, #tpu.memory_space<vmem>>, %arg7: memref<1x128xf32, #tpu.memory_space<vmem>>) attributes {dimension_semantics = [], scalar_prefetch = 0 : i64, scratch_operands = 0 : i64, tpu.core_type = #tpu.core_type<tc>} {
    %c0 = arith.constant 0 : index
    %c0_0 = arith.constant 0 : index
    %0 = vector.load %arg2[%c0, %c0_0] : memref<128x128xf32, #tpu.memory_space<vmem>>, vector<128x128xf32>
    %c0_1 = arith.constant 0 : index
    %c0_2 = arith.constant 0 : index
    %1 = vector.load %arg3[%c0_1, %c0_2] : memref<128x128xf32, #tpu.memory_space<vmem>>, vector<128x128xf32>
    %c0_3 = arith.constant 0 : index
    %c0_4 = arith.constant 0 : index
    %2 = vector.load %arg0[%c0_3, %c0_4] : memref<8x128xf32, #tpu.memory_space<vmem>>, vector<8x128xf32>
    %c0_5 = arith.constant 0 : index
    %c0_6 = arith.constant 0 : index
    %3 = vector.load %arg1[%c0_5, %c0_6] : memref<128x128xf32, #tpu.memory_space<vmem>>, vector<128x128xf32>
    %cst = arith.constant dense<0.000000e+00> : vector<8x128xf32>
    %4 = tpu.matmul %2, %3, %cst {dimension_numbers = #tpu.dot_dimension_numbers<[1], [0], [0], [1], [0, 0, 1, 1], [], []>, precision = #tpu.contract_precision<fp32>} : vector<8x128xf32>, vector<128x128xf32>, vector<8x128xf32> -> vector<8x128xf32>
    %c0_7 = arith.constant 0 : index
    %c0_8 = arith.constant 0 : index
    %5 = vector.load %arg4[%c0_7, %c0_8] : memref<1x128xf32, #tpu.memory_space<vmem>>, vector<1x128xf32>
    %6 = vector.broadcast %5 : vector<1x128xf32> to vector<8x128xf32>
    %7 = arith.addf %4, %6 : vector<8x128xf32>
    %cst_9 = arith.constant 0.000000e+00 : f32
    %8 = vector.broadcast %cst_9 : f32 to vector<1x128xf32>
    %9 = vector.extract_strided_slice %7 {offsets = [0, 0], sizes = [1, 128], strides = [1, 1]} : vector<8x128xf32> to vector<1x128xf32>
    %cst_10 = arith.constant dense<0.000000e+00> : vector<1x128xf32>
    %10 = tpu.matmul %8, %0, %cst_10 {dimension_numbers = #tpu.dot_dimension_numbers<[1], [0], [0], [1], [0, 0, 1, 1], [], []>, precision = #tpu.contract_precision<fp32>} : vector<1x128xf32>, vector<128x128xf32>, vector<1x128xf32> -> vector<1x128xf32>
    %11 = arith.addf %9, %10 : vector<1x128xf32>
    %12 = math.tanh %11 : vector<1x128xf32>
    %13 = vector.extract_strided_slice %7 {offsets = [1, 0], sizes = [1, 128], strides = [1, 1]} : vector<8x128xf32> to vector<1x128xf32>
    %cst_11 = arith.constant dense<0.000000e+00> : vector<1x128xf32>
    %14 = tpu.matmul %12, %0, %cst_11 {dimension_numbers = #tpu.dot_dimension_numbers<[1], [0], [0], [1], [0, 0, 1, 1], [], []>, precision = #tpu.contract_precision<fp32>} : vector<1x128xf32>, vector<128x128xf32>, vector<1x128xf32> -> vector<1x128xf32>
    %15 = arith.addf %13, %14 : vector<1x128xf32>
    %16 = math.tanh %15 : vector<1x128xf32>
    %17 = vector.extract_strided_slice %7 {offsets = [2, 0], sizes = [1, 128], strides = [1, 1]} : vector<8x128xf32> to vector<1x128xf32>
    %cst_12 = arith.constant dense<0.000000e+00> : vector<1x128xf32>
    %18 = tpu.matmul %16, %0, %cst_12 {dimension_numbers = #tpu.dot_dimension_numbers<[1], [0], [0], [1], [0, 0, 1, 1], [], []>, precision = #tpu.contract_precision<fp32>} : vector<1x128xf32>, vector<128x128xf32>, vector<1x128xf32> -> vector<1x128xf32>
    %19 = arith.addf %17, %18 : vector<1x128xf32>
    %20 = math.tanh %19 : vector<1x128xf32>
    %21 = vector.extract_strided_slice %7 {offsets = [3, 0], sizes = [1, 128], strides = [1, 1]} : vector<8x128xf32> to vector<1x128xf32>
    %cst_13 = arith.constant dense<0.000000e+00> : vector<1x128xf32>
    %22 = tpu.matmul %20, %0, %cst_13 {dimension_numbers = #tpu.dot_dimension_numbers<[1], [0], [0], [1], [0, 0, 1, 1], [], []>, precision = #tpu.contract_precision<fp32>} : vector<1x128xf32>, vector<128x128xf32>, vector<1x128xf32> -> vector<1x128xf32>
    %23 = arith.addf %21, %22 : vector<1x128xf32>
    %24 = math.tanh %23 : vector<1x128xf32>
    %25 = vector.extract_strided_slice %7 {offsets = [4, 0], sizes = [1, 128], strides = [1, 1]} : vector<8x128xf32> to vector<1x128xf32>
    %cst_14 = arith.constant dense<0.000000e+00> : vector<1x128xf32>
    %26 = tpu.matmul %24, %0, %cst_14 {dimension_numbers = #tpu.dot_dimension_numbers<[1], [0], [0], [1], [0, 0, 1, 1], [], []>, precision = #tpu.contract_precision<fp32>} : vector<1x128xf32>, vector<128x128xf32>, vector<1x128xf32> -> vector<1x128xf32>
    %27 = arith.addf %25, %26 : vector<1x128xf32>
    %28 = math.tanh %27 : vector<1x128xf32>
    %29 = vector.extract_strided_slice %7 {offsets = [5, 0], sizes = [1, 128], strides = [1, 1]} : vector<8x128xf32> to vector<1x128xf32>
    %cst_15 = arith.constant dense<0.000000e+00> : vector<1x128xf32>
    %30 = tpu.matmul %28, %0, %cst_15 {dimension_numbers = #tpu.dot_dimension_numbers<[1], [0], [0], [1], [0, 0, 1, 1], [], []>, precision = #tpu.contract_precision<fp32>} : vector<1x128xf32>, vector<128x128xf32>, vector<1x128xf32> -> vector<1x128xf32>
    %31 = arith.addf %29, %30 : vector<1x128xf32>
    %32 = math.tanh %31 : vector<1x128xf32>
    %33 = vector.extract_strided_slice %7 {offsets = [6, 0], sizes = [1, 128], strides = [1, 1]} : vector<8x128xf32> to vector<1x128xf32>
    %cst_16 = arith.constant dense<0.000000e+00> : vector<1x128xf32>
    %34 = tpu.matmul %32, %0, %cst_16 {dimension_numbers = #tpu.dot_dimension_numbers<[1], [0], [0], [1], [0, 0, 1, 1], [], []>, precision = #tpu.contract_precision<fp32>} : vector<1x128xf32>, vector<128x128xf32>, vector<1x128xf32> -> vector<1x128xf32>
    %35 = arith.addf %33, %34 : vector<1x128xf32>
    %36 = math.tanh %35 : vector<1x128xf32>
    %37 = vector.extract_strided_slice %7 {offsets = [7, 0], sizes = [1, 128], strides = [1, 1]} : vector<8x128xf32> to vector<1x128xf32>
    %cst_17 = arith.constant dense<0.000000e+00> : vector<1x128xf32>
    %38 = tpu.matmul %36, %0, %cst_17 {dimension_numbers = #tpu.dot_dimension_numbers<[1], [0], [0], [1], [0, 0, 1, 1], [], []>, precision = #tpu.contract_precision<fp32>} : vector<1x128xf32>, vector<128x128xf32>, vector<1x128xf32> -> vector<1x128xf32>
    %39 = arith.addf %37, %38 : vector<1x128xf32>
    %40 = math.tanh %39 : vector<1x128xf32>
    %41 = tpu.concatenate %12, %16, %20, %24, %28, %32, %36, %40 in 0 : vector<1x128xf32>, vector<1x128xf32>, vector<1x128xf32>, vector<1x128xf32>, vector<1x128xf32>, vector<1x128xf32>, vector<1x128xf32>, vector<1x128xf32> -> vector<8x128xf32>
    %c0_18 = arith.constant 0 : index
    %c0_19 = arith.constant 0 : index
    %42 = vector.load %arg6[%c0_18, %c0_19] : memref<8x128xf32, #tpu.memory_space<vmem>>, vector<8x128xf32>
    tpu.vector_store %arg6[%c0_18, %c0_19], %41 {strides = array<i32>} : memref<8x128xf32, #tpu.memory_space<vmem>>, vector<8x128xf32>,
    %cst_20 = arith.constant dense<0.000000e+00> : vector<1x128xf32>
    %43 = tpu.matmul %40, %1, %cst_20 {dimension_numbers = #tpu.dot_dimension_numbers<[1], [0], [0], [1], [0, 0, 1, 1], [], []>, precision = #tpu.contract_precision<fp32>} : vector<1x128xf32>, vector<128x128xf32>, vector<1x128xf32> -> vector<1x128xf32>
    %c0_21 = arith.constant 0 : index
    %c0_22 = arith.constant 0 : index
    %44 = vector.load %arg5[%c0_21, %c0_22] : memref<1x128xf32, #tpu.memory_space<vmem>>, vector<1x128xf32>
    %45 = arith.addf %43, %44 : vector<1x128xf32>
    %c0_23 = arith.constant 0 : index
    %c0_24 = arith.constant 0 : index
    %46 = vector.load %arg7[%c0_23, %c0_24] : memref<1x128xf32, #tpu.memory_space<vmem>>, vector<1x128xf32>
    tpu.vector_store %arg7[%c0_23, %c0_24], %45 {strides = array<i32>} : memref<1x128xf32, #tpu.memory_space<vmem>>, vector<1x128xf32>,
    return
  }
}

</mosaic_0001>

<bundles_post_ra>
// kernel: forward.1
= control target key start
LH: loop header
LB: loop body
LE: loop exit
PB: predicated region body
PF: predicated region fallthrough
CT: control target
= control target key end

     0   :  { %13 = vsyncpa [#allocation3], 0  ;;  %s12581_s0 = inlined_call_operand.vmem [shape: f32[8,128], index: 0, kind: input, shape index: {}]   ;;  %s12582_s1 = inlined_call_operand.hbm [shape: f32[128,128], index: 1, kind: input, shape index: {}]   ;;  %s12583_s2 = inlined_call_operand.hbm [shape: f32[128,128], index: 2, kind: input, shape index: {}]   ;;  %s12584_s3 = inlined_call_operand.hbm [shape: f32[128,128], index: 3, kind: input, shape index: {}]   ;;  %s12585_s4 = inlined_call_operand.vmem [shape: f32[1,128], index: 4, kind: input, shape index: {}, may-alias: {4,5}]   ;;  %s12586_s5 = inlined_call_operand.vmem [shape: f32[1,128], index: 5, kind: input, shape index: {}, may-alias: {4,5}]   ;;  %s12587_s6 = inlined_call_operand.hbm [shape: f32[8,128], index: 6, kind: output, shape index: {0}]   ;;  %s12588_s7 = inlined_call_operand.vmem [shape: f32[1,128], index: 7, kind: output, shape index: {1}]  }
   0x1   :  { %14 = vsyncpa [#allocation6], 0 }
   0x2   :  { %15 = vsyncpa [#allocation4], 0  ;;  %s9846_s24 = smov [#allocation5]   ;;  %s9847_s26 = smov [#allocation2]  }
   0x3   :  { %s35_s25 = sshll.u32 %s9846_s24, 4  ;;  %s23_s27 = sshll.u32 %s9847_s26, 4  ;;  %s36_s25 = int_to_ptr.vmem [resolvable:$true] %s35_s25  ;;  %s24_s27 = int_to_ptr.vmem [resolvable:$true] %s23_s27 }
   0x4   :  { %s9768_s28 = scalar_lea.vmem %s36_s25, 2048  ;;  %p9773_p1 = scmp.lt.s32.totalorder %s36_s25, %s36_s25 }
   0x5   :  { %p9769_p0 = scmp.ne.s32.totalorder %s36_s25, %s9768_s28  ;;  %p9774_p2 = scmp.lt.s32.totalorder %s9768_s28, %s9768_s28 }
   0x7   :  { %p9775_p3 = por %p9774_p2, %p9773_p1 }
   0x9   :  { %p9776_p4 = pnand %p9775_p3, %p9769_p0 }
   0xb   :  { %9779 = shalt.err (!%p9776_p4)
}
   0xc   :  { %s9848_s29 = smov 128   ;;  %s9849_s30 = smov 8  }
   0xd   :  { %41 = dma.hbm_to_vmem [thread:$0]  %s12583_s2, 2048, %s36_s25, [#allocation6], %s9848_s29, %s9848_s29, %s9849_s30  }
   0xe   :  { %s9788_s10 = scalar_lea.vmem %s24_s27, 2048  ;;  %p9793_p6 = scmp.lt.s32.totalorder %s24_s27, %s24_s27 }
   0xf   :  { %p9789_p5 = scmp.ne.s32.totalorder %s24_s27, %s9788_s10  ;;  %p9794_p7 = scmp.lt.s32.totalorder %s9788_s10, %s9788_s10 }
  0x11   :  { %p9795_p8 = por %p9794_p7, %p9793_p6 }
  0x13   :  { %p9796_p9 = pnand %p9795_p8, %p9789_p5 }
  0x15   :  { %9799 = shalt.err (!%p9796_p9)
}
  0x16   :  { %29 = dma.hbm_to_vmem [thread:$0]  %s12582_s1, 2048, %s24_s27, [#allocation3], %s9848_s29, %s9848_s29, %s9849_s30  }
  0x17   :  { %s9850_s13 = smov [#allocation7]  }
  0x18   :  { %s47_s14 = sshll.u32 %s9850_s13, 4  ;;  %s48_s14 = int_to_ptr.vmem [resolvable:$true] %s47_s14 }
  0x19   :  { %s9808_s15 = scalar_lea.vmem %s48_s14, 2048  ;;  %p9813_p11 = scmp.lt.s32.totalorder %s48_s14, %s48_s14 }
  0x1a   :  { %p9809_p10 = scmp.ne.s32.totalorder %s48_s14, %s9808_s15  ;;  %p9814_p12 = scmp.lt.s32.totalorder %s9808_s15, %s9808_s15 }
  0x1c   :  { %p9815_p13 = por %p9814_p12, %p9813_p11 }
  0x1e   :  { %p9816_p0 = pnand %p9815_p13, %p9809_p10 }
  0x20   :  { %9819 = shalt.err (!%p9816_p0)
}
  0x21   :  { %53 = dma.hbm_to_vmem [thread:$0]  %s12584_s3, 2048, %s48_s14, [#allocation6], %s9848_s29, %s9848_s29, %s9849_s30  }
  0x22   :  { %9840 = dma.done.wait [#allocation3], 2048  }
  0x23   :  { %9841 = vsyncadd [#allocation3], 4294965248 }
  0x24   :  { %9842 = dma.done.wait [#allocation6], 4096  }
  0x25   :  { %9843 = vsyncadd [#allocation6], 4294963200  ;;  %v12629_v0 = vmov 0.0   ;;  %vm9852_vm0 = vmmov 0   ;;  %v115_v1 = vld [vmem:[#allocation2 + $0x78] sm:$0xff]  ;;  %v114_v2 = vld [vmem:[#allocation2 + $0x70] sm:$0xff] }
  0x26   :  { %7636 = vmatprep.subr.mxu0 %v12629_v0  ;;  %7671 = vmatprep.subr.mxu1 %v12629_v0  ;;  %v113_v3 = vld [vmem:[#allocation2 + $0x68] sm:$0xff]  ;;  %v9909_v4 = vand.u32 4294901760, %v115_v1  ;;  %v9911_v5 = vand.u32 4294901760, %v114_v2  ;;  %v112_v7 = vld [vmem:[#allocation2 + $0x60] sm:$0xff]  ;;  %v111_v8 = vld [vmem:[#allocation2 + $0x58] sm:$0xff]  ;;  %vm5934_vm1 = vcmask 1040384  }
  0x27   :  { %7668 = vmatprep.mubr.msk.f32.mxu0 %vm9852_vm0, %v12629_v0  ;;  %7703 = vmatprep.mubr.msk.f32.mxu1 %vm9852_vm0, %v12629_v0  ;;  %v9913_v6 = vand.u32 4294901760, %v113_v3  ;;  %v110_v9 = vld [vmem:[#allocation2 + $0x50] sm:$0xff]  ;;  %v9915_v10 = vand.u32 4294901760, %v112_v7  ;;  %v9917_v11 = vand.u32 4294901760, %v111_v8  ;;  %v109_v13 = vld [vmem:[#allocation2 + $0x48] sm:$0xff]  ;;  %v108_v14 = vld [vmem:[#allocation2 + $0x40] sm:$0xff] }
  0x28   :  { %v9919_v12 = vand.u32 4294901760, %v110_v9  ;;  %7637 = vmatpush3.msra.mxu0 %v9909_v4  ;;  %v9923_v15 = vsub.f32 %v115_v1, %v9909_v4  ;;  %v9926_v16 = vsub.f32 %v114_v2, %v9911_v5  ;;  %v9928_v17 = vand.u32 4294901760, %v109_v13  ;;  %v107_v19 = vld [vmem:[#allocation2 + $0x38] sm:$0xff]  ;;  %v106_v26 = vld [vmem:[#allocation2 + $0x30] sm:$0xff]  ;;  %v105_v36 = vld [vmem:[#allocation2 + $0x28] sm:$0xff] }
  0x29   :  { %v9931_v18 = vsub.f32 %v113_v3, %v9913_v6  ;;  %7638 = vmatprep.subr.mxu0 %v12629_v0  ;;  %v9935_v20 = vsub.f32 %v112_v7, %v9915_v10  ;;  %v9938_v21 = vsub.f32 %v111_v8, %v9917_v11  ;;  %v9944_v25 = vand.u32 4294901760, %v108_v14  ;;  %v104_v41 = vld [vmem:[#allocation2 + $0x20] sm:$0xff]  ;;  %v103_v49 = vld [vmem:[#allocation2 + $0x18] sm:$0xff]  ;;  %v102_v54 = vld [vmem:[#allocation2 + $0x10] sm:$0xff] }
  0x2a   :  { %7639 = vmatpush3.msra.mxu0 %v9911_v5  ;;  %v217_v22 = vand.u32 4294901760, %v9923_v15  ;;  %v224_v23 = vand.u32 4294901760, %v9926_v16  ;;  %v9948_v28 = vand.u32 4294901760, %v107_v19  ;;  %v9952_v30 = vsub.f32 %v110_v9, %v9919_v12  ;;  %v99_v50 = vld [vmem:[%s12581_s0] sm:$0xff]  ;;  %v101_v60 = vld [vmem:[#allocation2 + $0x8] sm:$0xff] }
  0x2b   :  { %v231_v24 = vand.u32 4294901760, %v9931_v18  ;;  %7640 = vmatprep.subr.mxu0 %v12629_v0  ;;  %v238_v27 = vand.u32 4294901760, %v9935_v20  ;;  %v245_v29 = vand.u32 4294901760, %v9938_v21  ;;  %v9965_v34 = vsub.f32 %v109_v13, %v9928_v17  ;;  %v100_v7 = vld [vmem:[#allocation2] sm:$0xff] }
  0x2c   :  { %7641 = vmatpush3.msra.mxu0 %v9913_v6  ;;  %v218_v31 = vsub.f32 %v9923_v15, %v217_v22  ;;  %v225_v32 = vsub.f32 %v9926_v16, %v224_v23  ;;  %v9968_v35 = vand.u32 4294901760, %v106_v26  ;;  %v252_v40 = vand.u32 4294901760, %v9952_v30 }
  0x2d   :  { %v232_v33 = vsub.f32 %v9931_v18, %v231_v24  ;;  %7642 = vmatprep.subr.mxu0 %v12629_v0  ;;  %v239_v39 = vsub.f32 %v9935_v20, %v238_v27  ;;  %v246_v42 = vsub.f32 %v9938_v21, %v245_v29  ;;  %v9980_v43 = vsub.f32 %v108_v14, %v9944_v25 }
  0x2e   :  { %7643 = vmatpush3.msra.mxu0 %v9915_v10  ;;  %v219_v37 = vand.u32 4294901760, %v218_v31  ;;  %v226_v38 = vand.u32 4294901760, %v225_v32  ;;  %v9983_v45 = vand.u32 4294901760, %v105_v36  ;;  %v259_v46 = vand.u32 4294901760, %v9965_v34 }
  0x2f   :  { %7644 = vmatprep.subr.mxu0 %v12629_v0  ;;  %v233_v44 = vand.u32 4294901760, %v232_v33  ;;  %v9987_v47 = vsub.f32 %v107_v19, %v9948_v28  ;;  %v9991_v48 = vand.u32 4294901760, %v104_v41  ;;  %v240_v51 = vand.u32 4294901760, %v239_v39 }
  0x30   :  { %7645 = vmatpush3.msra.mxu0 %v9917_v11  ;;  %7672 = vmatpush3.msra.mxu1 %v219_v37  ;;  %v253_v52 = vsub.f32 %v9952_v30, %v252_v40  ;;  %v266_v53 = vand.u32 4294901760, %v9980_v43  ;;  %v10002_v55 = vsub.f32 %v106_v26, %v9968_v35  ;;  %v247_v56 = vand.u32 4294901760, %v246_v42 }
  0x31   :  { %7646 = vmatprep.subr.mxu0 %v12629_v0  ;;  %7673 = vmatprep.subr.mxu1 %v12629_v0  ;;  %v273_v57 = vand.u32 4294901760, %v9987_v47  ;;  %v260_v58 = vsub.f32 %v9965_v34, %v259_v46  ;;  %v10011_v59 = vand.u32 4294901760, %v103_v49  ;;  %v10014_v61 = vsub.f32 %v105_v36, %v9983_v45 }
  0x32   :  { %7647 = vmatpush3.msra.mxu0 %v9919_v12  ;;  %7674 = vmatpush3.msra.mxu1 %v226_v38  ;;  %v10016_v62 = vand.u32 4294901760, %v99_v50  ;;  %v10020_v63 = vand.u32 4294901760, %v102_v54  ;;  %v254_v1 = vand.u32 4294901760, %v253_v52  ;;  %v267_v2 = vsub.f32 %v9980_v43, %v266_v53 }
  0x33   :  { %7648 = vmatprep.subr.mxu0 %v12629_v0  ;;  %7675 = vmatprep.subr.mxu1 %v12629_v0  ;;  %v280_v3 = vand.u32 4294901760, %v10002_v55  ;;  %v10028_v8 = vsub.f32 %v104_v41, %v9991_v48  ;;  %v274_v9 = vsub.f32 %v9987_v47, %v273_v57  ;;  %v10035_v13 = vand.u32 4294901760, %v101_v60 }
  0x34   :  { %7649 = vmatpush3.msra.mxu0 %v9928_v17  ;;  %7676 = vmatpush3.msra.mxu1 %v233_v44  ;;  %v261_v14 = vand.u32 4294901760, %v260_v58  ;;  %v287_v19 = vand.u32 4294901760, %v10014_v61  ;;  %v10040_v26 = vsub.f32 %v99_v50, %v10016_v62  ;;  %v10043_v31 = vsub.f32 %v103_v49, %v10011_v59 }
  0x35   :  { %7650 = vmatprep.subr.mxu0 %v12629_v0  ;;  %7677 = vmatprep.subr.mxu1 %v12629_v0  ;;  %v10047_v32 = vand.u32 4294901760, %v100_v7  ;;  %v268_v33 = vand.u32 4294901760, %v267_v2  ;;  %v281_v36 = vsub.f32 %v10002_v55, %v280_v3  ;;  %v294_v37 = vand.u32 4294901760, %v10028_v8 }
  0x36   :  { %7651 = vmatpush3.msra.mxu0 %v9944_v25  ;;  %7678 = vmatpush3.msra.mxu1 %v240_v51  ;;  %v10055_v38 = vsub.f32 %v102_v54, %v10020_v63  ;;  %v275_v39 = vand.u32 4294901760, %v274_v9  ;;  %v288_v41 = vsub.f32 %v10014_v61, %v287_v19  ;;  %v206_v42 = vand.u32 4294901760, %v10040_v26 }
  0x37   :  { %7652 = vmatprep.subr.mxu0 %v12629_v0  ;;  %7679 = vmatprep.subr.mxu1 %v12629_v0  ;;  %v301_v44 = vand.u32 4294901760, %v10043_v31  ;;  %v10066_v49 = vsub.f32 %v101_v60, %v10035_v13  ;;  %v282_v50 = vand.u32 4294901760, %v281_v36  ;;  %v295_v51 = vsub.f32 %v10028_v8, %v294_v37 }
  0x38   :  { %7653 = vmatpush3.msra.mxu0 %v9948_v28  ;;  %7680 = vmatpush3.msra.mxu1 %v247_v56  ;;  %v308_v52 = vand.u32 4294901760, %v10055_v38  ;;  %v10076_v54 = vsub.f32 %v100_v7, %v10047_v32  ;;  %v289_v56 = vand.u32 4294901760, %v288_v41  ;;  %v207_v58 = vsub.f32 %v10040_v26, %v206_v42 }
  0x39   :  { %7654 = vmatprep.subr.mxu0 %v12629_v0  ;;  %7681 = vmatprep.subr.mxu1 %v12629_v0  ;;  %v302_v60 = vsub.f32 %v10043_v31, %v301_v44  ;;  %v296_v2 = vand.u32 4294901760, %v295_v51  ;;  %vm5936_vm2 = vcmask 1041408   ;;  %vm5938_vm3 = vcmask 1042432  }
  0x3a   :  { %7655 = vmatpush3.msra.mxu0 %v9968_v35  ;;  %7682 = vmatpush3.msra.mxu1 %v254_v1  ;;  %v315_v1 = vand.u32 4294901760, %v10066_v49  ;;  %v309_v7 = vsub.f32 %v10055_v38, %v308_v52  ;;  %v322_v9 = vand.u32 4294901760, %v10076_v54  ;;  %vm5940_vm4 = vcmask 1043456  }
  0x3b   :  { %7656 = vmatprep.subr.mxu0 %v12629_v0  ;;  %7683 = vmatprep.subr.mxu1 %v12629_v0  ;;  %vm5942_vm5 = vcmask 1044480   ;;  %vm5944_vm6 = vcmask 1045504   ;;  %vm5946_vm7 = vcmask 1046528  }
  0x3c   :  { %7657 = vmatpush3.msra.mxu0 %v9983_v45  ;;  %7684 = vmatpush3.msra.mxu1 %v261_v14  ;;  %v208_v14 = vand.u32 4294901760, %v207_v58  ;;  %v316_v36 = vsub.f32 %v10066_v49, %v315_v1  ;;  %v323_v41 = vsub.f32 %v10076_v54, %v322_v9 }
  0x3d   :  { %7658 = vmatprep.subr.mxu0 %v12629_v0  ;;  %7685 = vmatprep.subr.mxu1 %v12629_v0 }
  0x3e   :  { %7659 = vmatpush3.msra.mxu0 %v9991_v48  ;;  %7686 = vmatpush3.msra.mxu1 %v268_v33  ;;  %v303_v33 = vand.u32 4294901760, %v302_v60  ;;  %v324_v51 = vand.u32 4294901760, %v323_v41  ;;  %v70_v60 = vld [vmem:[#allocation5 + $0x18] sm:$0xff] }
  0x3f   :  { %7660 = vmatprep.subr.mxu0 %v12629_v0  ;;  %7687 = vmatprep.subr.mxu1 %v12629_v0 }
  0x40   :  { %7661 = vmatpush3.msra.mxu0 %v10011_v59  ;;  %7688 = vmatpush3.msra.mxu1 %v275_v39  ;;  %v310_v39 = vand.u32 4294901760, %v309_v7 }
  0x41   :  { %7662 = vmatprep.subr.mxu0 %v12629_v0  ;;  %7689 = vmatprep.subr.mxu1 %v12629_v0 }
  0x42   :  { %7663 = vmatpush3.msra.mxu0 %v10020_v63  ;;  %7690 = vmatpush3.msra.mxu1 %v282_v50  ;;  %v317_v50 = vand.u32 4294901760, %v316_v36  ;;  %v10399_v36 = vand.u32 4294901760, %v70_v60 }
  0x43   :  { %7664 = vmatprep.subr.mxu0 %v12629_v0  ;;  %7691 = vmatprep.subr.mxu1 %v12629_v0 }
  0x44   :  { %7665 = vmatpush3.msra.mxu0 %v10035_v13  ;;  %7692 = vmatpush3.msra.mxu1 %v289_v56 }
  0x45   :  { %7666 = vmatprep.subr.mxu0 %v12629_v0  ;;  %7693 = vmatprep.subr.mxu1 %v12629_v0 }
  0x46   :  { %7667 = vmatpush3.msra.mxu0 %v10047_v32  ;;  %7694 = vmatpush3.msra.mxu1 %v296_v2 }
  0x47   :  { %7695 = vmatprep.subr.mxu1 %v12629_v0  ;;  %7706 = vmatprep.subr.mxu0 %v12629_v0 }
  0x48   :  { %7669 = vmatmul.mubr.f32.vlgmr.msra.gmra.mxu0 %v208_v14  ;;  %7696 = vmatpush3.msra.mxu1 %v303_v33  ;;  %v69_v14 = vld [vmem:[#allocation5 + $0x10] sm:$0xff] }
  0x49   :  { %7707 = vmatpush3.msra.mxu0 %v9923_v15  ;;  %7697 = vmatprep.subr.mxu1 %v12629_v0 }
  0x4a   :  { %7708 = vmatprep.subr.mxu0 %v12629_v0  ;;  %7698 = vmatpush3.msra.mxu1 %v310_v39 }
  0x4b   :  { %7709 = vmatpush3.msra.mxu0 %v9926_v16  ;;  %7699 = vmatprep.subr.mxu1 %v12629_v0 }
  0x4c   :  { %7710 = vmatprep.subr.mxu0 %v12629_v0  ;;  %7700 = vmatpush3.msra.mxu1 %v317_v50 }
  0x4d   :  { %7711 = vmatpush3.msra.mxu0 %v9931_v18  ;;  %7701 = vmatprep.subr.mxu1 %v12629_v0 }
  0x4e   :  { %7712 = vmatprep.subr.mxu0 %v12629_v0  ;;  %7702 = vmatpush3.msra.mxu1 %v324_v51  ;;  %v68_v51 = vld [vmem:[#allocation5 + $0x8] sm:$0xff] }
  0x4f   :  { %7713 = vmatpush3.msra.mxu0 %v9935_v20  ;;  %7704 = vmatmul.mubr.f32.vlgmr.msra.gmra.mxu1 %v10016_v62 }
  0x50   :  { %7714 = vmatprep.subr.mxu0 %v12629_v0  ;;  %7741 = vmatprep.subr.mxu1 %v12629_v0 }
  0x51   :  { %7715 = vmatpush3.msra.mxu0 %v9938_v21  ;;  %7742 = vmatpush3.msra.mxu1 %v9909_v4  ;;  %v77_v21 = vld [vmem:[#allocation5 + $0x50] sm:$0xff] }
  0x52   :  { %7716 = vmatprep.subr.mxu0 %v12629_v0  ;;  %7743 = vmatprep.subr.mxu1 %v12629_v0 }
  0x53   :  { %7717 = vmatpush3.msra.mxu0 %v9952_v30  ;;  %7744 = vmatpush3.msra.mxu1 %v9911_v5  ;;  %v75_v30 = vld [vmem:[#allocation5 + $0x40] sm:$0xff] }
  0x54   :  { %7718 = vmatprep.subr.mxu0 %v12629_v0  ;;  %7745 = vmatprep.subr.mxu1 %v12629_v0 }
  0x55   :  { %7719 = vmatpush3.msra.mxu0 %v9965_v34  ;;  %7746 = vmatpush3.msra.mxu1 %v9913_v6 }
  0x56   :  { %7720 = vmatprep.subr.mxu0 %v12629_v0  ;;  %7747 = vmatprep.subr.mxu1 %v12629_v0 }
  0x57   :  { %7721 = vmatpush3.msra.mxu0 %v9980_v43  ;;  %7748 = vmatpush3.msra.mxu1 %v9915_v10  ;;  %v74_v43 = vld [vmem:[#allocation5 + $0x38] sm:$0xff] }
  0x58   :  { %7722 = vmatprep.subr.mxu0 %v12629_v0  ;;  %7749 = vmatprep.subr.mxu1 %v12629_v0 }
  0x59   :  { %7723 = vmatpush3.msra.mxu0 %v9987_v47  ;;  %7750 = vmatpush3.msra.mxu1 %v9917_v11  ;;  %v10310_v47 = vand.u32 4294901760, %v75_v30 }
  0x5a   :  { %7724 = vmatprep.subr.mxu0 %v12629_v0  ;;  %7751 = vmatprep.subr.mxu1 %v12629_v0 }
  0x5b   :  { %7725 = vmatpush3.msra.mxu0 %v10002_v55  ;;  %7752 = vmatpush3.msra.mxu1 %v9919_v12 }
  0x5c   :  { %7726 = vmatprep.subr.mxu0 %v12629_v0  ;;  %7753 = vmatprep.subr.mxu1 %v12629_v0 }
  0x5d   :  { %7727 = vmatpush3.msra.mxu0 %v10014_v61  ;;  %7754 = vmatpush3.msra.mxu1 %v9928_v17 }
  0x5e   :  { %7728 = vmatprep.subr.mxu0 %v12629_v0  ;;  %7755 = vmatprep.subr.mxu1 %v12629_v0 }
  0x5f   :  { %7729 = vmatpush3.msra.mxu0 %v10028_v8  ;;  %7756 = vmatpush3.msra.mxu1 %v9944_v25 }
  0x60   :  { %7730 = vmatprep.subr.mxu0 %v12629_v0  ;;  %7757 = vmatprep.subr.mxu1 %v12629_v0 }
  0x61   :  { %7731 = vmatpush3.msra.mxu0 %v10043_v31  ;;  %7758 = vmatpush3.msra.mxu1 %v9948_v28 }
  0x62   :  { %7732 = vmatprep.subr.mxu0 %v12629_v0  ;;  %7759 = vmatprep.subr.mxu1 %v12629_v0 }
  0x63   :  { %7733 = vmatpush3.msra.mxu0 %v10055_v38  ;;  %7760 = vmatpush3.msra.mxu1 %v9968_v35 }
  0x64   :  { %7734 = vmatprep.subr.mxu0 %v12629_v0  ;;  %7761 = vmatprep.subr.mxu1 %v12629_v0 }
  0x65   :  { %7735 = vmatpush3.msra.mxu0 %v10066_v49  ;;  %7762 = vmatpush3.msra.mxu1 %v9983_v45 }
  0x66   :  { %7736 = vmatprep.subr.mxu0 %v12629_v0  ;;  %7763 = vmatprep.subr.mxu1 %v12629_v0 }
  0x67   :  { %7737 = vmatpush3.msra.mxu0 %v10076_v54  ;;  %7738 = vmatprep.mubr.msk.f32.mxu0 %vm9852_vm0, %v12629_v0 }
  0x68   :  { %7764 = vmatpush3.msra.mxu1 %v9991_v48  ;;  %7739 = vmatmul.mubr.f32.vlgmr.msra.gmra.mxu0 %v10040_v26 }
  0x69   :  { %7765 = vmatprep.subr.mxu1 %v12629_v0  ;;  %7776 = vmatprep.subr.mxu0 %v12629_v0 }
  0x6a   :  { %7766 = vmatpush3.msra.mxu1 %v10011_v59  ;;  %7777 = vmatpush3.msra.mxu0 %v217_v22 }
  0x6b   :  { %7767 = vmatprep.subr.mxu1 %v12629_v0  ;;  %7778 = vmatprep.subr.mxu0 %v12629_v0 }
  0x6c   :  { %7768 = vmatpush3.msra.mxu1 %v10020_v63  ;;  %7779 = vmatpush3.msra.mxu0 %v224_v23 }
  0x6d   :  { %7769 = vmatprep.subr.mxu1 %v12629_v0  ;;  %7780 = vmatprep.subr.mxu0 %v12629_v0 }
  0x6e   :  { %7770 = vmatpush3.msra.mxu1 %v10035_v13  ;;  %7781 = vmatpush3.msra.mxu0 %v231_v24 }
  0x6f   :  { %7771 = vmatprep.subr.mxu1 %v12629_v0  ;;  %7782 = vmatprep.subr.mxu0 %v12629_v0 }
  0x70   :  { %7772 = vmatpush3.msra.mxu1 %v10047_v32  ;;  %7773 = vmatprep.mubr.msk.f32.mxu1 %vm9852_vm0, %v12629_v0 }
  0x71   :  { %7783 = vmatpush3.msra.mxu0 %v238_v27  ;;  %7774 = vmatmul.mubr.f32.vlgmr.msra.gmra.mxu1 %v206_v42  ;;  %v10282_v27 = vand.u32 4294901760, %v77_v21 }
  0x72   :  { %7784 = vmatprep.subr.mxu0 %v12629_v0  ;;  %7811 = vmatprep.subr.mxu1 %v12629_v0 }
  0x73   :  { %7785 = vmatpush3.msra.mxu0 %v245_v29  ;;  %7812 = vmatpush3.msra.mxu1 %v9909_v4  ;;  %v82_v4 = vld [vmem:[#allocation5 + $0x78] sm:$0xff]  ;;  %v10316_v55 = vsub.f32 %v77_v21, %v10282_v27  ;;  %v67_v21 = vld [vmem:[#allocation5] sm:$0xff] }
  0x74   :  { %7786 = vmatprep.subr.mxu0 %v12629_v0  ;;  %7813 = vmatprep.subr.mxu1 %v12629_v0 }
  0x75   :  { %7787 = vmatpush3.msra.mxu0 %v252_v40  ;;  %7814 = vmatpush3.msra.mxu1 %v9911_v5  ;;  %v81_v5 = vld [vmem:[#allocation5 + $0x70] sm:$0xff]  ;;  %v10346_v31 = vand.u32 4294901760, %v10316_v55 }
  0x76   :  { %7788 = vmatprep.subr.mxu0 %v12629_v0  ;;  %7815 = vmatprep.subr.mxu1 %v12629_v0 }
  0x77   :  { %7789 = vmatpush3.msra.mxu0 %v259_v46  ;;  %7816 = vmatpush3.msra.mxu1 %v9913_v6  ;;  %v10235_v6 = vand.u32 4294901760, %v82_v4  ;;  %v889_v56 = vsub.f32 %v10316_v55, %v10346_v31 }
  0x78   :  { %7790 = vmatprep.subr.mxu0 %v12629_v0  ;;  %7817 = vmatprep.subr.mxu1 %v12629_v0 }
  0x79   :  { %7791 = vmatpush3.msra.mxu0 %v266_v53  ;;  %7818 = vmatpush3.msra.mxu1 %v9915_v10  ;;  %v80_v10 = vld [vmem:[#allocation5 + $0x68] sm:$0xff]  ;;  %v10252_v16 = vsub.f32 %v82_v4, %v10235_v6  ;;  %v73_v53 = vld [vmem:[#allocation5 + $0x30] sm:$0xff]  ;;  %v10403_v39 = vand.u32 4294901760, %v889_v56 }
  0x7a   :  { %7792 = vmatprep.subr.mxu0 %v12629_v0  ;;  %7819 = vmatprep.subr.mxu1 %v12629_v0  ;;  %v10249_v15 = vand.u32 4294901760, %v80_v10 }
  0x7b   :  { %7793 = vmatpush3.msra.mxu0 %v273_v57  ;;  %7820 = vmatpush3.msra.mxu1 %v9917_v11  ;;  %v10242_v11 = vand.u32 4294901760, %v81_v5  ;;  %v10273_v23 = vand.u32 4294901760, %v10252_v16  ;;  %v10320_v57 = vand.u32 4294901760, %v74_v43  ;;  %12649 = vst [vmem:[#allocation17_spill] sm:$0xff] %v10403_v39 }
  0x7c   :  { %7794 = vmatprep.subr.mxu0 %v12629_v0  ;;  %7821 = vmatprep.subr.mxu1 %v12629_v0  ;;  %v10276_v24 = vsub.f32 %v80_v10, %v10249_v15 }
  0x7d   :  { %7795 = vmatpush3.msra.mxu0 %v280_v3  ;;  %7822 = vmatpush3.msra.mxu1 %v9919_v12  ;;  %v79_v12 = vld [vmem:[#allocation5 + $0x60] sm:$0xff]  ;;  %v10262_v20 = vsub.f32 %v81_v5, %v10242_v11  ;;  %v854_v34 = vsub.f32 %v10252_v16, %v10273_v23  ;;  %v72_v3 = vld [vmem:[#allocation5 + $0x28] sm:$0xff]  ;;  %v10365_v49 = vsub.f32 %v74_v43, %v10320_v57  ;;  %v10415_v5 = vand.u32 4294901760, %v69_v14 }
  0x7e   :  { %7796 = vmatprep.subr.mxu0 %v12629_v0  ;;  %7823 = vmatprep.subr.mxu1 %v12629_v0  ;;  %v10259_v18 = vand.u32 4294901760, %v79_v12  ;;  %v10299_v40 = vand.u32 4294901760, %v10276_v24  ;;  %v10353_v38 = vand.u32 4294901760, %v72_v3 }
  0x7f   :  { %7797 = vmatpush3.msra.mxu0 %v287_v19  ;;  %7824 = vmatpush3.msra.mxu1 %v9928_v17  ;;  %v78_v17 = vld [vmem:[#allocation5 + $0x58] sm:$0xff] }
  0x80   :  { %7798 = vmatprep.subr.mxu0 %v12629_v0  ;;  %7825 = vmatprep.subr.mxu1 %v12629_v0  ;;  %v10270_v22 = vand.u32 4294901760, %v78_v17  ;;  %v10288_v29 = vsub.f32 %v79_v12, %v10259_v18  ;;  %v868_v61 = vsub.f32 %v10276_v24, %v10299_v40  ;;  %v10395_v33 = vsub.f32 %v72_v3, %v10353_v38 }
  0x81   :  { %7799 = vmatpush3.msra.mxu0 %v294_v37  ;;  %7826 = vmatpush3.msra.mxu1 %v9944_v25  ;;  %v76_v25 = vld [vmem:[#allocation5 + $0x48] sm:$0xff]  ;;  %v71_v37 = vld [vmem:[#allocation5 + $0x20] sm:$0xff] }
  0x82   :  { %7800 = vmatprep.subr.mxu0 %v12629_v0  ;;  %7827 = vmatprep.subr.mxu1 %v12629_v0 }
  0x83   :  { %7801 = vmatpush3.msra.mxu0 %v301_v44  ;;  %7828 = vmatpush3.msra.mxu1 %v9948_v28  ;;  %v10285_v28 = vand.u32 4294901760, %v10262_v20 }
  0x84   :  { %7802 = vmatprep.subr.mxu0 %v12629_v0  ;;  %7829 = vmatprep.subr.mxu1 %v12629_v0 }
  0x85   :  { %7803 = vmatpush3.msra.mxu0 %v308_v52  ;;  %7830 = vmatpush3.msra.mxu1 %v9968_v35  ;;  %v10296_v35 = vand.u32 4294901760, %v76_v25  ;;  %v861_v46 = vsub.f32 %v10262_v20, %v10285_v28  ;;  %v10369_v52 = vand.u32 4294901760, %v71_v37 }
  0x86   :  { %7804 = vmatprep.subr.mxu0 %v12629_v0  ;;  %7831 = vmatprep.subr.mxu1 %v12629_v0 }
  0x87   :  { %7805 = vmatpush3.msra.mxu0 %v315_v1  ;;  %7832 = vmatpush3.msra.mxu1 %v9983_v45  ;;  %v10302_v45 = vsub.f32 %v78_v17, %v10270_v22  ;;  %v10332_v8 = vsub.f32 %v76_v25, %v10296_v35  ;;  %v10341_v19 = vand.u32 4294901760, %v861_v46  ;;  %v10411_v4 = vsub.f32 %v71_v37, %v10369_v52 }
  0x88   :  { %7806 = vmatprep.subr.mxu0 %v12629_v0  ;;  %7833 = vmatprep.subr.mxu1 %v12629_v0  ;;  %v10424_v17 = vand.u32 4294901760, %v10395_v33  ;;  %v10428_v25 = vand.u32 4294901760, %v68_v51 }
  0x89   :  { %7807 = vmatpush3.msra.mxu0 %v322_v9  ;;  %7808 = vmatprep.mubr.msk.f32.mxu0 %vm9852_vm0, %v12629_v0  ;;  %12645 = vst [vmem:[#allocation13_spill] sm:$0xff] %v10341_v19  ;;  %v10362_v44 = vand.u32 4294901760, %v10332_v8  ;;  %v10392_v9 = vand.u32 4294901760, %v10365_v49  ;;  %v10440_v46 = vand.u32 4294901760, %v10411_v4 }
  0x8a   :  { %7834 = vmatpush3.msra.mxu1 %v9991_v48  ;;  %7809 = vmatmul.mubr.f32.vlgmr.msra.gmra.mxu0 %v10016_v62  ;;  %v10313_v48 = vand.u32 4294901760, %v10288_v29  ;;  %12652 = vst [vmem:[#allocation20_spill] sm:$0xff] %v10424_v17 }
  0x8b   :  { %7835 = vmatprep.subr.mxu1 %v12629_v0  ;;  %7846 = vmatprep.subr.mxu0 %v12629_v0  ;;  %v896_v7 = vsub.f32 %v10332_v8, %v10362_v44  ;;  %v910_v12 = vsub.f32 %v10365_v49, %v10392_v9  ;;  %12654 = vst [vmem:[#allocation22_spill] sm:$0xff] %v10440_v46 }
  0x8c   :  { %7836 = vmatpush3.msra.mxu1 %v10011_v59  ;;  %7847 = vmatpush3.msra.mxu0 %v10235_v6  ;;  %v10324_v59 = vand.u32 4294901760, %v854_v34  ;;  %v875_v26 = vsub.f32 %v10288_v29, %v10313_v48 }
  0x8d   :  { %7837 = vmatprep.subr.mxu1 %v12629_v0  ;;  %7848 = vmatprep.subr.mxu0 %v12629_v0  ;;  %v10419_v10 = vand.u32 4294901760, %v896_v7  ;;  %v10451_v3 = vand.u32 4294901760, %v910_v12 }
  0x8e   :  { %7838 = vmatpush3.msra.mxu1 %v10020_v63  ;;  %7849 = vmatpush3.msra.mxu0 %v10242_v11  ;;  %12644 = vst [vmem:[#allocation12_spill] sm:$0xff] %v10324_v59  ;;  %v10329_v63 = vand.u32 4294901760, %v10302_v45  ;;  %v10373_v54 = vand.u32 4294901760, %v875_v26  ;;  %v924_v26 = vsub.f32 %v10395_v33, %v10424_v17 }
  0x8f   :  { %7839 = vmatprep.subr.mxu1 %v12629_v0  ;;  %7850 = vmatprep.subr.mxu0 %v12629_v0  ;;  %12651 = vst [vmem:[#allocation19_spill] sm:$0xff] %v10419_v10  ;;  %12655 = vst [vmem:[#allocation23_spill] sm:$0xff] %v10451_v3 }
  0x90   :  { %7840 = vmatpush3.msra.mxu1 %v10035_v13  ;;  %7851 = vmatpush3.msra.mxu0 %v10249_v15  ;;  %v10337_v13 = vand.u32 4294901760, %v73_v53  ;;  %v882_v42 = vsub.f32 %v10302_v45, %v10329_v63  ;;  %12647 = vst [vmem:[#allocation15_spill] sm:$0xff] %v10373_v54 }
  0x91   :  { %7841 = vmatprep.subr.mxu1 %v12629_v0  ;;  %7852 = vmatprep.subr.mxu0 %v12629_v0 }
  0x92   :  { %7842 = vmatpush3.msra.mxu1 %v10047_v32  ;;  %7843 = vmatprep.mubr.msk.f32.mxu1 %vm9852_vm0, %v12629_v0  ;;  %v10349_v32 = vsub.f32 %v75_v30, %v10310_v47  ;;  %v10381_v1 = vsub.f32 %v73_v53, %v10337_v13  ;;  %v10387_v2 = vand.u32 4294901760, %v882_v42  ;;  %v10431_v30 = vsub.f32 %v70_v60, %v10399_v36 }
  0x93   :  { %7853 = vmatpush3.msra.mxu0 %v10259_v18  ;;  %7844 = vmatmul.mubr.f32.vlgmr.msra.gmra.mxu1 %v10016_v62  ;;  %v10357_v62 = vand.u32 4294901760, %v868_v61  ;;  %v10444_v53 = vand.u32 4294901760, %v67_v21  ;;  %v10447_v61 = vsub.f32 %v69_v14, %v10415_v5  ;;  %v10461_v42 = vsub.f32 %v68_v51, %v10428_v25 }
  0x94   :  { %7854 = vmatprep.subr.mxu0 %v12629_v0  ;;  %7881 = vmatprep.subr.mxu1 %v12629_v0  ;;  %v10378_v58 = vand.u32 4294901760, %v10349_v32  ;;  %12648 = vst [vmem:[#allocation16_spill] sm:$0xff] %v10387_v2  ;;  %v10408_v50 = vand.u32 4294901760, %v10381_v1  ;;  %v10458_v37 = vand.u32 4294901760, %v10431_v30  ;;  %v931_v60 = vsub.f32 %v10411_v4, %v10440_v46 }
  0x95   :  { %7855 = vmatpush3.msra.mxu0 %v10270_v22  ;;  %7882 = vmatpush3.msra.mxu1 %v10324_v59  ;;  %12646 = vst [vmem:[#allocation14_spill] sm:$0xff] %v10357_v62  ;;  %v10472_v7 = vand.u32 4294901760, %v10447_v61  ;;  %v10475_v14 = vsub.f32 %v67_v21, %v10444_v53  ;;  %v10486_v12 = vand.u32 4294901760, %v10461_v42 }
  0x96   :  { %7856 = vmatprep.subr.mxu0 %v12629_v0  ;;  %7883 = vmatprep.subr.mxu1 %v12629_v0  ;;  %v903_v41 = vsub.f32 %v10349_v32, %v10378_v58  ;;  %12650 = vst [vmem:[#allocation18_spill] sm:$0xff] %v10408_v50  ;;  %v917_v43 = vsub.f32 %v10381_v1, %v10408_v50  ;;  %12656 = vst [vmem:[#allocation24_spill] sm:$0xff] %v10458_v37  ;;  %v10490_v21 = vand.u32 4294901760, %v931_v60 }
  0x97   :  { %7857 = vmatpush3.msra.mxu0 %v10282_v27  ;;  %7884 = vmatpush3.msra.mxu1 %v10341_v19  ;;  %12658 = vst [vmem:[#allocation26_spill] sm:$0xff] %v10472_v7  ;;  %v938_v51 = vsub.f32 %v10431_v30, %v10458_v37  ;;  %12660 = vst [vmem:[#allocation28_spill] sm:$0xff] %v10486_v12 }
  0x98   :  { %7858 = vmatprep.subr.mxu0 %v12629_v0  ;;  %7885 = vmatprep.subr.mxu1 %v12629_v0  ;;  %v10435_v34 = vand.u32 4294901760, %v903_v41  ;;  %v10465_v56 = vand.u32 4294901760, %v917_v43  ;;  %v10479_v41 = vand.u32 4294901760, %v924_v26  ;;  %12661 = vst [vmem:[#allocation29_spill] sm:$0xff] %v10490_v21  ;;  %v945_v43 = vsub.f32 %v10447_v61, %v10472_v7 }
  0x99   :  { %7859 = vmatpush3.msra.mxu0 %v10296_v35  ;;  %7886 = vmatpush3.msra.mxu1 %v10357_v62  ;;  %v10497_v26 = vand.u32 4294901760, %v10475_v14  ;;  %v10503_v60 = vand.u32 4294901760, %v938_v51 }
  0x9a   :  { %7860 = vmatprep.subr.mxu0 %v12629_v0  ;;  %7887 = vmatprep.subr.mxu1 %v12629_v0  ;;  %12653 = vst [vmem:[#allocation21_spill] sm:$0xff] %v10435_v34  ;;  %12657 = vst [vmem:[#allocation25_spill] sm:$0xff] %v10465_v56 }
  0x9b   :  { %7861 = vmatpush3.msra.mxu0 %v10310_v47  ;;  %7888 = vmatpush3.msra.mxu1 %v10373_v54  ;;  %12659 = vst [vmem:[#allocation27_spill] sm:$0xff] %v10479_v41  ;;  %12662 = vst [vmem:[#allocation30_spill] sm:$0xff] %v10497_v26 }
  0x9c   :  { %7862 = vmatprep.subr.mxu0 %v12629_v0  ;;  %7889 = vmatprep.subr.mxu1 %v12629_v0  ;;  %12663 = vst [vmem:[#allocation31_spill] sm:$0xff] %v10503_v60 }
  0x9d   :  { %7863 = vmatpush3.msra.mxu0 %v10320_v57  ;;  %7890 = vmatpush3.msra.mxu1 %v10387_v2 }
  0x9e   :  { %7864 = vmatprep.subr.mxu0 %v12629_v0  ;;  %7891 = vmatprep.subr.mxu1 %v12629_v0 }
  0x9f   :  { %7865 = vmatpush3.msra.mxu0 %v10337_v13  ;;  %7892 = vmatpush3.msra.mxu1 %v10403_v39 }
  0xa0   :  { %7866 = vmatprep.subr.mxu0 %v12629_v0  ;;  %7893 = vmatprep.subr.mxu1 %v12629_v0 }
  0xa1   :  { %7867 = vmatpush3.msra.mxu0 %v10353_v38  ;;  %7894 = vmatpush3.msra.mxu1 %v10419_v10 }
  0xa2   :  { %7868 = vmatprep.subr.mxu0 %v12629_v0  ;;  %7895 = vmatprep.subr.mxu1 %v12629_v0 }
  0xa3   :  { %7869 = vmatpush3.msra.mxu0 %v10369_v52  ;;  %7896 = vmatpush3.msra.mxu1 %v10435_v34 }
  0xa4   :  { %7870 = vmatprep.subr.mxu0 %v12629_v0  ;;  %7897 = vmatprep.subr.mxu1 %v12629_v0 }
  0xa5   :  { %7871 = vmatpush3.msra.mxu0 %v10399_v36  ;;  %7898 = vmatpush3.msra.mxu1 %v10451_v3  ;;  %v10512_v3 = vand.u32 4294901760, %v945_v43 }
  0xa6   :  { %7872 = vmatprep.subr.mxu0 %v12629_v0  ;;  %7899 = vmatprep.subr.mxu1 %v12629_v0 }
  0xa7   :  { %7873 = vmatpush3.msra.mxu0 %v10415_v5  ;;  %7900 = vmatpush3.msra.mxu1 %v10465_v56  ;;  %v952_v56 = vsub.f32 %v10461_v42, %v10486_v12  ;;  %12664 = vst [vmem:[#allocation32_spill] sm:$0xff] %v10512_v3 }
  0xa8   :  { %7874 = vmatprep.subr.mxu0 %v12629_v0  ;;  %7901 = vmatprep.subr.mxu1 %v12629_v0 }
  0xa9   :  { %7875 = vmatpush3.msra.mxu0 %v10428_v25  ;;  %7902 = vmatpush3.msra.mxu1 %v10479_v41  ;;  %v959_v41 = vsub.f32 %v10475_v14, %v10497_v26  ;;  %v10520_v51 = vand.u32 4294901760, %v952_v56 }
  0xaa   :  { %7876 = vmatprep.subr.mxu0 %v12629_v0  ;;  %7903 = vmatprep.subr.mxu1 %v12629_v0 }
  0xab   :  { %7877 = vmatpush3.msra.mxu0 %v10444_v53  ;;  %7904 = vmatpush3.msra.mxu1 %v10490_v21  ;;  %12665 = vst [vmem:[#allocation33_spill] sm:$0xff] %v10520_v51  ;;  %v10526_v43 = vand.u32 4294901760, %v959_v41  ;;  %v6615_v41 = vld [vmem:[%s12585_s4] ss:$0 sm:$0xff]  ;;  %s9853_s4 = smov [#allocation8]  }
  0xac   :  { %7878 = vmatprep.mubr.msk.f32.mxu0 %vm9852_vm0, %v12629_v0  ;;  %7905 = vmatprep.subr.mxu1 %v12629_v0  ;;  %s6601_s18 = sshll.u32 %s9853_s4, 4  ;;  %s6602_s18 = int_to_ptr.vmem [resolvable:$true] %s6601_s18 }
  0xad   :  { %7916 = vmatprep.subr.mxu0 %v12629_v0  ;;  %7879 = vmatmul.mubr.f32.vlgmr.msra.gmra.mxu0 %v12629_v0  ;;  %12666 = vst [vmem:[#allocation34_spill] sm:$0xff] %v10526_v43  ;;  %s9820_s19 = scalar_lea.vmem %s6602_s18, 128  ;;  %p9825_p2 = scmp.lt.s32.totalorder %s6602_s18, %s6602_s18 }
  0xae   :  { %7906 = vmatpush3.msra.mxu1 %v10503_v60  ;;  %7917 = vmatpush3.msra.mxu0 %v10252_v16  ;;  %p9821_p1 = scmp.ne.s32.totalorder %s6602_s18, %s9820_s19  ;;  %p9826_p3 = scmp.lt.s32.totalorder %s9820_s19, %s9820_s19 }
  0xaf   :  { %7907 = vmatprep.subr.mxu1 %v12629_v0  ;;  %7918 = vmatprep.subr.mxu0 %v12629_v0 }
  0xb0   :  { %7908 = vmatpush3.msra.mxu1 %v10512_v3  ;;  %7919 = vmatpush3.msra.mxu0 %v10262_v20  ;;  %p9827_p4 = por %p9826_p3, %p9825_p2 }
  0xb1   :  { %7909 = vmatprep.subr.mxu1 %v12629_v0  ;;  %7920 = vmatprep.subr.mxu0 %v12629_v0 }
  0xb2   :  { %7910 = vmatpush3.msra.mxu1 %v10520_v51  ;;  %7921 = vmatpush3.msra.mxu0 %v10276_v24  ;;  %p9828_p5 = pnand %p9827_p4, %p9821_p1 }
  0xb3   :  { %7911 = vmatprep.subr.mxu1 %v12629_v0  ;;  %7922 = vmatprep.subr.mxu0 %v12629_v0 }
  0xb4   :  { %7912 = vmatpush3.msra.mxu1 %v10526_v43  ;;  %7913 = vmatprep.mubr.msk.f32.mxu1 %vm9852_vm0, %v12629_v0 }
  0xb5   :  { %7923 = vmatpush3.msra.mxu0 %v10288_v29  ;;  %7914 = vmatmul.mubr.f32.vlgmr.msra.gmra.mxu1 %v12629_v0 }
  0xb6   :  { %7924 = vmatprep.subr.mxu0 %v12629_v0  ;;  %7951 = vmatprep.subr.mxu1 %v12629_v0 }
  0xb7   :  { %7925 = vmatpush3.msra.mxu0 %v10302_v45  ;;  %7952 = vmatpush3.msra.mxu1 %v10235_v6 }
  0xb8   :  { %7926 = vmatprep.subr.mxu0 %v12629_v0  ;;  %7953 = vmatprep.subr.mxu1 %v12629_v0 }
  0xb9   :  { %7927 = vmatpush3.msra.mxu0 %v10316_v55  ;;  %7954 = vmatpush3.msra.mxu1 %v10242_v11 }
  0xba   :  { %7928 = vmatprep.subr.mxu0 %v12629_v0  ;;  %7955 = vmatprep.subr.mxu1 %v12629_v0 }
  0xbb   :  { %7929 = vmatpush3.msra.mxu0 %v10332_v8  ;;  %7956 = vmatpush3.msra.mxu1 %v10249_v15 }
  0xbc   :  { %7930 = vmatprep.subr.mxu0 %v12629_v0  ;;  %7957 = vmatprep.subr.mxu1 %v12629_v0 }
  0xbd   :  { %7931 = vmatpush3.msra.mxu0 %v10349_v32  ;;  %7958 = vmatpush3.msra.mxu1 %v10259_v18 }
  0xbe   :  { %7932 = vmatprep.subr.mxu0 %v12629_v0  ;;  %7959 = vmatprep.subr.mxu1 %v12629_v0 }
  0xbf   :  { %7933 = vmatpush3.msra.mxu0 %v10365_v49  ;;  %7960 = vmatpush3.msra.mxu1 %v10270_v22 }
  0xc0   :  { %7934 = vmatprep.subr.mxu0 %v12629_v0  ;;  %7961 = vmatprep.subr.mxu1 %v12629_v0 }
  0xc1   :  { %7935 = vmatpush3.msra.mxu0 %v10381_v1  ;;  %7962 = vmatpush3.msra.mxu1 %v10282_v27 }
  0xc2   :  { %7936 = vmatprep.subr.mxu0 %v12629_v0  ;;  %7963 = vmatprep.subr.mxu1 %v12629_v0 }
  0xc3   :  { %7937 = vmatpush3.msra.mxu0 %v10395_v33  ;;  %7964 = vmatpush3.msra.mxu1 %v10296_v35 }
  0xc4   :  { %7938 = vmatprep.subr.mxu0 %v12629_v0  ;;  %7965 = vmatprep.subr.mxu1 %v12629_v0 }
  0xc5   :  { %7939 = vmatpush3.msra.mxu0 %v10411_v4  ;;  %7966 = vmatpush3.msra.mxu1 %v10310_v47 }
  0xc6   :  { %7940 = vmatprep.subr.mxu0 %v12629_v0  ;;  %7967 = vmatprep.subr.mxu1 %v12629_v0 }
  0xc7   :  { %7941 = vmatpush3.msra.mxu0 %v10431_v30  ;;  %7968 = vmatpush3.msra.mxu1 %v10320_v57 }
  0xc8   :  { %7942 = vmatprep.subr.mxu0 %v12629_v0  ;;  %7969 = vmatprep.subr.mxu1 %v12629_v0 }
  0xc9   :  { %7943 = vmatpush3.msra.mxu0 %v10447_v61  ;;  %7970 = vmatpush3.msra.mxu1 %v10337_v13 }
  0xca   :  { %7944 = vmatprep.subr.mxu0 %v12629_v0  ;;  %7971 = vmatprep.subr.mxu1 %v12629_v0 }
  0xcb   :  { %7945 = vmatpush3.msra.mxu0 %v10461_v42  ;;  %7972 = vmatpush3.msra.mxu1 %v10353_v38 }
  0xcc   :  { %7946 = vmatprep.subr.mxu0 %v12629_v0  ;;  %7973 = vmatprep.subr.mxu1 %v12629_v0 }
  0xcd   :  { %7947 = vmatpush3.msra.mxu0 %v10475_v14  ;;  %7948 = vmatprep.mubr.msk.f32.mxu0 %vm9852_vm0, %v12629_v0 }
  0xce   :  { %7974 = vmatpush3.msra.mxu1 %v10369_v52  ;;  %7949 = vmatmul.mubr.f32.vlgmr.msra.gmra.mxu0 %v12629_v0 }
  0xcf   :  { %7975 = vmatprep.subr.mxu1 %v12629_v0  ;;  %7986 = vmatprep.subr.mxu0 %v12629_v0 }
  0xd0   :  { %7976 = vmatpush3.msra.mxu1 %v10399_v36  ;;  %7987 = vmatpush3.msra.mxu0 %v10273_v23 }
  0xd1   :  { %7977 = vmatprep.subr.mxu1 %v12629_v0  ;;  %7988 = vmatprep.subr.mxu0 %v12629_v0 }
  0xd2   :  { %7978 = vmatpush3.msra.mxu1 %v10415_v5  ;;  %7989 = vmatpush3.msra.mxu0 %v10285_v28 }
  0xd3   :  { %7979 = vmatprep.subr.mxu1 %v12629_v0  ;;  %7990 = vmatprep.subr.mxu0 %v12629_v0 }
  0xd4   :  { %7980 = vmatpush3.msra.mxu1 %v10428_v25  ;;  %7991 = vmatpush3.msra.mxu0 %v10299_v40 }
  0xd5   :  { %7981 = vmatprep.subr.mxu1 %v12629_v0  ;;  %7992 = vmatprep.subr.mxu0 %v12629_v0 }
  0xd6   :  { %7982 = vmatpush3.msra.mxu1 %v10444_v53  ;;  %7983 = vmatprep.mubr.msk.f32.mxu1 %vm9852_vm0, %v12629_v0 }
  0xd7   :  { %7993 = vmatpush3.msra.mxu0 %v10313_v48  ;;  %7984 = vmatmul.mubr.f32.vlgmr.msra.gmra.mxu1 %v12629_v0 }
  0xd8   :  { %7994 = vmatprep.subr.mxu0 %v12629_v0  ;;  %8021 = vmatprep.subr.mxu1 %v12629_v0 }
  0xd9   :  { %7995 = vmatpush3.msra.mxu0 %v10329_v63  ;;  %8022 = vmatpush3.msra.mxu1 %v10235_v6 }
  0xda   :  { %7996 = vmatprep.subr.mxu0 %v12629_v0  ;;  %8023 = vmatprep.subr.mxu1 %v12629_v0 }
  0xdb   :  { %7997 = vmatpush3.msra.mxu0 %v10346_v31  ;;  %8024 = vmatpush3.msra.mxu1 %v10242_v11 }
  0xdc   :  { %7998 = vmatprep.subr.mxu0 %v12629_v0  ;;  %8025 = vmatprep.subr.mxu1 %v12629_v0 }
  0xdd   :  { %7999 = vmatpush3.msra.mxu0 %v10362_v44  ;;  %8026 = vmatpush3.msra.mxu1 %v10249_v15 }
  0xde   :  { %8000 = vmatprep.subr.mxu0 %v12629_v0  ;;  %8027 = vmatprep.subr.mxu1 %v12629_v0 }
  0xdf   :  { %8001 = vmatpush3.msra.mxu0 %v10378_v58  ;;  %8028 = vmatpush3.msra.mxu1 %v10259_v18 }
  0xe0   :  { %8002 = vmatprep.subr.mxu0 %v12629_v0  ;;  %8029 = vmatprep.subr.mxu1 %v12629_v0 }
  0xe1   :  { %8003 = vmatpush3.msra.mxu0 %v10392_v9  ;;  %8030 = vmatpush3.msra.mxu1 %v10270_v22 }
  0xe2   :  { %8004 = vmatprep.subr.mxu0 %v12629_v0  ;;  %8031 = vmatprep.subr.mxu1 %v12629_v0 }
  0xe3   :  { %8005 = vmatpush3.msra.mxu0 %v10408_v50  ;;  %8032 = vmatpush3.msra.mxu1 %v10282_v27 }
  0xe4   :  { %8006 = vmatprep.subr.mxu0 %v12629_v0  ;;  %8033 = vmatprep.subr.mxu1 %v12629_v0 }
  0xe5   :  { %8007 = vmatpush3.msra.mxu0 %v10424_v17  ;;  %8034 = vmatpush3.msra.mxu1 %v10296_v35 }
  0xe6   :  { %8008 = vmatprep.subr.mxu0 %v12629_v0  ;;  %8035 = vmatprep.subr.mxu1 %v12629_v0 }
  0xe7   :  { %8009 = vmatpush3.msra.mxu0 %v10440_v46  ;;  %8036 = vmatpush3.msra.mxu1 %v10310_v47 }
  0xe8   :  { %8010 = vmatprep.subr.mxu0 %v12629_v0  ;;  %8037 = vmatprep.subr.mxu1 %v12629_v0 }
  0xe9   :  { %8011 = vmatpush3.msra.mxu0 %v10458_v37  ;;  %8038 = vmatpush3.msra.mxu1 %v10320_v57 }
  0xea   :  { %8012 = vmatprep.subr.mxu0 %v12629_v0  ;;  %8039 = vmatprep.subr.mxu1 %v12629_v0 }
  0xeb   :  { %8013 = vmatpush3.msra.mxu0 %v10472_v7  ;;  %8040 = vmatpush3.msra.mxu1 %v10337_v13 }
  0xec   :  { %8014 = vmatprep.subr.mxu0 %v12629_v0  ;;  %8041 = vmatprep.subr.mxu1 %v12629_v0 }
  0xed   :  { %8015 = vmatpush3.msra.mxu0 %v10486_v12  ;;  %8042 = vmatpush3.msra.mxu1 %v10353_v38 }
  0xee   :  { %8016 = vmatprep.subr.mxu0 %v12629_v0  ;;  %8043 = vmatprep.subr.mxu1 %v12629_v0 }
  0xef   :  { %8017 = vmatpush3.msra.mxu0 %v10497_v26  ;;  %8018 = vmatprep.mubr.msk.f32.mxu0 %vm9852_vm0, %v12629_v0 }
  0xf0   :  { %8044 = vmatpush3.msra.mxu1 %v10369_v52  ;;  %8019 = vmatmul.mubr.f32.vlgmr.msra.gmra.mxu0 %v12629_v0 }
  0xf1   :  { %8045 = vmatprep.subr.mxu1 %v12629_v0  ;;  %8053 = vmatprep.mubr.msk.f32.mxu1 %vm9852_vm0, %v12629_v0 }
  0xf2   :  { %8046 = vmatpush3.msra.mxu1 %v10399_v36  ;;  %8056 = vmatprep.subr.mxu0 %v12629_v0 }
  0xf3   :  { %8047 = vmatprep.subr.mxu1 %v12629_v0  ;;  %8057 = vmatpush3.msra.mxu0 %v10235_v6 }
  0xf4   :  { %8048 = vmatpush3.msra.mxu1 %v10415_v5  ;;  %8058 = vmatprep.subr.mxu0 %v12629_v0 }
  0xf5   :  { %8049 = vmatprep.subr.mxu1 %v12629_v0  ;;  %8059 = vmatpush3.msra.mxu0 %v10242_v11 }
  0xf6   :  { %8050 = vmatpush3.msra.mxu1 %v10428_v25  ;;  %8060 = vmatprep.subr.mxu0 %v12629_v0 }
  0xf7   :  { %8051 = vmatprep.subr.mxu1 %v12629_v0  ;;  %8061 = vmatpush3.msra.mxu0 %v10249_v15 }
  0xf8   :  { %8052 = vmatpush3.msra.mxu1 %v10444_v53  ;;  %8062 = vmatprep.subr.mxu0 %v12629_v0 }
  0xf9   :  { %8054 = vmatmul.mubr.f32.vlgmr.msra.gmra.mxu1 %v12629_v0  ;;  %8091 = vmatprep.subr.mxu1 %v12629_v0 }
  0xfa   :  { %8092 = vmatpush3.msra.mxu1 %v10324_v59  ;;  %8063 = vmatpush3.msra.mxu0 %v10259_v18 }
  0xfb   :  { %8093 = vmatprep.subr.mxu1 %v12629_v0  ;;  %8064 = vmatprep.subr.mxu0 %v12629_v0 }
  0xfc   :  { %8094 = vmatpush3.msra.mxu1 %v10341_v19  ;;  %8065 = vmatpush3.msra.mxu0 %v10270_v22 }
  0xfd   :  { %8095 = vmatprep.subr.mxu1 %v12629_v0  ;;  %8066 = vmatprep.subr.mxu0 %v12629_v0 }
  0xfe   :  { %8096 = vmatpush3.msra.mxu1 %v10357_v62  ;;  %8067 = vmatpush3.msra.mxu0 %v10282_v27 }
  0xff   :  { %8097 = vmatprep.subr.mxu1 %v12629_v0  ;;  %8068 = vmatprep.subr.mxu0 %v12629_v0 }
 0x100   :  { %8098 = vmatpush3.msra.mxu1 %v10373_v54  ;;  %8069 = vmatpush3.msra.mxu0 %v10296_v35  ;;  %v12669_v54 = vld [vmem:[#allocation27_spill] sm:$0xff] }
 0x101   :  { %8099 = vmatprep.subr.mxu1 %v12629_v0  ;;  %8070 = vmatprep.subr.mxu0 %v12629_v0 }
 0x102   :  { %8100 = vmatpush3.msra.mxu1 %v10387_v2  ;;  %8071 = vmatpush3.msra.mxu0 %v10310_v47  ;;  %v12668_v2 = vld [vmem:[#allocation25_spill] sm:$0xff] }
 0x103   :  { %8101 = vmatprep.subr.mxu1 %v12629_v0  ;;  %8072 = vmatprep.subr.mxu0 %v12629_v0 }
 0x104   :  { %8102 = vmatpush3.msra.mxu1 %v10403_v39  ;;  %8073 = vmatpush3.msra.mxu0 %v10320_v57  ;;  %v12667_v39 = vld [vmem:[#allocation23_spill] sm:$0xff] }
 0x105   :  { %8103 = vmatprep.subr.mxu1 %v12629_v0  ;;  %8074 = vmatprep.subr.mxu0 %v12629_v0 }
 0x106   :  { %8104 = vmatpush3.msra.mxu1 %v10419_v10  ;;  %8075 = vmatpush3.msra.mxu0 %v10337_v13 }
 0x107   :  { %8105 = vmatprep.subr.mxu1 %v12629_v0  ;;  %8076 = vmatprep.subr.mxu0 %v12629_v0 }
 0x108   :  { %v210_v56 = vpop.f32.mrf.mxu0  ;;  %8106 = vmatpush3.msra.mxu1 %v10435_v34  ;;  %8077 = vmatpush3.msra.mxu0 %v10353_v38 }
 0x109   :  { %8107 = vmatprep.subr.mxu1 %v12629_v0  ;;  %8078 = vmatprep.subr.mxu0 %v12629_v0  ;;  %v211_v34 = vadd.f32 %v6615_v41, %v210_v56 }
 0x10a   :  { %v7670_v10 = vpop.f32.mrf.mxu0  ;;  %8108 = vmatpush3.msra.mxu1 %v12667_v39  ;;  %8079 = vmatpush3.msra.mxu0 %v10369_v52 }
 0x10b   :  { %8109 = vmatprep.subr.mxu1 %v12629_v0  ;;  %8080 = vmatprep.subr.mxu0 %v12629_v0 }
 0x10c   :  { %8110 = vmatpush3.msra.mxu1 %v12668_v2  ;;  %8123 = vmatprep.mubr.msk.f32.mxu1 %vm9852_vm0, %v12629_v0 }
 0x10d   :  { %8111 = vmatprep.subr.mxu1 %v12629_v0  ;;  %8081 = vmatpush3.msra.mxu0 %v10399_v36 }
 0x10e   :  { %8112 = vmatpush3.msra.mxu1 %v12669_v54  ;;  %8082 = vmatprep.subr.mxu0 %v12629_v0 }
 0x10f   :  { %v361_v10 = vpop.f32.mrf.mxu1  ;;  %8113 = vmatprep.subr.mxu1 %v12629_v0  ;;  %8083 = vmatpush3.msra.mxu0 %v10415_v5 }
 0x110   :  { %v362_v39 = vadd.f32 %v361_v10, %v211_v34  ;;  %8114 = vmatpush3.msra.mxu1 %v10490_v21  ;;  %8084 = vmatprep.subr.mxu0 %v12629_v0 }
 0x111   :  { %v7705_v56 = vpop.f32.mrf.mxu1  ;;  %8115 = vmatprep.subr.mxu1 %v12629_v0  ;;  %8085 = vmatpush3.msra.mxu0 %v10428_v25 }
 0x112   :  { %8116 = vmatpush3.msra.mxu1 %v10503_v60  ;;  %8086 = vmatprep.subr.mxu0 %v12629_v0 }
 0x113   :  { %8117 = vmatprep.subr.mxu1 %v12629_v0  ;;  %8087 = vmatpush3.msra.mxu0 %v10444_v53 }
 0x114   :  { %8118 = vmatpush3.msra.mxu1 %v10512_v3  ;;  %8088 = vmatprep.mubr.msk.f32.mxu0 %vm9852_vm0, %v12629_v0 }
 0x115   :  { %8119 = vmatprep.subr.mxu1 %v12629_v0  ;;  %8126 = vmatprep.subr.mxu0 %v12629_v0 }
 0x116   :  { %8120 = vmatpush3.msra.mxu1 %v10520_v51 }
 0x117   :  { %8121 = vmatprep.subr.mxu1 %v12629_v0 }
 0x118   :  { %8122 = vmatpush3.msra.mxu1 %v10526_v43 }
 0x119   :  { %8161 = vmatprep.subr.mxu1 %v12629_v0 }
 0x128   :  { %v465_v34 = vpop.f32.mrf.mxu0 }
 0x129   :  { %v466_v41 = vadd.f32 %v465_v34, %v362_v39 }
 0x12a   :  { %v7740_v10 = vpop.f32.mrf.mxu0 }
 0x131   :  { %v554_v56 = vpop.f32.mrf.mxu1 }
 0x132   :  { %v555_v3 = vadd.f32 %v554_v56, %v466_v41 }
 0x133   :  { %v7775_v60 = vpop.f32.mrf.mxu1 }
 0x14a   :  { %v673_v21 = vpop.f32.mrf.mxu0 }
 0x14b   :  { %v674_v54 = vadd.f32 %v673_v21, %v555_v3 }
 0x14c   :  { %v7810_v2 = vpop.f32.mrf.mxu0 }
 0x153   :  { %v760_v62 = vpop.f32.mrf.mxu1 }
 0x154   :  { %v10744_v26 = vadd.f32 %v760_v62, %v674_v54 }
 0x155   :  { %v7845_v19 = vpop.f32.mrf.mxu1 }
 0x16d   :  { %v846_v51 = vpop.f32.mrf.mxu0 }
 0x16f   :  { %v7880_v12 = vpop.f32.mrf.mxu0 }
 0x170   :  { %v12672_v12 = vld [vmem:[#allocation22_spill] sm:$0xff] }
 0x175   :  { %v996_v59 = vpop.f32.mrf.mxu1 }
 0x176   :  { %v997_v34 = vadd.f32 %v996_v59, %v846_v51  ;;  %v12673_v51 = vld [vmem:[#allocation24_spill] sm:$0xff] }
 0x177   :  { %v7915_v7 = vpop.f32.mrf.mxu1 }
 0x18e   :  { %v1098_v43 = vpop.f32.mrf.mxu0 }
 0x18f   :  { %v1099_v41 = vadd.f32 %v1098_v43, %v997_v34  ;;  %v12674_v43 = vld [vmem:[#allocation26_spill] sm:$0xff]  ;;  %v12676_v34 = vld [vmem:[#allocation28_spill] sm:$0xff] }
 0x190   :  { %v7950_v37 = vpop.f32.mrf.mxu0 }
 0x197   :  { %v1184_v0 = vpop.f32.mrf.mxu1 }
 0x198   :  { %v1185_v60 = vadd.f32 %v1184_v0, %v1099_v41  ;;  %v12671_v0 = vmov 0.0   ;;  %v12678_v41 = vld [vmem:[#allocation30_spill] sm:$0xff] }
 0x199   :  { %v7985_v46 = vpop.f32.mrf.mxu1 }
 0x1b0   :  { %v1302_v39 = vpop.f32.mrf.mxu0 }
 0x1b1   :  { %v1303_v56 = vadd.f32 %v1302_v39, %v1185_v60  ;;  %v12675_v39 = vld [vmem:[#allocation12_spill] sm:$0xff]  ;;  %v12679_v60 = vld [vmem:[#allocation14_spill] sm:$0xff] }
 0x1b2   :  { %v8020_v10 = vpop.f32.mrf.mxu0 }
 0x1b3   :  { %v12677_v10 = vld [vmem:[#allocation13_spill] sm:$0xff] }
 0x1b9   :  { %v1388_v3 = vpop.f32.mrf.mxu1 }
 0x1ba   :  { %v1389_v2 = vadd.f32 %v1388_v3, %v1303_v56  ;;  %v12680_v56 = vld [vmem:[#allocation15_spill] sm:$0xff]  ;;  %v12681_v3 = vld [vmem:[#allocation16_spill] sm:$0xff] }
 0x1bb   :  { %v8055_v21 = vpop.f32.mrf.mxu1 }
 0x1bc   :  { %v1392_v62 = vadd.f32 %v1389_v2, %v10744_v26  ;;  %v12682_v2 = vld [vmem:[#allocation17_spill] sm:$0xff]  ;;  %v12683_v21 = vld [vmem:[#allocation19_spill] sm:$0xff] }
 0x1be   :  { %9744 = vtanh.f32 %v1392_v62  ;;  %v12684_v62 = vld [vmem:[#allocation21_spill] sm:$0xff] }
 0x1cb   :  { %v10747_v19 = vpop.eup %9744 }
 0x1cc   :  { %12670 = vst [vmem:[#allocation35_spill] sm:$0xff] %v10747_v19  ;;  %v10750_v54 = vand.u32 4294901760, %v10747_v19 }
 0x1ce   :  { %8124 = vmatmul.mubr.f32.vlgmr.msra.gmra.mxu1 %v10750_v54  ;;  %v10755_v59 = vsub.f32 %v10747_v19, %v10750_v54  ;;  %v12690_v19 = vld [vmem:[#allocation32_spill] sm:$0xff] }
 0x1cf   :  { %8162 = vmatpush3.msra.mxu1 %v10235_v6  ;;  %8193 = vmatprep.mubr.msk.f32.mxu1 %vm9852_vm0, %v12671_v0 }
 0x1d0   :  { %8163 = vmatprep.subr.mxu1 %v12671_v0  ;;  %v1477_v46 = vand.u32 4294901760, %v10755_v59 }
 0x1d1   :  { %8164 = vmatpush3.msra.mxu1 %v10242_v11 }
 0x1d2   :  { %8165 = vmatprep.subr.mxu1 %v12671_v0  ;;  %v1478_v37 = vsub.f32 %v10755_v59, %v1477_v46 }
 0x1d3   :  { %8166 = vmatpush3.msra.mxu1 %v10249_v15 }
 0x1d4   :  { %8167 = vmatprep.subr.mxu1 %v12671_v0  ;;  %v1479_v7 = vand.u32 4294901760, %v1478_v37  ;;  %v12688_v37 = vld [vmem:[#allocation29_spill] sm:$0xff] }
 0x1d5   :  { %8168 = vmatpush3.msra.mxu1 %v10259_v18 }
 0x1d6   :  { %8169 = vmatprep.subr.mxu1 %v12671_v0  ;;  %8089 = vmatmul.mubr.f32.vlgmr.msra.gmra.mxu0 %v1479_v7  ;;  %v12689_v7 = vld [vmem:[#allocation31_spill] sm:$0xff] }
 0x1d7   :  { %8127 = vmatpush3.msra.mxu0 %v10252_v16  ;;  %8170 = vmatpush3.msra.mxu1 %v10270_v22 }
 0x1d8   :  { %8128 = vmatprep.subr.mxu0 %v12671_v0  ;;  %8171 = vmatprep.subr.mxu1 %v12671_v0 }
 0x1d9   :  { %8129 = vmatpush3.msra.mxu0 %v10262_v20  ;;  %8172 = vmatpush3.msra.mxu1 %v10282_v27 }
 0x1da   :  { %8130 = vmatprep.subr.mxu0 %v12671_v0  ;;  %8173 = vmatprep.subr.mxu1 %v12671_v0 }
 0x1db   :  { %8131 = vmatpush3.msra.mxu0 %v10276_v24  ;;  %8174 = vmatpush3.msra.mxu1 %v10296_v35 }
 0x1dc   :  { %8132 = vmatprep.subr.mxu0 %v12671_v0  ;;  %8175 = vmatprep.subr.mxu1 %v12671_v0 }
 0x1dd   :  { %8133 = vmatpush3.msra.mxu0 %v10288_v29  ;;  %8176 = vmatpush3.msra.mxu1 %v10310_v47 }
 0x1de   :  { %8134 = vmatprep.subr.mxu0 %v12671_v0  ;;  %8177 = vmatprep.subr.mxu1 %v12671_v0 }
 0x1df   :  { %8135 = vmatpush3.msra.mxu0 %v10302_v45  ;;  %8178 = vmatpush3.msra.mxu1 %v10320_v57 }
 0x1e0   :  { %8136 = vmatprep.subr.mxu0 %v12671_v0  ;;  %8179 = vmatprep.subr.mxu1 %v12671_v0 }
 0x1e1   :  { %8137 = vmatpush3.msra.mxu0 %v10316_v55  ;;  %8180 = vmatpush3.msra.mxu1 %v10337_v13 }
 0x1e2   :  { %8138 = vmatprep.subr.mxu0 %v12671_v0  ;;  %8181 = vmatprep.subr.mxu1 %v12671_v0 }
 0x1e3   :  { %8139 = vmatpush3.msra.mxu0 %v10332_v8  ;;  %8182 = vmatpush3.msra.mxu1 %v10353_v38 }
 0x1e4   :  { %8140 = vmatprep.subr.mxu0 %v12671_v0  ;;  %8183 = vmatprep.subr.mxu1 %v12671_v0 }
 0x1e5   :  { %8141 = vmatpush3.msra.mxu0 %v10349_v32  ;;  %8184 = vmatpush3.msra.mxu1 %v10369_v52 }
 0x1e6   :  { %8142 = vmatprep.subr.mxu0 %v12671_v0  ;;  %8185 = vmatprep.subr.mxu1 %v12671_v0 }
 0x1e7   :  { %8143 = vmatpush3.msra.mxu0 %v10365_v49  ;;  %8186 = vmatpush3.msra.mxu1 %v10399_v36 }
 0x1e8   :  { %8144 = vmatprep.subr.mxu0 %v12671_v0  ;;  %8187 = vmatprep.subr.mxu1 %v12671_v0 }
 0x1e9   :  { %8145 = vmatpush3.msra.mxu0 %v10381_v1  ;;  %8188 = vmatpush3.msra.mxu1 %v10415_v5 }
 0x1ea   :  { %8146 = vmatprep.subr.mxu0 %v12671_v0  ;;  %8189 = vmatprep.subr.mxu1 %v12671_v0 }
 0x1eb   :  { %8147 = vmatpush3.msra.mxu0 %v10395_v33  ;;  %8190 = vmatpush3.msra.mxu1 %v10428_v25 }
 0x1ec   :  { %8148 = vmatprep.subr.mxu0 %v12671_v0  ;;  %8191 = vmatprep.subr.mxu1 %v12671_v0 }
 0x1ed   :  { %8149 = vmatpush3.msra.mxu0 %v10411_v4  ;;  %8192 = vmatpush3.msra.mxu1 %v10444_v53 }
 0x1ee   :  { %8150 = vmatprep.subr.mxu0 %v12671_v0  ;;  %8194 = vmatmul.mubr.f32.vlgmr.msra.gmra.mxu1 %v1477_v46  ;;  %v12687_v46 = vld [vmem:[#allocation27_spill] sm:$0xff] }
 0x1ef   :  { %8231 = vmatprep.subr.mxu1 %v12671_v0  ;;  %8151 = vmatpush3.msra.mxu0 %v10431_v30 }
 0x1f0   :  { %8232 = vmatpush3.msra.mxu1 %v10235_v6  ;;  %8152 = vmatprep.subr.mxu0 %v12671_v0 }
 0x1f1   :  { %8233 = vmatprep.subr.mxu1 %v12671_v0  ;;  %8153 = vmatpush3.msra.mxu0 %v10447_v61 }
 0x1f2   :  { %8234 = vmatpush3.msra.mxu1 %v10242_v11  ;;  %8154 = vmatprep.subr.mxu0 %v12671_v0 }
 0x1f3   :  { %8235 = vmatprep.subr.mxu1 %v12671_v0  ;;  %8155 = vmatpush3.msra.mxu0 %v10461_v42 }
 0x1f4   :  { %8236 = vmatpush3.msra.mxu1 %v10249_v15  ;;  %8156 = vmatprep.subr.mxu0 %v12671_v0 }
 0x1f5   :  { %8237 = vmatprep.subr.mxu1 %v12671_v0  ;;  %8157 = vmatpush3.msra.mxu0 %v10475_v14 }
 0x1f6   :  { %8158 = vmatprep.mubr.msk.f32.mxu0 %vm9852_vm0, %v12671_v0  ;;  %8238 = vmatpush3.msra.mxu1 %v10259_v18 }
 0x1f7   :  { %8159 = vmatmul.mubr.f32.vlgmr.msra.gmra.mxu0 %v10755_v59  ;;  %8196 = vmatprep.subr.mxu0 %v12671_v0  ;;  %v12686_v59 = vld [vmem:[#allocation25_spill] sm:$0xff] }
 0x1f8   :  { %8239 = vmatprep.subr.mxu1 %v12671_v0  ;;  %8197 = vmatpush3.msra.mxu0 %v10273_v23 }
 0x1f9   :  { %8240 = vmatpush3.msra.mxu1 %v10270_v22  ;;  %8198 = vmatprep.subr.mxu0 %v12671_v0 }
 0x1fa   :  { %8241 = vmatprep.subr.mxu1 %v12671_v0  ;;  %8199 = vmatpush3.msra.mxu0 %v10285_v28 }
 0x1fb   :  { %8242 = vmatpush3.msra.mxu1 %v10282_v27  ;;  %8200 = vmatprep.subr.mxu0 %v12671_v0 }
 0x1fc   :  { %8243 = vmatprep.subr.mxu1 %v12671_v0  ;;  %8201 = vmatpush3.msra.mxu0 %v10299_v40 }
 0x1fd   :  { %8244 = vmatpush3.msra.mxu1 %v10296_v35  ;;  %8202 = vmatprep.subr.mxu0 %v12671_v0 }
 0x1fe   :  { %8245 = vmatprep.subr.mxu1 %v12671_v0  ;;  %8203 = vmatpush3.msra.mxu0 %v10313_v48 }
 0x1ff   :  { %8246 = vmatpush3.msra.mxu1 %v10310_v47  ;;  %8204 = vmatprep.subr.mxu0 %v12671_v0 }
 0x200   :  { %8247 = vmatprep.subr.mxu1 %v12671_v0  ;;  %8205 = vmatpush3.msra.mxu0 %v10329_v63 }
 0x201   :  { %8248 = vmatpush3.msra.mxu1 %v10320_v57  ;;  %8206 = vmatprep.subr.mxu0 %v12671_v0 }
 0x202   :  { %8249 = vmatprep.subr.mxu1 %v12671_v0  ;;  %8207 = vmatpush3.msra.mxu0 %v10346_v31 }
 0x203   :  { %8250 = vmatpush3.msra.mxu1 %v10337_v13  ;;  %8208 = vmatprep.subr.mxu0 %v12671_v0 }
 0x204   :  { %8251 = vmatprep.subr.mxu1 %v12671_v0  ;;  %8209 = vmatpush3.msra.mxu0 %v10362_v44 }
 0x205   :  { %8252 = vmatpush3.msra.mxu1 %v10353_v38  ;;  %8210 = vmatprep.subr.mxu0 %v12671_v0 }
 0x206   :  { %8253 = vmatprep.subr.mxu1 %v12671_v0  ;;  %8211 = vmatpush3.msra.mxu0 %v10378_v58 }
 0x207   :  { %8254 = vmatpush3.msra.mxu1 %v10369_v52  ;;  %8212 = vmatprep.subr.mxu0 %v12671_v0 }
 0x208   :  { %8255 = vmatprep.subr.mxu1 %v12671_v0  ;;  %8213 = vmatpush3.msra.mxu0 %v10392_v9 }
 0x209   :  { %8256 = vmatpush3.msra.mxu1 %v10399_v36  ;;  %8214 = vmatprep.subr.mxu0 %v12671_v0 }
 0x20a   :  { %8257 = vmatprep.subr.mxu1 %v12671_v0  ;;  %8215 = vmatpush3.msra.mxu0 %v10408_v50 }
 0x20b   :  { %8258 = vmatpush3.msra.mxu1 %v10415_v5  ;;  %8216 = vmatprep.subr.mxu0 %v12671_v0 }
 0x20c   :  { %8259 = vmatprep.subr.mxu1 %v12671_v0  ;;  %8217 = vmatpush3.msra.mxu0 %v10424_v17 }
 0x20d   :  { %8260 = vmatpush3.msra.mxu1 %v10428_v25  ;;  %8218 = vmatprep.subr.mxu0 %v12671_v0 }
 0x20e   :  { %8261 = vmatprep.subr.mxu1 %v12671_v0  ;;  %8219 = vmatpush3.msra.mxu0 %v12672_v12 }
 0x20f   :  { %8262 = vmatpush3.msra.mxu1 %v10444_v53  ;;  %8263 = vmatprep.mubr.msk.f32.mxu1 %vm9852_vm0, %v12671_v0 }
 0x210   :  { %8220 = vmatprep.subr.mxu0 %v12671_v0  ;;  %8264 = vmatmul.mubr.f32.vlgmr.msra.gmra.mxu1 %v10750_v54 }
 0x211   :  { %8221 = vmatpush3.msra.mxu0 %v12673_v51  ;;  %8228 = vmatprep.mubr.msk.f32.mxu0 %vm9852_vm0, %v12671_v0 }
 0x212   :  { %8222 = vmatprep.subr.mxu0 %v12671_v0  ;;  %8301 = vmatprep.subr.mxu1 %v12671_v0 }
 0x213   :  { %8223 = vmatpush3.msra.mxu0 %v12674_v43  ;;  %8302 = vmatpush3.msra.mxu1 %v12675_v39 }
 0x214   :  { %8224 = vmatprep.subr.mxu0 %v12671_v0  ;;  %8303 = vmatprep.subr.mxu1 %v12671_v0 }
 0x215   :  { %8225 = vmatpush3.msra.mxu0 %v12676_v34  ;;  %8304 = vmatpush3.msra.mxu1 %v12677_v10 }
 0x216   :  { %8226 = vmatprep.subr.mxu0 %v12671_v0  ;;  %8305 = vmatprep.subr.mxu1 %v12671_v0 }
 0x217   :  { %8227 = vmatpush3.msra.mxu0 %v12678_v41  ;;  %8306 = vmatpush3.msra.mxu1 %v12679_v60 }
 0x218   :  { %8229 = vmatmul.mubr.f32.vlgmr.msra.gmra.mxu0 %v10750_v54  ;;  %8307 = vmatprep.subr.mxu1 %v12671_v0  ;;  %v12685_v54 = vld [vmem:[#allocation23_spill] sm:$0xff] }
 0x219   :  { %8308 = vmatpush3.msra.mxu1 %v12680_v56  ;;  %8266 = vmatprep.subr.mxu0 %v12671_v0 }
 0x21a   :  { %8309 = vmatprep.subr.mxu1 %v12671_v0  ;;  %8267 = vmatpush3.msra.mxu0 %v10235_v6 }
 0x21b   :  { %8310 = vmatpush3.msra.mxu1 %v12681_v3  ;;  %8268 = vmatprep.subr.mxu0 %v12671_v0 }
 0x21c   :  { %8311 = vmatprep.subr.mxu1 %v12671_v0  ;;  %8269 = vmatpush3.msra.mxu0 %v10242_v11 }
 0x21d   :  { %8312 = vmatpush3.msra.mxu1 %v12682_v2  ;;  %8270 = vmatprep.subr.mxu0 %v12671_v0 }
 0x21e   :  { %8313 = vmatprep.subr.mxu1 %v12671_v0  ;;  %8271 = vmatpush3.msra.mxu0 %v10249_v15 }
 0x21f   :  { %8314 = vmatpush3.msra.mxu1 %v12683_v21  ;;  %8272 = vmatprep.subr.mxu0 %v12671_v0 }
 0x220   :  { %8315 = vmatprep.subr.mxu1 %v12671_v0  ;;  %8273 = vmatpush3.msra.mxu0 %v10259_v18 }
 0x221   :  { %8316 = vmatpush3.msra.mxu1 %v12684_v62  ;;  %8274 = vmatprep.subr.mxu0 %v12671_v0 }
 0x222   :  { %8317 = vmatprep.subr.mxu1 %v12671_v0  ;;  %8275 = vmatpush3.msra.mxu0 %v10270_v22 }
 0x223   :  { %8318 = vmatpush3.msra.mxu1 %v12685_v54  ;;  %8276 = vmatprep.subr.mxu0 %v12671_v0 }
 0x224   :  { %8319 = vmatprep.subr.mxu1 %v12671_v0  ;;  %8277 = vmatpush3.msra.mxu0 %v10282_v27 }
 0x225   :  { %8320 = vmatpush3.msra.mxu1 %v12686_v59  ;;  %8278 = vmatprep.subr.mxu0 %v12671_v0 }
 0x226   :  { %8321 = vmatprep.subr.mxu1 %v12671_v0  ;;  %8279 = vmatpush3.msra.mxu0 %v10296_v35 }
 0x227   :  { %8322 = vmatpush3.msra.mxu1 %v12687_v46  ;;  %8280 = vmatprep.subr.mxu0 %v12671_v0 }
 0x228   :  { %8323 = vmatprep.subr.mxu1 %v12671_v0  ;;  %8281 = vmatpush3.msra.mxu0 %v10310_v47 }
 0x229   :  { %8324 = vmatpush3.msra.mxu1 %v12688_v37  ;;  %8282 = vmatprep.subr.mxu0 %v12671_v0  ;;  %v12691_v37 = vld [vmem:[#allocation33_spill] sm:$0xff] }
 0x22a   :  { %8325 = vmatprep.subr.mxu1 %v12671_v0  ;;  %8283 = vmatpush3.msra.mxu0 %v10320_v57 }
 0x22b   :  { %8326 = vmatpush3.msra.mxu1 %v12689_v7  ;;  %8284 = vmatprep.subr.mxu0 %v12671_v0  ;;  %v12692_v7 = vld [vmem:[#allocation34_spill] sm:$0xff] }
 0x22c   :  { %8327 = vmatprep.subr.mxu1 %v12671_v0  ;;  %8285 = vmatpush3.msra.mxu0 %v10337_v13 }
 0x22d   :  { %8328 = vmatpush3.msra.mxu1 %v12690_v19  ;;  %8286 = vmatprep.subr.mxu0 %v12671_v0 }
 0x22e   :  { %8329 = vmatprep.subr.mxu1 %v12671_v0  ;;  %8287 = vmatpush3.msra.mxu0 %v10353_v38 }
 0x22f   :  { %8330 = vmatpush3.msra.mxu1 %v12691_v37  ;;  %8288 = vmatprep.subr.mxu0 %v12671_v0 }
 0x230   :  { %8331 = vmatprep.subr.mxu1 %v12671_v0  ;;  %8289 = vmatpush3.msra.mxu0 %v10369_v52 }
 0x231   :  { %8332 = vmatpush3.msra.mxu1 %v12692_v7  ;;  %8290 = vmatprep.subr.mxu0 %v12671_v0 }
 0x232   :  { %8333 = vmatprep.mubr.msk.f32.mxu1 %vm9852_vm0, %v12671_v0  ;;  %8371 = vmatprep.subr.mxu1 %v12671_v0 }
 0x233   :  { %8291 = vmatpush3.msra.mxu0 %v10399_v36  ;;  %8298 = vmatprep.mubr.msk.f32.mxu0 %vm9852_vm0, %v12671_v0 }
 0x234   :  { %8292 = vmatprep.subr.mxu0 %v12671_v0 }
 0x235   :  { %8293 = vmatpush3.msra.mxu0 %v10415_v5 }
 0x236   :  { %8294 = vmatprep.subr.mxu0 %v12671_v0 }
 0x237   :  { %8295 = vmatpush3.msra.mxu0 %v10428_v25 }
 0x238   :  { %8296 = vmatprep.subr.mxu0 %v12671_v0 }
 0x239   :  { %8297 = vmatpush3.msra.mxu0 %v10444_v53 }
 0x23a   :  { %8336 = vmatprep.subr.mxu0 %v12671_v0 }
 0x28e   :  { %v1632_v7 = vpop.f32.mrf.mxu1 }
 0x290   :  { %v8125_v37 = vpop.f32.mrf.mxu1 }
 0x296   :  { %v1481_v19 = vpop.f32.mrf.mxu0 }
 0x297   :  { %v1633_v3 = vadd.f32 %v1632_v7, %v1481_v19  ;;  %v12704_v7 = vld [vmem:[#allocation19_spill] sm:$0xff] }
 0x298   :  { %v8090_v46 = vpop.f32.mrf.mxu0 }
 0x2ae   :  { %v1825_v59 = vpop.f32.mrf.mxu1 }
 0x2b0   :  { %v8195_v54 = vpop.f32.mrf.mxu1 }
 0x2b7   :  { %v1736_v62 = vpop.f32.mrf.mxu0 }
 0x2b8   :  { %v1737_v60 = vadd.f32 %v1736_v62, %v1633_v3  ;;  %v12700_v3 = vld [vmem:[#allocation14_spill] sm:$0xff]  ;;  %v12702_v62 = vld [vmem:[#allocation16_spill] sm:$0xff] }
 0x2b9   :  { %v8160_v21 = vpop.f32.mrf.mxu0 }
 0x2ba   :  { %v1826_v41 = vadd.f32 %v1825_v59, %v1737_v60  ;;  %v12698_v60 = vld [vmem:[#allocation13_spill] sm:$0xff] }
 0x2bb   :  { %v12703_v59 = vld [vmem:[#allocation17_spill] sm:$0xff] }
 0x2d0   :  { %v2031_v2 = vpop.f32.mrf.mxu1 }
 0x2d2   :  { %v8265_v56 = vpop.f32.mrf.mxu1 }
 0x2d3   :  { %v12699_v56 = vld [vmem:[#allocation30_spill] sm:$0xff] }
 0x2d8   :  { %v1944_v10 = vpop.f32.mrf.mxu0 }
 0x2d9   :  { %v1945_v34 = vadd.f32 %v1944_v10, %v1826_v41  ;;  %v12696_v10 = vld [vmem:[#allocation12_spill] sm:$0xff] }
 0x2da   :  { %v8230_v39 = vpop.f32.mrf.mxu0  ;;  %v12697_v41 = vld [vmem:[#allocation28_spill] sm:$0xff] }
 0x2db   :  { %v2032_v43 = vadd.f32 %v2031_v2, %v1945_v34  ;;  %v12694_v39 = vld [vmem:[#allocation24_spill] sm:$0xff]  ;;  %v12695_v34 = vld [vmem:[#allocation26_spill] sm:$0xff]  ;;  %v12701_v2 = vld [vmem:[#allocation15_spill] sm:$0xff] }
 0x2dd   :  { %v2036_v51 = vrot.slane %v2032_v43, 7  ;;  %v12693_v43 = vld [vmem:[#allocation22_spill] sm:$0xff] }
 0x2df   :  { %v2038_v12 = vadd.f32 %v2036_v51, %v10744_v26 }
 0x2e1   :  { %9746 = vtanh.f32 %v2038_v12 }
 0x2ee   :  { %v10967_v37 = vpop.eup %9746 }
 0x2ef   :  { %v2041_v46 = vrot.slane %v10967_v37, 1 }
 0x2f1   :  { %v10970_v54 = vand.u32 4294901760, %v2041_v46 }
 0x2f3   :  { %v10973_v21 = vsub.f32 %v2041_v46, %v10970_v54  ;;  %8334 = vmatmul.mubr.f32.vlgmr.msra.gmra.mxu1 %v10970_v54  ;;  %v12705_v46 = vld [vmem:[#allocation21_spill] sm:$0xff] }
 0x2f4   :  { %8372 = vmatpush3.msra.mxu1 %v10235_v6  ;;  %8403 = vmatprep.mubr.msk.f32.mxu1 %vm9852_vm0, %v12671_v0 }
 0x2f5   :  { %8373 = vmatprep.subr.mxu1 %v12671_v0  ;;  %v2126_v19 = vand.u32 4294901760, %v10973_v21 }
 0x2f6   :  { %8374 = vmatpush3.msra.mxu1 %v10242_v11 }
 0x2f7   :  { %8375 = vmatprep.subr.mxu1 %v12671_v0  ;;  %v2127_v12 = vsub.f32 %v10973_v21, %v2126_v19 }
 0x2f8   :  { %8376 = vmatpush3.msra.mxu1 %v10249_v15 }
 0x2f9   :  { %8377 = vmatprep.subr.mxu1 %v12671_v0  ;;  %v2128_v51 = vand.u32 4294901760, %v2127_v12  ;;  %v12709_v12 = vld [vmem:[#allocation29_spill] sm:$0xff] }
 0x2fa   :  { %8378 = vmatpush3.msra.mxu1 %v10259_v18 }
 0x2fb   :  { %8379 = vmatprep.subr.mxu1 %v12671_v0  ;;  %8299 = vmatmul.mubr.f32.vlgmr.msra.gmra.mxu0 %v2128_v51  ;;  %v12710_v51 = vld [vmem:[#allocation31_spill] sm:$0xff] }
 0x2fc   :  { %8337 = vmatpush3.msra.mxu0 %v10252_v16  ;;  %8380 = vmatpush3.msra.mxu1 %v10270_v22 }
 0x2fd   :  { %8338 = vmatprep.subr.mxu0 %v12671_v0  ;;  %8381 = vmatprep.subr.mxu1 %v12671_v0 }
 0x2fe   :  { %8339 = vmatpush3.msra.mxu0 %v10262_v20  ;;  %8382 = vmatpush3.msra.mxu1 %v10282_v27 }
 0x2ff   :  { %8340 = vmatprep.subr.mxu0 %v12671_v0  ;;  %8383 = vmatprep.subr.mxu1 %v12671_v0 }
 0x300   :  { %8341 = vmatpush3.msra.mxu0 %v10276_v24  ;;  %8384 = vmatpush3.msra.mxu1 %v10296_v35 }
 0x301   :  { %8342 = vmatprep.subr.mxu0 %v12671_v0  ;;  %8385 = vmatprep.subr.mxu1 %v12671_v0 }
 0x302   :  { %8343 = vmatpush3.msra.mxu0 %v10288_v29  ;;  %8386 = vmatpush3.msra.mxu1 %v10310_v47 }
 0x303   :  { %8344 = vmatprep.subr.mxu0 %v12671_v0  ;;  %8387 = vmatprep.subr.mxu1 %v12671_v0 }
 0x304   :  { %8345 = vmatpush3.msra.mxu0 %v10302_v45  ;;  %8388 = vmatpush3.msra.mxu1 %v10320_v57 }
 0x305   :  { %8346 = vmatprep.subr.mxu0 %v12671_v0  ;;  %8389 = vmatprep.subr.mxu1 %v12671_v0 }
 0x306   :  { %8347 = vmatpush3.msra.mxu0 %v10316_v55  ;;  %8390 = vmatpush3.msra.mxu1 %v10337_v13 }
 0x307   :  { %8348 = vmatprep.subr.mxu0 %v12671_v0  ;;  %8391 = vmatprep.subr.mxu1 %v12671_v0 }
 0x308   :  { %8349 = vmatpush3.msra.mxu0 %v10332_v8  ;;  %8392 = vmatpush3.msra.mxu1 %v10353_v38 }
 0x309   :  { %8350 = vmatprep.subr.mxu0 %v12671_v0  ;;  %8393 = vmatprep.subr.mxu1 %v12671_v0 }
 0x30a   :  { %8351 = vmatpush3.msra.mxu0 %v10349_v32  ;;  %8394 = vmatpush3.msra.mxu1 %v10369_v52 }
 0x30b   :  { %8352 = vmatprep.subr.mxu0 %v12671_v0  ;;  %8395 = vmatprep.subr.mxu1 %v12671_v0 }
 0x30c   :  { %8353 = vmatpush3.msra.mxu0 %v10365_v49  ;;  %8396 = vmatpush3.msra.mxu1 %v10399_v36 }
 0x30d   :  { %8354 = vmatprep.subr.mxu0 %v12671_v0  ;;  %8397 = vmatprep.subr.mxu1 %v12671_v0 }
 0x30e   :  { %8355 = vmatpush3.msra.mxu0 %v10381_v1  ;;  %8398 = vmatpush3.msra.mxu1 %v10415_v5 }
 0x30f   :  { %8356 = vmatprep.subr.mxu0 %v12671_v0  ;;  %8399 = vmatprep.subr.mxu1 %v12671_v0 }
 0x310   :  { %8357 = vmatpush3.msra.mxu0 %v10395_v33  ;;  %8400 = vmatpush3.msra.mxu1 %v10428_v25 }
 0x311   :  { %8358 = vmatprep.subr.mxu0 %v12671_v0  ;;  %8401 = vmatprep.subr.mxu1 %v12671_v0 }
 0x312   :  { %8359 = vmatpush3.msra.mxu0 %v10411_v4  ;;  %8402 = vmatpush3.msra.mxu1 %v10444_v53 }
 0x313   :  { %8360 = vmatprep.subr.mxu0 %v12671_v0  ;;  %8404 = vmatmul.mubr.f32.vlgmr.msra.gmra.mxu1 %v2126_v19  ;;  %v12708_v19 = vld [vmem:[#allocation27_spill] sm:$0xff] }
 0x314   :  { %8441 = vmatprep.subr.mxu1 %v12671_v0  ;;  %8361 = vmatpush3.msra.mxu0 %v10431_v30 }
 0x315   :  { %8442 = vmatpush3.msra.mxu1 %v10235_v6  ;;  %8362 = vmatprep.subr.mxu0 %v12671_v0 }
 0x316   :  { %8443 = vmatprep.subr.mxu1 %v12671_v0  ;;  %8363 = vmatpush3.msra.mxu0 %v10447_v61 }
 0x317   :  { %8444 = vmatpush3.msra.mxu1 %v10242_v11  ;;  %8364 = vmatprep.subr.mxu0 %v12671_v0 }
 0x318   :  { %8445 = vmatprep.subr.mxu1 %v12671_v0  ;;  %8365 = vmatpush3.msra.mxu0 %v10461_v42 }
 0x319   :  { %8446 = vmatpush3.msra.mxu1 %v10249_v15  ;;  %8366 = vmatprep.subr.mxu0 %v12671_v0 }
 0x31a   :  { %8447 = vmatprep.subr.mxu1 %v12671_v0  ;;  %8367 = vmatpush3.msra.mxu0 %v10475_v14 }
 0x31b   :  { %8368 = vmatprep.mubr.msk.f32.mxu0 %vm9852_vm0, %v12671_v0  ;;  %8448 = vmatpush3.msra.mxu1 %v10259_v18 }
 0x31c   :  { %8369 = vmatmul.mubr.f32.vlgmr.msra.gmra.mxu0 %v10973_v21  ;;  %8406 = vmatprep.subr.mxu0 %v12671_v0  ;;  %v12707_v21 = vld [vmem:[#allocation25_spill] sm:$0xff] }
 0x31d   :  { %8449 = vmatprep.subr.mxu1 %v12671_v0  ;;  %8407 = vmatpush3.msra.mxu0 %v10273_v23 }
 0x31e   :  { %8450 = vmatpush3.msra.mxu1 %v10270_v22  ;;  %8408 = vmatprep.subr.mxu0 %v12671_v0 }
 0x31f   :  { %8451 = vmatprep.subr.mxu1 %v12671_v0  ;;  %8409 = vmatpush3.msra.mxu0 %v10285_v28 }
 0x320   :  { %8452 = vmatpush3.msra.mxu1 %v10282_v27  ;;  %8410 = vmatprep.subr.mxu0 %v12671_v0 }
 0x321   :  { %8453 = vmatprep.subr.mxu1 %v12671_v0  ;;  %8411 = vmatpush3.msra.mxu0 %v10299_v40 }
 0x322   :  { %8454 = vmatpush3.msra.mxu1 %v10296_v35  ;;  %8412 = vmatprep.subr.mxu0 %v12671_v0 }
 0x323   :  { %8455 = vmatprep.subr.mxu1 %v12671_v0  ;;  %8413 = vmatpush3.msra.mxu0 %v10313_v48 }
 0x324   :  { %8456 = vmatpush3.msra.mxu1 %v10310_v47  ;;  %8414 = vmatprep.subr.mxu0 %v12671_v0 }
 0x325   :  { %8457 = vmatprep.subr.mxu1 %v12671_v0  ;;  %8415 = vmatpush3.msra.mxu0 %v10329_v63 }
 0x326   :  { %8458 = vmatpush3.msra.mxu1 %v10320_v57  ;;  %8416 = vmatprep.subr.mxu0 %v12671_v0 }
 0x327   :  { %8459 = vmatprep.subr.mxu1 %v12671_v0  ;;  %8417 = vmatpush3.msra.mxu0 %v10346_v31 }
 0x328   :  { %8460 = vmatpush3.msra.mxu1 %v10337_v13  ;;  %8418 = vmatprep.subr.mxu0 %v12671_v0 }
 0x329   :  { %8461 = vmatprep.subr.mxu1 %v12671_v0  ;;  %8419 = vmatpush3.msra.mxu0 %v10362_v44 }
 0x32a   :  { %8462 = vmatpush3.msra.mxu1 %v10353_v38  ;;  %8420 = vmatprep.subr.mxu0 %v12671_v0 }
 0x32b   :  { %8463 = vmatprep.subr.mxu1 %v12671_v0  ;;  %8421 = vmatpush3.msra.mxu0 %v10378_v58 }
 0x32c   :  { %8464 = vmatpush3.msra.mxu1 %v10369_v52  ;;  %8422 = vmatprep.subr.mxu0 %v12671_v0 }
 0x32d   :  { %8465 = vmatprep.subr.mxu1 %v12671_v0  ;;  %8423 = vmatpush3.msra.mxu0 %v10392_v9 }
 0x32e   :  { %8466 = vmatpush3.msra.mxu1 %v10399_v36  ;;  %8424 = vmatprep.subr.mxu0 %v12671_v0 }
 0x32f   :  { %8467 = vmatprep.subr.mxu1 %v12671_v0  ;;  %8425 = vmatpush3.msra.mxu0 %v10408_v50 }
 0x330   :  { %8468 = vmatpush3.msra.mxu1 %v10415_v5  ;;  %8426 = vmatprep.subr.mxu0 %v12671_v0 }
 0x331   :  { %8469 = vmatprep.subr.mxu1 %v12671_v0  ;;  %8427 = vmatpush3.msra.mxu0 %v10424_v17 }
 0x332   :  { %8470 = vmatpush3.msra.mxu1 %v10428_v25  ;;  %8428 = vmatprep.subr.mxu0 %v12671_v0 }
 0x333   :  { %8471 = vmatprep.subr.mxu1 %v12671_v0  ;;  %8429 = vmatpush3.msra.mxu0 %v12693_v43 }
 0x334   :  { %8472 = vmatpush3.msra.mxu1 %v10444_v53  ;;  %8473 = vmatprep.mubr.msk.f32.mxu1 %vm9852_vm0, %v12671_v0 }
 0x335   :  { %8430 = vmatprep.subr.mxu0 %v12671_v0  ;;  %8474 = vmatmul.mubr.f32.vlgmr.msra.gmra.mxu1 %v10970_v54 }
 0x336   :  { %8431 = vmatpush3.msra.mxu0 %v12694_v39  ;;  %8438 = vmatprep.mubr.msk.f32.mxu0 %vm9852_vm0, %v12671_v0 }
 0x337   :  { %8432 = vmatprep.subr.mxu0 %v12671_v0  ;;  %8511 = vmatprep.subr.mxu1 %v12671_v0 }
 0x338   :  { %8433 = vmatpush3.msra.mxu0 %v12695_v34  ;;  %8512 = vmatpush3.msra.mxu1 %v12696_v10 }
 0x339   :  { %8434 = vmatprep.subr.mxu0 %v12671_v0  ;;  %8513 = vmatprep.subr.mxu1 %v12671_v0 }
 0x33a   :  { %8435 = vmatpush3.msra.mxu0 %v12697_v41  ;;  %8514 = vmatpush3.msra.mxu1 %v12698_v60 }
 0x33b   :  { %8436 = vmatprep.subr.mxu0 %v12671_v0  ;;  %8515 = vmatprep.subr.mxu1 %v12671_v0 }
 0x33c   :  { %8437 = vmatpush3.msra.mxu0 %v12699_v56  ;;  %8516 = vmatpush3.msra.mxu1 %v12700_v3 }
 0x33d   :  { %8439 = vmatmul.mubr.f32.vlgmr.msra.gmra.mxu0 %v10970_v54  ;;  %8517 = vmatprep.subr.mxu1 %v12671_v0  ;;  %v12706_v54 = vld [vmem:[#allocation23_spill] sm:$0xff] }
 0x33e   :  { %8518 = vmatpush3.msra.mxu1 %v12701_v2  ;;  %8476 = vmatprep.subr.mxu0 %v12671_v0 }
 0x33f   :  { %8519 = vmatprep.subr.mxu1 %v12671_v0  ;;  %8477 = vmatpush3.msra.mxu0 %v10235_v6 }
 0x340   :  { %8520 = vmatpush3.msra.mxu1 %v12702_v62  ;;  %8478 = vmatprep.subr.mxu0 %v12671_v0 }
 0x341   :  { %8521 = vmatprep.subr.mxu1 %v12671_v0  ;;  %8479 = vmatpush3.msra.mxu0 %v10242_v11 }
 0x342   :  { %8522 = vmatpush3.msra.mxu1 %v12703_v59  ;;  %8480 = vmatprep.subr.mxu0 %v12671_v0 }
 0x343   :  { %8523 = vmatprep.subr.mxu1 %v12671_v0  ;;  %8481 = vmatpush3.msra.mxu0 %v10249_v15 }
 0x344   :  { %8524 = vmatpush3.msra.mxu1 %v12704_v7  ;;  %8482 = vmatprep.subr.mxu0 %v12671_v0 }
 0x345   :  { %8525 = vmatprep.subr.mxu1 %v12671_v0  ;;  %8483 = vmatpush3.msra.mxu0 %v10259_v18 }
 0x346   :  { %8526 = vmatpush3.msra.mxu1 %v12705_v46  ;;  %8484 = vmatprep.subr.mxu0 %v12671_v0 }
 0x347   :  { %8527 = vmatprep.subr.mxu1 %v12671_v0  ;;  %8485 = vmatpush3.msra.mxu0 %v10270_v22 }
 0x348   :  { %8528 = vmatpush3.msra.mxu1 %v12706_v54  ;;  %8486 = vmatprep.subr.mxu0 %v12671_v0 }
 0x349   :  { %8529 = vmatprep.subr.mxu1 %v12671_v0  ;;  %8487 = vmatpush3.msra.mxu0 %v10282_v27 }
 0x34a   :  { %8530 = vmatpush3.msra.mxu1 %v12707_v21  ;;  %8488 = vmatprep.subr.mxu0 %v12671_v0 }
 0x34b   :  { %8531 = vmatprep.subr.mxu1 %v12671_v0  ;;  %8489 = vmatpush3.msra.mxu0 %v10296_v35 }
 0x34c   :  { %8532 = vmatpush3.msra.mxu1 %v12708_v19  ;;  %8490 = vmatprep.subr.mxu0 %v12671_v0  ;;  %v12711_v19 = vld [vmem:[#allocation32_spill] sm:$0xff] }
 0x34d   :  { %8533 = vmatprep.subr.mxu1 %v12671_v0  ;;  %8491 = vmatpush3.msra.mxu0 %v10310_v47 }
 0x34e   :  { %8534 = vmatpush3.msra.mxu1 %v12709_v12  ;;  %8492 = vmatprep.subr.mxu0 %v12671_v0  ;;  %v12712_v12 = vld [vmem:[#allocation33_spill] sm:$0xff] }
 0x34f   :  { %8535 = vmatprep.subr.mxu1 %v12671_v0  ;;  %8493 = vmatpush3.msra.mxu0 %v10320_v57 }
 0x350   :  { %8536 = vmatpush3.msra.mxu1 %v12710_v51  ;;  %8494 = vmatprep.subr.mxu0 %v12671_v0  ;;  %v12713_v51 = vld [vmem:[#allocation34_spill] sm:$0xff] }
 0x351   :  { %8537 = vmatprep.subr.mxu1 %v12671_v0  ;;  %8495 = vmatpush3.msra.mxu0 %v10337_v13 }
 0x352   :  { %8538 = vmatpush3.msra.mxu1 %v12711_v19  ;;  %8496 = vmatprep.subr.mxu0 %v12671_v0 }
 0x353   :  { %8539 = vmatprep.subr.mxu1 %v12671_v0  ;;  %8497 = vmatpush3.msra.mxu0 %v10353_v38 }
 0x354   :  { %8540 = vmatpush3.msra.mxu1 %v12712_v12  ;;  %8498 = vmatprep.subr.mxu0 %v12671_v0 }
 0x355   :  { %8541 = vmatprep.subr.mxu1 %v12671_v0  ;;  %8499 = vmatpush3.msra.mxu0 %v10369_v52 }
 0x356   :  { %8542 = vmatpush3.msra.mxu1 %v12713_v51  ;;  %8500 = vmatprep.subr.mxu0 %v12671_v0 }
 0x357   :  { %8543 = vmatprep.mubr.msk.f32.mxu1 %vm9852_vm0, %v12671_v0  ;;  %8581 = vmatprep.subr.mxu1 %v12671_v0 }
 0x358   :  { %8501 = vmatpush3.msra.mxu0 %v10399_v36  ;;  %8508 = vmatprep.mubr.msk.f32.mxu0 %vm9852_vm0, %v12671_v0 }
 0x359   :  { %8502 = vmatprep.subr.mxu0 %v12671_v0 }
 0x35a   :  { %8503 = vmatpush3.msra.mxu0 %v10415_v5 }
 0x35b   :  { %8504 = vmatprep.subr.mxu0 %v12671_v0 }
 0x35c   :  { %8505 = vmatpush3.msra.mxu0 %v10428_v25 }
 0x35d   :  { %8506 = vmatprep.subr.mxu0 %v12671_v0 }
 0x35e   :  { %8507 = vmatpush3.msra.mxu0 %v10444_v53 }
 0x35f   :  { %8546 = vmatprep.subr.mxu0 %v12671_v0 }
 0x3b3   :  { %v2281_v51 = vpop.f32.mrf.mxu1 }
 0x3b5   :  { %v8335_v12 = vpop.f32.mrf.mxu1 }
 0x3bb   :  { %v2130_v19 = vpop.f32.mrf.mxu0 }
 0x3bc   :  { %v2282_v2 = vadd.f32 %v2281_v51, %v2130_v19  ;;  %v12724_v19 = vld [vmem:[#allocation14_spill] sm:$0xff]  ;;  %v12725_v51 = vld [vmem:[#allocation15_spill] sm:$0xff] }
 0x3bd   :  { %v8300_v21 = vpop.f32.mrf.mxu0 }
 0x3d3   :  { %v2474_v54 = vpop.f32.mrf.mxu1 }
 0x3d5   :  { %v8405_v46 = vpop.f32.mrf.mxu1 }
 0x3d6   :  { %v12714_v46 = vld [vmem:[#allocation35_spill] sm:$0xff] }
 0x3d7   :  { %v5935_v12 = vsel %vm5934_vm1, %v12714_v46, %v10967_v37  ;;  %v12727_v46 = vld [vmem:[#allocation17_spill] sm:$0xff] }
 0x3dc   :  { %v2385_v7 = vpop.f32.mrf.mxu0 }
 0x3dd   :  { %v2386_v56 = vadd.f32 %v2385_v7, %v2282_v2  ;;  %v12720_v2 = vld [vmem:[#allocation12_spill] sm:$0xff]  ;;  %v12722_v7 = vld [vmem:[#allocation13_spill] sm:$0xff] }
 0x3de   :  { %v8370_v59 = vpop.f32.mrf.mxu0 }
 0x3df   :  { %v2475_v60 = vadd.f32 %v2474_v54, %v2386_v56  ;;  %v12723_v54 = vld [vmem:[#allocation30_spill] sm:$0xff] }
 0x3f5   :  { %v2680_v62 = vpop.f32.mrf.mxu1 }
 0x3f7   :  { %v8475_v3 = vpop.f32.mrf.mxu1 }
 0x3fd   :  { %v2593_v41 = vpop.f32.mrf.mxu0 }
 0x3fe   :  { %v2594_v10 = vadd.f32 %v2593_v41, %v2475_v60  ;;  %v12718_v41 = vld [vmem:[#allocation24_spill] sm:$0xff]  ;;  %v12719_v60 = vld [vmem:[#allocation26_spill] sm:$0xff] }
 0x3ff   :  { %v8440_v34 = vpop.f32.mrf.mxu0 }
 0x400   :  { %v2681_v39 = vadd.f32 %v2680_v62, %v2594_v10  ;;  %v12716_v34 = vld [vmem:[#allocation20_spill] sm:$0xff]  ;;  %v12717_v10 = vld [vmem:[#allocation22_spill] sm:$0xff] }
 0x401   :  { %v12721_v62 = vld [vmem:[#allocation28_spill] sm:$0xff] }
 0x402   :  { %v2685_v43 = vrot.slane %v2681_v39, 6  ;;  %v12715_v39 = vld [vmem:[#allocation18_spill] sm:$0xff] }
 0x404   :  { %v2687_v17 = vadd.f32 %v2685_v43, %v10744_v26 }
 0x406   :  { %9748 = vtanh.f32 %v2687_v17 }
 0x413   :  { %v9749_v21 = vpop.eup %9748 }
 0x414   :  { %v2690_v59 = vrot.slane %v9749_v21, 2  ;;  %v11188_v50 = vsel %vm5936_vm2, %v5935_v12, %v9749_v21  ;;  %v12726_v21 = vld [vmem:[#allocation16_spill] sm:$0xff]  ;;  %v12728_v12 = vld [vmem:[#allocation19_spill] sm:$0xff] }
 0x416   :  { %v11190_v3 = vand.u32 4294901760, %v2690_v59 }
 0x418   :  { %v11193_v56 = vsub.f32 %v2690_v59, %v11190_v3  ;;  %8544 = vmatmul.mubr.f32.vlgmr.msra.gmra.mxu1 %v11190_v3  ;;  %v12729_v59 = vld [vmem:[#allocation21_spill] sm:$0xff] }
 0x419   :  { %8582 = vmatpush3.msra.mxu1 %v10235_v6  ;;  %8613 = vmatprep.mubr.msk.f32.mxu1 %vm9852_vm0, %v12671_v0 }
 0x41a   :  { %8583 = vmatprep.subr.mxu1 %v12671_v0  ;;  %v2775_v17 = vand.u32 4294901760, %v11193_v56 }
 0x41b   :  { %8584 = vmatpush3.msra.mxu1 %v10242_v11 }
 0x41c   :  { %8585 = vmatprep.subr.mxu1 %v12671_v0  ;;  %v2776_v37 = vsub.f32 %v11193_v56, %v2775_v17 }
 0x41d   :  { %8586 = vmatpush3.msra.mxu1 %v10249_v15 }
 0x41e   :  { %8587 = vmatprep.subr.mxu1 %v12671_v0  ;;  %v2777_v43 = vand.u32 4294901760, %v2776_v37  ;;  %v12733_v37 = vld [vmem:[#allocation29_spill] sm:$0xff] }
 0x41f   :  { %8588 = vmatpush3.msra.mxu1 %v10259_v18 }
 0x420   :  { %8589 = vmatprep.subr.mxu1 %v12671_v0  ;;  %8509 = vmatmul.mubr.f32.vlgmr.msra.gmra.mxu0 %v2777_v43  ;;  %v12734_v43 = vld [vmem:[#allocation31_spill] sm:$0xff] }
 0x421   :  { %8547 = vmatpush3.msra.mxu0 %v10252_v16  ;;  %8590 = vmatpush3.msra.mxu1 %v10270_v22 }
 0x422   :  { %8548 = vmatprep.subr.mxu0 %v12671_v0  ;;  %8591 = vmatprep.subr.mxu1 %v12671_v0 }
 0x423   :  { %8549 = vmatpush3.msra.mxu0 %v10262_v20  ;;  %8592 = vmatpush3.msra.mxu1 %v10282_v27 }
 0x424   :  { %8550 = vmatprep.subr.mxu0 %v12671_v0  ;;  %8593 = vmatprep.subr.mxu1 %v12671_v0 }
 0x425   :  { %8551 = vmatpush3.msra.mxu0 %v10276_v24  ;;  %8594 = vmatpush3.msra.mxu1 %v10296_v35 }
 0x426   :  { %8552 = vmatprep.subr.mxu0 %v12671_v0  ;;  %8595 = vmatprep.subr.mxu1 %v12671_v0 }
 0x427   :  { %8553 = vmatpush3.msra.mxu0 %v10288_v29  ;;  %8596 = vmatpush3.msra.mxu1 %v10310_v47 }
 0x428   :  { %8554 = vmatprep.subr.mxu0 %v12671_v0  ;;  %8597 = vmatprep.subr.mxu1 %v12671_v0 }
 0x429   :  { %8555 = vmatpush3.msra.mxu0 %v10302_v45  ;;  %8598 = vmatpush3.msra.mxu1 %v10320_v57 }
 0x42a   :  { %8556 = vmatprep.subr.mxu0 %v12671_v0  ;;  %8599 = vmatprep.subr.mxu1 %v12671_v0 }
 0x42b   :  { %8557 = vmatpush3.msra.mxu0 %v10316_v55  ;;  %8600 = vmatpush3.msra.mxu1 %v10337_v13 }
 0x42c   :  { %8558 = vmatprep.subr.mxu0 %v12671_v0  ;;  %8601 = vmatprep.subr.mxu1 %v12671_v0 }
 0x42d   :  { %8559 = vmatpush3.msra.mxu0 %v10332_v8  ;;  %8602 = vmatpush3.msra.mxu1 %v10353_v38 }
 0x42e   :  { %8560 = vmatprep.subr.mxu0 %v12671_v0  ;;  %8603 = vmatprep.subr.mxu1 %v12671_v0 }
 0x42f   :  { %8561 = vmatpush3.msra.mxu0 %v10349_v32  ;;  %8604 = vmatpush3.msra.mxu1 %v10369_v52 }
 0x430   :  { %8562 = vmatprep.subr.mxu0 %v12671_v0  ;;  %8605 = vmatprep.subr.mxu1 %v12671_v0 }
 0x431   :  { %8563 = vmatpush3.msra.mxu0 %v10365_v49  ;;  %8606 = vmatpush3.msra.mxu1 %v10399_v36 }
 0x432   :  { %8564 = vmatprep.subr.mxu0 %v12671_v0  ;;  %8607 = vmatprep.subr.mxu1 %v12671_v0 }
 0x433   :  { %8565 = vmatpush3.msra.mxu0 %v10381_v1  ;;  %8608 = vmatpush3.msra.mxu1 %v10415_v5 }
 0x434   :  { %8566 = vmatprep.subr.mxu0 %v12671_v0  ;;  %8609 = vmatprep.subr.mxu1 %v12671_v0 }
 0x435   :  { %8567 = vmatpush3.msra.mxu0 %v10395_v33  ;;  %8610 = vmatpush3.msra.mxu1 %v10428_v25 }
 0x436   :  { %8568 = vmatprep.subr.mxu0 %v12671_v0  ;;  %8611 = vmatprep.subr.mxu1 %v12671_v0 }
 0x437   :  { %8569 = vmatpush3.msra.mxu0 %v10411_v4  ;;  %8612 = vmatpush3.msra.mxu1 %v10444_v53 }
 0x438   :  { %8570 = vmatprep.subr.mxu0 %v12671_v0  ;;  %8614 = vmatmul.mubr.f32.vlgmr.msra.gmra.mxu1 %v2775_v17  ;;  %v12732_v17 = vld [vmem:[#allocation27_spill] sm:$0xff] }
 0x439   :  { %8651 = vmatprep.subr.mxu1 %v12671_v0  ;;  %8571 = vmatpush3.msra.mxu0 %v10431_v30 }
 0x43a   :  { %8652 = vmatpush3.msra.mxu1 %v10235_v6  ;;  %8572 = vmatprep.subr.mxu0 %v12671_v0 }
 0x43b   :  { %8653 = vmatprep.subr.mxu1 %v12671_v0  ;;  %8573 = vmatpush3.msra.mxu0 %v10447_v61 }
 0x43c   :  { %8654 = vmatpush3.msra.mxu1 %v10242_v11  ;;  %8574 = vmatprep.subr.mxu0 %v12671_v0 }
 0x43d   :  { %8655 = vmatprep.subr.mxu1 %v12671_v0  ;;  %8575 = vmatpush3.msra.mxu0 %v10461_v42 }
 0x43e   :  { %8656 = vmatpush3.msra.mxu1 %v10249_v15  ;;  %8576 = vmatprep.subr.mxu0 %v12671_v0 }
 0x43f   :  { %8657 = vmatprep.subr.mxu1 %v12671_v0  ;;  %8577 = vmatpush3.msra.mxu0 %v10475_v14 }
 0x440   :  { %8578 = vmatprep.mubr.msk.f32.mxu0 %vm9852_vm0, %v12671_v0  ;;  %8658 = vmatpush3.msra.mxu1 %v10259_v18 }
 0x441   :  { %8579 = vmatmul.mubr.f32.vlgmr.msra.gmra.mxu0 %v11193_v56  ;;  %8616 = vmatprep.subr.mxu0 %v12671_v0  ;;  %v12731_v56 = vld [vmem:[#allocation25_spill] sm:$0xff] }
 0x442   :  { %8659 = vmatprep.subr.mxu1 %v12671_v0  ;;  %8617 = vmatpush3.msra.mxu0 %v10273_v23 }
 0x443   :  { %8660 = vmatpush3.msra.mxu1 %v10270_v22  ;;  %8618 = vmatprep.subr.mxu0 %v12671_v0 }
 0x444   :  { %8661 = vmatprep.subr.mxu1 %v12671_v0  ;;  %8619 = vmatpush3.msra.mxu0 %v10285_v28 }
 0x445   :  { %8662 = vmatpush3.msra.mxu1 %v10282_v27  ;;  %8620 = vmatprep.subr.mxu0 %v12671_v0 }
 0x446   :  { %8663 = vmatprep.subr.mxu1 %v12671_v0  ;;  %8621 = vmatpush3.msra.mxu0 %v10299_v40 }
 0x447   :  { %8664 = vmatpush3.msra.mxu1 %v10296_v35  ;;  %8622 = vmatprep.subr.mxu0 %v12671_v0 }
 0x448   :  { %8665 = vmatprep.subr.mxu1 %v12671_v0  ;;  %8623 = vmatpush3.msra.mxu0 %v10313_v48 }
 0x449   :  { %8666 = vmatpush3.msra.mxu1 %v10310_v47  ;;  %8624 = vmatprep.subr.mxu0 %v12671_v0 }
 0x44a   :  { %8667 = vmatprep.subr.mxu1 %v12671_v0  ;;  %8625 = vmatpush3.msra.mxu0 %v10329_v63 }
 0x44b   :  { %8668 = vmatpush3.msra.mxu1 %v10320_v57  ;;  %8626 = vmatprep.subr.mxu0 %v12671_v0 }
 0x44c   :  { %8669 = vmatprep.subr.mxu1 %v12671_v0  ;;  %8627 = vmatpush3.msra.mxu0 %v10346_v31 }
 0x44d   :  { %8670 = vmatpush3.msra.mxu1 %v10337_v13  ;;  %8628 = vmatprep.subr.mxu0 %v12671_v0 }
 0x44e   :  { %8671 = vmatprep.subr.mxu1 %v12671_v0  ;;  %8629 = vmatpush3.msra.mxu0 %v10362_v44 }
 0x44f   :  { %8672 = vmatpush3.msra.mxu1 %v10353_v38  ;;  %8630 = vmatprep.subr.mxu0 %v12671_v0 }
 0x450   :  { %8673 = vmatprep.subr.mxu1 %v12671_v0  ;;  %8631 = vmatpush3.msra.mxu0 %v10378_v58 }
 0x451   :  { %8674 = vmatpush3.msra.mxu1 %v10369_v52  ;;  %8632 = vmatprep.subr.mxu0 %v12671_v0 }
 0x452   :  { %8675 = vmatprep.subr.mxu1 %v12671_v0  ;;  %8633 = vmatpush3.msra.mxu0 %v10392_v9 }
 0x453   :  { %8676 = vmatpush3.msra.mxu1 %v10399_v36  ;;  %8634 = vmatprep.subr.mxu0 %v12671_v0 }
 0x454   :  { %8677 = vmatprep.subr.mxu1 %v12671_v0  ;;  %8635 = vmatpush3.msra.mxu0 %v12715_v39 }
 0x455   :  { %8678 = vmatpush3.msra.mxu1 %v10415_v5  ;;  %8636 = vmatprep.subr.mxu0 %v12671_v0 }
 0x456   :  { %8679 = vmatprep.subr.mxu1 %v12671_v0  ;;  %8637 = vmatpush3.msra.mxu0 %v12716_v34 }
 0x457   :  { %8680 = vmatpush3.msra.mxu1 %v10428_v25  ;;  %8638 = vmatprep.subr.mxu0 %v12671_v0 }
 0x458   :  { %8681 = vmatprep.subr.mxu1 %v12671_v0  ;;  %8639 = vmatpush3.msra.mxu0 %v12717_v10 }
 0x459   :  { %8682 = vmatpush3.msra.mxu1 %v10444_v53  ;;  %8683 = vmatprep.mubr.msk.f32.mxu1 %vm9852_vm0, %v12671_v0 }
 0x45a   :  { %8640 = vmatprep.subr.mxu0 %v12671_v0  ;;  %8684 = vmatmul.mubr.f32.vlgmr.msra.gmra.mxu1 %v11190_v3 }
 0x45b   :  { %8641 = vmatpush3.msra.mxu0 %v12718_v41  ;;  %8648 = vmatprep.mubr.msk.f32.mxu0 %vm9852_vm0, %v12671_v0 }
 0x45c   :  { %8642 = vmatprep.subr.mxu0 %v12671_v0  ;;  %8721 = vmatprep.subr.mxu1 %v12671_v0 }
 0x45d   :  { %8643 = vmatpush3.msra.mxu0 %v12719_v60  ;;  %8722 = vmatpush3.msra.mxu1 %v12720_v2 }
 0x45e   :  { %8644 = vmatprep.subr.mxu0 %v12671_v0  ;;  %8723 = vmatprep.subr.mxu1 %v12671_v0 }
 0x45f   :  { %8645 = vmatpush3.msra.mxu0 %v12721_v62  ;;  %8724 = vmatpush3.msra.mxu1 %v12722_v7 }
 0x460   :  { %8646 = vmatprep.subr.mxu0 %v12671_v0  ;;  %8725 = vmatprep.subr.mxu1 %v12671_v0 }
 0x461   :  { %8647 = vmatpush3.msra.mxu0 %v12723_v54  ;;  %8726 = vmatpush3.msra.mxu1 %v12724_v19 }
 0x462   :  { %8649 = vmatmul.mubr.f32.vlgmr.msra.gmra.mxu0 %v11190_v3  ;;  %8727 = vmatprep.subr.mxu1 %v12671_v0  ;;  %v12730_v3 = vld [vmem:[#allocation23_spill] sm:$0xff] }
 0x463   :  { %8728 = vmatpush3.msra.mxu1 %v12725_v51  ;;  %8686 = vmatprep.subr.mxu0 %v12671_v0 }
 0x464   :  { %8729 = vmatprep.subr.mxu1 %v12671_v0  ;;  %8687 = vmatpush3.msra.mxu0 %v10235_v6 }
 0x465   :  { %8730 = vmatpush3.msra.mxu1 %v12726_v21  ;;  %8688 = vmatprep.subr.mxu0 %v12671_v0 }
 0x466   :  { %8731 = vmatprep.subr.mxu1 %v12671_v0  ;;  %8689 = vmatpush3.msra.mxu0 %v10242_v11 }
 0x467   :  { %8732 = vmatpush3.msra.mxu1 %v12727_v46  ;;  %8690 = vmatprep.subr.mxu0 %v12671_v0 }
 0x468   :  { %8733 = vmatprep.subr.mxu1 %v12671_v0  ;;  %8691 = vmatpush3.msra.mxu0 %v10249_v15 }
 0x469   :  { %8734 = vmatpush3.msra.mxu1 %v12728_v12  ;;  %8692 = vmatprep.subr.mxu0 %v12671_v0 }
 0x46a   :  { %8735 = vmatprep.subr.mxu1 %v12671_v0  ;;  %8693 = vmatpush3.msra.mxu0 %v10259_v18 }
 0x46b   :  { %8736 = vmatpush3.msra.mxu1 %v12729_v59  ;;  %8694 = vmatprep.subr.mxu0 %v12671_v0 }
 0x46c   :  { %8737 = vmatprep.subr.mxu1 %v12671_v0  ;;  %8695 = vmatpush3.msra.mxu0 %v10270_v22 }
 0x46d   :  { %8738 = vmatpush3.msra.mxu1 %v12730_v3  ;;  %8696 = vmatprep.subr.mxu0 %v12671_v0 }
 0x46e   :  { %8739 = vmatprep.subr.mxu1 %v12671_v0  ;;  %8697 = vmatpush3.msra.mxu0 %v10282_v27 }
 0x46f   :  { %8740 = vmatpush3.msra.mxu1 %v12731_v56  ;;  %8698 = vmatprep.subr.mxu0 %v12671_v0 }
 0x470   :  { %8741 = vmatprep.subr.mxu1 %v12671_v0  ;;  %8699 = vmatpush3.msra.mxu0 %v10296_v35 }
 0x471   :  { %8742 = vmatpush3.msra.mxu1 %v12732_v17  ;;  %8700 = vmatprep.subr.mxu0 %v12671_v0  ;;  %v12735_v17 = vld [vmem:[#allocation32_spill] sm:$0xff] }
 0x472   :  { %8743 = vmatprep.subr.mxu1 %v12671_v0  ;;  %8701 = vmatpush3.msra.mxu0 %v10310_v47 }
 0x473   :  { %8744 = vmatpush3.msra.mxu1 %v12733_v37  ;;  %8702 = vmatprep.subr.mxu0 %v12671_v0  ;;  %v12736_v37 = vld [vmem:[#allocation33_spill] sm:$0xff] }
 0x474   :  { %8745 = vmatprep.subr.mxu1 %v12671_v0  ;;  %8703 = vmatpush3.msra.mxu0 %v10320_v57 }
 0x475   :  { %8746 = vmatpush3.msra.mxu1 %v12734_v43  ;;  %8704 = vmatprep.subr.mxu0 %v12671_v0  ;;  %v12737_v43 = vld [vmem:[#allocation34_spill] sm:$0xff] }
 0x476   :  { %8747 = vmatprep.subr.mxu1 %v12671_v0  ;;  %8705 = vmatpush3.msra.mxu0 %v10337_v13 }
 0x477   :  { %8748 = vmatpush3.msra.mxu1 %v12735_v17  ;;  %8706 = vmatprep.subr.mxu0 %v12671_v0 }
 0x478   :  { %8749 = vmatprep.subr.mxu1 %v12671_v0  ;;  %8707 = vmatpush3.msra.mxu0 %v10353_v38 }
 0x479   :  { %8750 = vmatpush3.msra.mxu1 %v12736_v37  ;;  %8708 = vmatprep.subr.mxu0 %v12671_v0 }
 0x47a   :  { %8751 = vmatprep.subr.mxu1 %v12671_v0  ;;  %8709 = vmatpush3.msra.mxu0 %v10369_v52 }
 0x47b   :  { %8752 = vmatpush3.msra.mxu1 %v12737_v43  ;;  %8710 = vmatprep.subr.mxu0 %v12671_v0 }
 0x47c   :  { %8753 = vmatprep.mubr.msk.f32.mxu1 %vm9852_vm0, %v12671_v0  ;;  %8791 = vmatprep.subr.mxu1 %v12671_v0 }
 0x47d   :  { %8711 = vmatpush3.msra.mxu0 %v10399_v36  ;;  %8718 = vmatprep.mubr.msk.f32.mxu0 %vm9852_vm0, %v12671_v0 }
 0x47e   :  { %8712 = vmatprep.subr.mxu0 %v12671_v0 }
 0x47f   :  { %8713 = vmatpush3.msra.mxu0 %v10415_v5 }
 0x480   :  { %8714 = vmatprep.subr.mxu0 %v12671_v0 }
 0x481   :  { %8715 = vmatpush3.msra.mxu0 %v10428_v25 }
 0x482   :  { %8716 = vmatprep.subr.mxu0 %v12671_v0 }
 0x483   :  { %8717 = vmatpush3.msra.mxu0 %v10444_v53 }
 0x484   :  { %8756 = vmatprep.subr.mxu0 %v12671_v0 }
 0x4d8   :  { %v2930_v43 = vpop.f32.mrf.mxu1 }
 0x4da   :  { %v8545_v37 = vpop.f32.mrf.mxu1 }
 0x4e0   :  { %v2779_v17 = vpop.f32.mrf.mxu0 }
 0x4e1   :  { %v2931_v51 = vadd.f32 %v2930_v43, %v2779_v17  ;;  %v12748_v17 = vld [vmem:[#allocation16_spill] sm:$0xff]  ;;  %v12749_v43 = vld [vmem:[#allocation17_spill] sm:$0xff] }
 0x4e2   :  { %v8510_v56 = vpop.f32.mrf.mxu0 }
 0x4f8   :  { %v3123_v3 = vpop.f32.mrf.mxu1 }
 0x4fa   :  { %v8615_v59 = vpop.f32.mrf.mxu1 }
 0x501   :  { %v3034_v12 = vpop.f32.mrf.mxu0 }
 0x502   :  { %v3035_v54 = vadd.f32 %v3034_v12, %v2931_v51  ;;  %v12744_v51 = vld [vmem:[#allocation13_spill] sm:$0xff]  ;;  %v12746_v12 = vld [vmem:[#allocation14_spill] sm:$0xff] }
 0x503   :  { %v8580_v46 = vpop.f32.mrf.mxu0 }
 0x504   :  { %v3124_v7 = vadd.f32 %v3123_v3, %v3035_v54  ;;  %v12743_v54 = vld [vmem:[#allocation28_spill] sm:$0xff]  ;;  %v12747_v3 = vld [vmem:[#allocation15_spill] sm:$0xff] }
 0x51a   :  { %v3329_v21 = vpop.f32.mrf.mxu1 }
 0x51c   :  { %v8685_v19 = vpop.f32.mrf.mxu1 }
 0x522   :  { %v3242_v62 = vpop.f32.mrf.mxu0 }
 0x523   :  { %v3243_v2 = vadd.f32 %v3242_v62, %v3124_v7  ;;  %v12741_v62 = vld [vmem:[#allocation26_spill] sm:$0xff]  ;;  %v12742_v7 = vld [vmem:[#allocation12_spill] sm:$0xff] }
 0x524   :  { %v8650_v60 = vpop.f32.mrf.mxu0 }
 0x525   :  { %v3330_v41 = vadd.f32 %v3329_v21, %v3243_v2  ;;  %v12739_v60 = vld [vmem:[#allocation22_spill] sm:$0xff]  ;;  %v12740_v2 = vld [vmem:[#allocation24_spill] sm:$0xff] }
 0x526   :  { %v12745_v21 = vld [vmem:[#allocation30_spill] sm:$0xff] }
 0x527   :  { %v3334_v10 = vrot.slane %v3330_v41, 5  ;;  %v12738_v41 = vld [vmem:[#allocation20_spill] sm:$0xff] }
 0x529   :  { %v3336_v34 = vadd.f32 %v3334_v10, %v10744_v26 }
 0x52b   :  { %9750 = vtanh.f32 %v3336_v34 }
 0x538   :  { %v9751_v37 = vpop.eup %9750 }
 0x539   :  { %v3339_v56 = vrot.slane %v9751_v37, 3  ;;  %v11407_v59 = vsel %vm5938_vm3, %v11188_v50, %v9751_v37  ;;  %v12750_v37 = vld [vmem:[#allocation19_spill] sm:$0xff] }
 0x53b   :  { %v11409_v46 = vand.u32 4294901760, %v3339_v56 }
 0x53d   :  { %v11412_v19 = vsub.f32 %v3339_v56, %v11409_v46  ;;  %8754 = vmatmul.mubr.f32.vlgmr.msra.gmra.mxu1 %v11409_v46  ;;  %v12751_v56 = vld [vmem:[#allocation21_spill] sm:$0xff] }
 0x53e   :  { %8792 = vmatpush3.msra.mxu1 %v10235_v6  ;;  %8823 = vmatprep.mubr.msk.f32.mxu1 %vm9852_vm0, %v12671_v0 }
 0x53f   :  { %8793 = vmatprep.subr.mxu1 %v12671_v0  ;;  %v3424_v34 = vand.u32 4294901760, %v11412_v19 }
 0x540   :  { %8794 = vmatpush3.msra.mxu1 %v10242_v11 }
 0x541   :  { %8795 = vmatprep.subr.mxu1 %v12671_v0  ;;  %v3425_v50 = vsub.f32 %v11412_v19, %v3424_v34 }
 0x542   :  { %8796 = vmatpush3.msra.mxu1 %v10249_v15 }
 0x543   :  { %8797 = vmatprep.subr.mxu1 %v12671_v0  ;;  %v3426_v10 = vand.u32 4294901760, %v3425_v50  ;;  %v12755_v50 = vld [vmem:[#allocation29_spill] sm:$0xff] }
 0x544   :  { %8798 = vmatpush3.msra.mxu1 %v10259_v18 }
 0x545   :  { %8799 = vmatprep.subr.mxu1 %v12671_v0  ;;  %8719 = vmatmul.mubr.f32.vlgmr.msra.gmra.mxu0 %v3426_v10  ;;  %v12756_v10 = vld [vmem:[#allocation31_spill] sm:$0xff] }
 0x546   :  { %8757 = vmatpush3.msra.mxu0 %v10252_v16  ;;  %8800 = vmatpush3.msra.mxu1 %v10270_v22 }
 0x547   :  { %8758 = vmatprep.subr.mxu0 %v12671_v0  ;;  %8801 = vmatprep.subr.mxu1 %v12671_v0 }
 0x548   :  { %8759 = vmatpush3.msra.mxu0 %v10262_v20  ;;  %8802 = vmatpush3.msra.mxu1 %v10282_v27 }
 0x549   :  { %8760 = vmatprep.subr.mxu0 %v12671_v0  ;;  %8803 = vmatprep.subr.mxu1 %v12671_v0 }
 0x54a   :  { %8761 = vmatpush3.msra.mxu0 %v10276_v24  ;;  %8804 = vmatpush3.msra.mxu1 %v10296_v35 }
 0x54b   :  { %8762 = vmatprep.subr.mxu0 %v12671_v0  ;;  %8805 = vmatprep.subr.mxu1 %v12671_v0 }
 0x54c   :  { %8763 = vmatpush3.msra.mxu0 %v10288_v29  ;;  %8806 = vmatpush3.msra.mxu1 %v10310_v47 }
 0x54d   :  { %8764 = vmatprep.subr.mxu0 %v12671_v0  ;;  %8807 = vmatprep.subr.mxu1 %v12671_v0 }
 0x54e   :  { %8765 = vmatpush3.msra.mxu0 %v10302_v45  ;;  %8808 = vmatpush3.msra.mxu1 %v10320_v57 }
 0x54f   :  { %8766 = vmatprep.subr.mxu0 %v12671_v0  ;;  %8809 = vmatprep.subr.mxu1 %v12671_v0 }
 0x550   :  { %8767 = vmatpush3.msra.mxu0 %v10316_v55  ;;  %8810 = vmatpush3.msra.mxu1 %v10337_v13 }
 0x551   :  { %8768 = vmatprep.subr.mxu0 %v12671_v0  ;;  %8811 = vmatprep.subr.mxu1 %v12671_v0 }
 0x552   :  { %8769 = vmatpush3.msra.mxu0 %v10332_v8  ;;  %8812 = vmatpush3.msra.mxu1 %v10353_v38 }
 0x553   :  { %8770 = vmatprep.subr.mxu0 %v12671_v0  ;;  %8813 = vmatprep.subr.mxu1 %v12671_v0 }
 0x554   :  { %8771 = vmatpush3.msra.mxu0 %v10349_v32  ;;  %8814 = vmatpush3.msra.mxu1 %v10369_v52 }
 0x555   :  { %8772 = vmatprep.subr.mxu0 %v12671_v0  ;;  %8815 = vmatprep.subr.mxu1 %v12671_v0 }
 0x556   :  { %8773 = vmatpush3.msra.mxu0 %v10365_v49  ;;  %8816 = vmatpush3.msra.mxu1 %v10399_v36 }
 0x557   :  { %8774 = vmatprep.subr.mxu0 %v12671_v0  ;;  %8817 = vmatprep.subr.mxu1 %v12671_v0 }
 0x558   :  { %8775 = vmatpush3.msra.mxu0 %v10381_v1  ;;  %8818 = vmatpush3.msra.mxu1 %v10415_v5 }
 0x559   :  { %8776 = vmatprep.subr.mxu0 %v12671_v0  ;;  %8819 = vmatprep.subr.mxu1 %v12671_v0 }
 0x55a   :  { %8777 = vmatpush3.msra.mxu0 %v10395_v33  ;;  %8820 = vmatpush3.msra.mxu1 %v10428_v25 }
 0x55b   :  { %8778 = vmatprep.subr.mxu0 %v12671_v0  ;;  %8821 = vmatprep.subr.mxu1 %v12671_v0 }
 0x55c   :  { %8779 = vmatpush3.msra.mxu0 %v10411_v4  ;;  %8822 = vmatpush3.msra.mxu1 %v10444_v53 }
 0x55d   :  { %8780 = vmatprep.subr.mxu0 %v12671_v0  ;;  %8824 = vmatmul.mubr.f32.vlgmr.msra.gmra.mxu1 %v3424_v34  ;;  %v12754_v34 = vld [vmem:[#allocation27_spill] sm:$0xff] }
 0x55e   :  { %8861 = vmatprep.subr.mxu1 %v12671_v0  ;;  %8781 = vmatpush3.msra.mxu0 %v10431_v30 }
 0x55f   :  { %8862 = vmatpush3.msra.mxu1 %v10235_v6  ;;  %8782 = vmatprep.subr.mxu0 %v12671_v0 }
 0x560   :  { %8863 = vmatprep.subr.mxu1 %v12671_v0  ;;  %8783 = vmatpush3.msra.mxu0 %v10447_v61 }
 0x561   :  { %8864 = vmatpush3.msra.mxu1 %v10242_v11  ;;  %8784 = vmatprep.subr.mxu0 %v12671_v0 }
 0x562   :  { %8865 = vmatprep.subr.mxu1 %v12671_v0  ;;  %8785 = vmatpush3.msra.mxu0 %v10461_v42 }
 0x563   :  { %8866 = vmatpush3.msra.mxu1 %v10249_v15  ;;  %8786 = vmatprep.subr.mxu0 %v12671_v0 }
 0x564   :  { %8867 = vmatprep.subr.mxu1 %v12671_v0  ;;  %8787 = vmatpush3.msra.mxu0 %v10475_v14 }
 0x565   :  { %8788 = vmatprep.mubr.msk.f32.mxu0 %vm9852_vm0, %v12671_v0  ;;  %8868 = vmatpush3.msra.mxu1 %v10259_v18 }
 0x566   :  { %8789 = vmatmul.mubr.f32.vlgmr.msra.gmra.mxu0 %v11412_v19  ;;  %8826 = vmatprep.subr.mxu0 %v12671_v0  ;;  %v12753_v19 = vld [vmem:[#allocation25_spill] sm:$0xff] }
 0x567   :  { %8869 = vmatprep.subr.mxu1 %v12671_v0  ;;  %8827 = vmatpush3.msra.mxu0 %v10273_v23 }
 0x568   :  { %8870 = vmatpush3.msra.mxu1 %v10270_v22  ;;  %8828 = vmatprep.subr.mxu0 %v12671_v0 }
 0x569   :  { %8871 = vmatprep.subr.mxu1 %v12671_v0  ;;  %8829 = vmatpush3.msra.mxu0 %v10285_v28 }
 0x56a   :  { %8872 = vmatpush3.msra.mxu1 %v10282_v27  ;;  %8830 = vmatprep.subr.mxu0 %v12671_v0 }
 0x56b   :  { %8873 = vmatprep.subr.mxu1 %v12671_v0  ;;  %8831 = vmatpush3.msra.mxu0 %v10299_v40 }
 0x56c   :  { %8874 = vmatpush3.msra.mxu1 %v10296_v35  ;;  %8832 = vmatprep.subr.mxu0 %v12671_v0 }
 0x56d   :  { %8875 = vmatprep.subr.mxu1 %v12671_v0  ;;  %8833 = vmatpush3.msra.mxu0 %v10313_v48 }
 0x56e   :  { %8876 = vmatpush3.msra.mxu1 %v10310_v47  ;;  %8834 = vmatprep.subr.mxu0 %v12671_v0 }
 0x56f   :  { %8877 = vmatprep.subr.mxu1 %v12671_v0  ;;  %8835 = vmatpush3.msra.mxu0 %v10329_v63 }
 0x570   :  { %8878 = vmatpush3.msra.mxu1 %v10320_v57  ;;  %8836 = vmatprep.subr.mxu0 %v12671_v0 }
 0x571   :  { %8879 = vmatprep.subr.mxu1 %v12671_v0  ;;  %8837 = vmatpush3.msra.mxu0 %v10346_v31 }
 0x572   :  { %8880 = vmatpush3.msra.mxu1 %v10337_v13  ;;  %8838 = vmatprep.subr.mxu0 %v12671_v0 }
 0x573   :  { %8881 = vmatprep.subr.mxu1 %v12671_v0  ;;  %8839 = vmatpush3.msra.mxu0 %v10362_v44 }
 0x574   :  { %8882 = vmatpush3.msra.mxu1 %v10353_v38  ;;  %8840 = vmatprep.subr.mxu0 %v12671_v0 }
 0x575   :  { %8883 = vmatprep.subr.mxu1 %v12671_v0  ;;  %8841 = vmatpush3.msra.mxu0 %v10378_v58 }
 0x576   :  { %8884 = vmatpush3.msra.mxu1 %v10369_v52  ;;  %8842 = vmatprep.subr.mxu0 %v12671_v0 }
 0x577   :  { %8885 = vmatprep.subr.mxu1 %v12671_v0  ;;  %8843 = vmatpush3.msra.mxu0 %v10392_v9 }
 0x578   :  { %8886 = vmatpush3.msra.mxu1 %v10399_v36  ;;  %8844 = vmatprep.subr.mxu0 %v12671_v0 }
 0x579   :  { %8887 = vmatprep.subr.mxu1 %v12671_v0  ;;  %8845 = vmatpush3.msra.mxu0 %v12715_v39 }
 0x57a   :  { %8888 = vmatpush3.msra.mxu1 %v10415_v5  ;;  %8846 = vmatprep.subr.mxu0 %v12671_v0 }
 0x57b   :  { %8889 = vmatprep.subr.mxu1 %v12671_v0  ;;  %8847 = vmatpush3.msra.mxu0 %v12738_v41 }
 0x57c   :  { %8890 = vmatpush3.msra.mxu1 %v10428_v25  ;;  %8848 = vmatprep.subr.mxu0 %v12671_v0 }
 0x57d   :  { %8891 = vmatprep.subr.mxu1 %v12671_v0  ;;  %8849 = vmatpush3.msra.mxu0 %v12739_v60 }
 0x57e   :  { %8892 = vmatpush3.msra.mxu1 %v10444_v53  ;;  %8893 = vmatprep.mubr.msk.f32.mxu1 %vm9852_vm0, %v12671_v0 }
 0x57f   :  { %8850 = vmatprep.subr.mxu0 %v12671_v0  ;;  %8894 = vmatmul.mubr.f32.vlgmr.msra.gmra.mxu1 %v11409_v46 }
 0x580   :  { %8851 = vmatpush3.msra.mxu0 %v12740_v2  ;;  %8858 = vmatprep.mubr.msk.f32.mxu0 %vm9852_vm0, %v12671_v0 }
 0x581   :  { %8852 = vmatprep.subr.mxu0 %v12671_v0  ;;  %8931 = vmatprep.subr.mxu1 %v12671_v0 }
 0x582   :  { %8853 = vmatpush3.msra.mxu0 %v12741_v62  ;;  %8932 = vmatpush3.msra.mxu1 %v12742_v7 }
 0x583   :  { %8854 = vmatprep.subr.mxu0 %v12671_v0  ;;  %8933 = vmatprep.subr.mxu1 %v12671_v0 }
 0x584   :  { %8855 = vmatpush3.msra.mxu0 %v12743_v54  ;;  %8934 = vmatpush3.msra.mxu1 %v12744_v51 }
 0x585   :  { %8856 = vmatprep.subr.mxu0 %v12671_v0  ;;  %8935 = vmatprep.subr.mxu1 %v12671_v0 }
 0x586   :  { %8857 = vmatpush3.msra.mxu0 %v12745_v21  ;;  %8936 = vmatpush3.msra.mxu1 %v12746_v12 }
 0x587   :  { %8859 = vmatmul.mubr.f32.vlgmr.msra.gmra.mxu0 %v11409_v46  ;;  %8937 = vmatprep.subr.mxu1 %v12671_v0  ;;  %v12752_v46 = vld [vmem:[#allocation23_spill] sm:$0xff] }
 0x588   :  { %8938 = vmatpush3.msra.mxu1 %v12747_v3  ;;  %8896 = vmatprep.subr.mxu0 %v12671_v0 }
 0x589   :  { %8939 = vmatprep.subr.mxu1 %v12671_v0  ;;  %8897 = vmatpush3.msra.mxu0 %v10235_v6 }
 0x58a   :  { %8940 = vmatpush3.msra.mxu1 %v12748_v17  ;;  %8898 = vmatprep.subr.mxu0 %v12671_v0 }
 0x58b   :  { %8941 = vmatprep.subr.mxu1 %v12671_v0  ;;  %8899 = vmatpush3.msra.mxu0 %v10242_v11 }
 0x58c   :  { %8942 = vmatpush3.msra.mxu1 %v12749_v43  ;;  %8900 = vmatprep.subr.mxu0 %v12671_v0 }
 0x58d   :  { %8943 = vmatprep.subr.mxu1 %v12671_v0  ;;  %8901 = vmatpush3.msra.mxu0 %v10249_v15 }
 0x58e   :  { %8944 = vmatpush3.msra.mxu1 %v12750_v37  ;;  %8902 = vmatprep.subr.mxu0 %v12671_v0 }
 0x58f   :  { %8945 = vmatprep.subr.mxu1 %v12671_v0  ;;  %8903 = vmatpush3.msra.mxu0 %v10259_v18 }
 0x590   :  { %8946 = vmatpush3.msra.mxu1 %v12751_v56  ;;  %8904 = vmatprep.subr.mxu0 %v12671_v0 }
 0x591   :  { %8947 = vmatprep.subr.mxu1 %v12671_v0  ;;  %8905 = vmatpush3.msra.mxu0 %v10270_v22 }
 0x592   :  { %8948 = vmatpush3.msra.mxu1 %v12752_v46  ;;  %8906 = vmatprep.subr.mxu0 %v12671_v0 }
 0x593   :  { %8949 = vmatprep.subr.mxu1 %v12671_v0  ;;  %8907 = vmatpush3.msra.mxu0 %v10282_v27 }
 0x594   :  { %8950 = vmatpush3.msra.mxu1 %v12753_v19  ;;  %8908 = vmatprep.subr.mxu0 %v12671_v0 }
 0x595   :  { %8951 = vmatprep.subr.mxu1 %v12671_v0  ;;  %8909 = vmatpush3.msra.mxu0 %v10296_v35 }
 0x596   :  { %8952 = vmatpush3.msra.mxu1 %v12754_v34  ;;  %8910 = vmatprep.subr.mxu0 %v12671_v0  ;;  %v12757_v34 = vld [vmem:[#allocation32_spill] sm:$0xff] }
 0x597   :  { %8953 = vmatprep.subr.mxu1 %v12671_v0  ;;  %8911 = vmatpush3.msra.mxu0 %v10310_v47 }
 0x598   :  { %8954 = vmatpush3.msra.mxu1 %v12755_v50  ;;  %8912 = vmatprep.subr.mxu0 %v12671_v0  ;;  %v12758_v50 = vld [vmem:[#allocation33_spill] sm:$0xff] }
 0x599   :  { %8955 = vmatprep.subr.mxu1 %v12671_v0  ;;  %8913 = vmatpush3.msra.mxu0 %v10320_v57 }
 0x59a   :  { %8956 = vmatpush3.msra.mxu1 %v12756_v10  ;;  %8914 = vmatprep.subr.mxu0 %v12671_v0  ;;  %v12759_v10 = vld [vmem:[#allocation34_spill] sm:$0xff] }
 0x59b   :  { %8957 = vmatprep.subr.mxu1 %v12671_v0  ;;  %8915 = vmatpush3.msra.mxu0 %v10337_v13 }
 0x59c   :  { %8958 = vmatpush3.msra.mxu1 %v12757_v34  ;;  %8916 = vmatprep.subr.mxu0 %v12671_v0 }
 0x59d   :  { %8959 = vmatprep.subr.mxu1 %v12671_v0  ;;  %8917 = vmatpush3.msra.mxu0 %v10353_v38 }
 0x59e   :  { %8960 = vmatpush3.msra.mxu1 %v12758_v50  ;;  %8918 = vmatprep.subr.mxu0 %v12671_v0 }
 0x59f   :  { %8961 = vmatprep.subr.mxu1 %v12671_v0  ;;  %8919 = vmatpush3.msra.mxu0 %v10369_v52 }
 0x5a0   :  { %8962 = vmatpush3.msra.mxu1 %v12759_v10  ;;  %8920 = vmatprep.subr.mxu0 %v12671_v0 }
 0x5a1   :  { %8963 = vmatprep.mubr.msk.f32.mxu1 %vm9852_vm0, %v12671_v0  ;;  %9001 = vmatprep.subr.mxu1 %v12671_v0 }
 0x5a2   :  { %8921 = vmatpush3.msra.mxu0 %v10399_v36  ;;  %8928 = vmatprep.mubr.msk.f32.mxu0 %vm9852_vm0, %v12671_v0 }
 0x5a3   :  { %8922 = vmatprep.subr.mxu0 %v12671_v0 }
 0x5a4   :  { %8923 = vmatpush3.msra.mxu0 %v10415_v5 }
 0x5a5   :  { %8924 = vmatprep.subr.mxu0 %v12671_v0 }
 0x5a6   :  { %8925 = vmatpush3.msra.mxu0 %v10428_v25 }
 0x5a7   :  { %8926 = vmatprep.subr.mxu0 %v12671_v0 }
 0x5a8   :  { %8927 = vmatpush3.msra.mxu0 %v10444_v53 }
 0x5a9   :  { %8966 = vmatprep.subr.mxu0 %v12671_v0 }
 0x5fd   :  { %v3579_v10 = vpop.f32.mrf.mxu1 }
 0x5ff   :  { %v8755_v50 = vpop.f32.mrf.mxu1 }
 0x605   :  { %v3428_v34 = vpop.f32.mrf.mxu0 }
 0x606   :  { %v3580_v3 = vadd.f32 %v3579_v10, %v3428_v34  ;;  %v12770_v34 = vld [vmem:[#allocation16_spill] sm:$0xff]  ;;  %v12771_v10 = vld [vmem:[#allocation17_spill] sm:$0xff] }
 0x607   :  { %v8720_v19 = vpop.f32.mrf.mxu0 }
 0x61d   :  { %v3772_v46 = vpop.f32.mrf.mxu1 }
 0x61f   :  { %v8825_v56 = vpop.f32.mrf.mxu1 }
 0x626   :  { %v3683_v37 = vpop.f32.mrf.mxu0 }
 0x627   :  { %v3684_v21 = vadd.f32 %v3683_v37, %v3580_v3  ;;  %v12766_v3 = vld [vmem:[#allocation13_spill] sm:$0xff]  ;;  %v12768_v37 = vld [vmem:[#allocation14_spill] sm:$0xff] }
 0x628   :  { %v8790_v43 = vpop.f32.mrf.mxu0 }
 0x629   :  { %v3773_v51 = vadd.f32 %v3772_v46, %v3684_v21  ;;  %v12765_v21 = vld [vmem:[#allocation28_spill] sm:$0xff]  ;;  %v12769_v46 = vld [vmem:[#allocation15_spill] sm:$0xff] }
 0x63f   :  { %v3978_v17 = vpop.f32.mrf.mxu1 }
 0x641   :  { %v8895_v12 = vpop.f32.mrf.mxu1 }
 0x647   :  { %v3891_v54 = vpop.f32.mrf.mxu0 }
 0x648   :  { %v3892_v7 = vadd.f32 %v3891_v54, %v3773_v51  ;;  %v12763_v54 = vld [vmem:[#allocation26_spill] sm:$0xff]  ;;  %v12764_v51 = vld [vmem:[#allocation12_spill] sm:$0xff] }
 0x649   :  { %v8860_v62 = vpop.f32.mrf.mxu0 }
 0x64a   :  { %v3979_v2 = vadd.f32 %v3978_v17, %v3892_v7  ;;  %v12761_v62 = vld [vmem:[#allocation22_spill] sm:$0xff]  ;;  %v12762_v7 = vld [vmem:[#allocation24_spill] sm:$0xff] }
 0x64b   :  { %v12767_v17 = vld [vmem:[#allocation30_spill] sm:$0xff] }
 0x64c   :  { %v3983_v60 = vrot.slane %v3979_v2, 4  ;;  %v12760_v2 = vld [vmem:[#allocation20_spill] sm:$0xff] }
 0x64e   :  { %v3985_v41 = vadd.f32 %v3983_v60, %v10744_v26 }
 0x650   :  { %9752 = vtanh.f32 %v3985_v41 }
 0x65d   :  { %v9753_v50 = vpop.eup %9752 }
 0x65e   :  { %v3988_v19 = vrot.slane %v9753_v50, 4  ;;  %v11626_v56 = vsel %vm5940_vm4, %v11407_v59, %v9753_v50  ;;  %v12772_v50 = vld [vmem:[#allocation19_spill] sm:$0xff] }
 0x660   :  { %v11628_v43 = vand.u32 4294901760, %v3988_v19 }
 0x662   :  { %v11631_v12 = vsub.f32 %v3988_v19, %v11628_v43  ;;  %8964 = vmatmul.mubr.f32.vlgmr.msra.gmra.mxu1 %v11628_v43  ;;  %v12773_v19 = vld [vmem:[#allocation21_spill] sm:$0xff] }
 0x663   :  { %9002 = vmatpush3.msra.mxu1 %v10235_v6  ;;  %9033 = vmatprep.mubr.msk.f32.mxu1 %vm9852_vm0, %v12671_v0 }
 0x664   :  { %9003 = vmatprep.subr.mxu1 %v12671_v0  ;;  %v4073_v41 = vand.u32 4294901760, %v11631_v12 }
 0x665   :  { %9004 = vmatpush3.msra.mxu1 %v10242_v11 }
 0x666   :  { %9005 = vmatprep.subr.mxu1 %v12671_v0  ;;  %v4074_v59 = vsub.f32 %v11631_v12, %v4073_v41 }
 0x667   :  { %9006 = vmatpush3.msra.mxu1 %v10249_v15 }
 0x668   :  { %9007 = vmatprep.subr.mxu1 %v12671_v0  ;;  %v4075_v60 = vand.u32 4294901760, %v4074_v59  ;;  %v12777_v59 = vld [vmem:[#allocation29_spill] sm:$0xff] }
 0x669   :  { %9008 = vmatpush3.msra.mxu1 %v10259_v18 }
 0x66a   :  { %9009 = vmatprep.subr.mxu1 %v12671_v0  ;;  %8929 = vmatmul.mubr.f32.vlgmr.msra.gmra.mxu0 %v4075_v60  ;;  %v12778_v60 = vld [vmem:[#allocation31_spill] sm:$0xff] }
 0x66b   :  { %8967 = vmatpush3.msra.mxu0 %v10252_v16  ;;  %9010 = vmatpush3.msra.mxu1 %v10270_v22 }
 0x66c   :  { %8968 = vmatprep.subr.mxu0 %v12671_v0  ;;  %9011 = vmatprep.subr.mxu1 %v12671_v0 }
 0x66d   :  { %8969 = vmatpush3.msra.mxu0 %v10262_v20  ;;  %9012 = vmatpush3.msra.mxu1 %v10282_v27 }
 0x66e   :  { %8970 = vmatprep.subr.mxu0 %v12671_v0  ;;  %9013 = vmatprep.subr.mxu1 %v12671_v0 }
 0x66f   :  { %8971 = vmatpush3.msra.mxu0 %v10276_v24  ;;  %9014 = vmatpush3.msra.mxu1 %v10296_v35 }
 0x670   :  { %8972 = vmatprep.subr.mxu0 %v12671_v0  ;;  %9015 = vmatprep.subr.mxu1 %v12671_v0 }
 0x671   :  { %8973 = vmatpush3.msra.mxu0 %v10288_v29  ;;  %9016 = vmatpush3.msra.mxu1 %v10310_v47 }
 0x672   :  { %8974 = vmatprep.subr.mxu0 %v12671_v0  ;;  %9017 = vmatprep.subr.mxu1 %v12671_v0 }
 0x673   :  { %8975 = vmatpush3.msra.mxu0 %v10302_v45  ;;  %9018 = vmatpush3.msra.mxu1 %v10320_v57 }
 0x674   :  { %8976 = vmatprep.subr.mxu0 %v12671_v0  ;;  %9019 = vmatprep.subr.mxu1 %v12671_v0 }
 0x675   :  { %8977 = vmatpush3.msra.mxu0 %v10316_v55  ;;  %9020 = vmatpush3.msra.mxu1 %v10337_v13 }
 0x676   :  { %8978 = vmatprep.subr.mxu0 %v12671_v0  ;;  %9021 = vmatprep.subr.mxu1 %v12671_v0 }
 0x677   :  { %8979 = vmatpush3.msra.mxu0 %v10332_v8  ;;  %9022 = vmatpush3.msra.mxu1 %v10353_v38 }
 0x678   :  { %8980 = vmatprep.subr.mxu0 %v12671_v0  ;;  %9023 = vmatprep.subr.mxu1 %v12671_v0 }
 0x679   :  { %8981 = vmatpush3.msra.mxu0 %v10349_v32  ;;  %9024 = vmatpush3.msra.mxu1 %v10369_v52 }
 0x67a   :  { %8982 = vmatprep.subr.mxu0 %v12671_v0  ;;  %9025 = vmatprep.subr.mxu1 %v12671_v0 }
 0x67b   :  { %8983 = vmatpush3.msra.mxu0 %v10365_v49  ;;  %9026 = vmatpush3.msra.mxu1 %v10399_v36 }
 0x67c   :  { %8984 = vmatprep.subr.mxu0 %v12671_v0  ;;  %9027 = vmatprep.subr.mxu1 %v12671_v0 }
 0x67d   :  { %8985 = vmatpush3.msra.mxu0 %v10381_v1  ;;  %9028 = vmatpush3.msra.mxu1 %v10415_v5 }
 0x67e   :  { %8986 = vmatprep.subr.mxu0 %v12671_v0  ;;  %9029 = vmatprep.subr.mxu1 %v12671_v0 }
 0x67f   :  { %8987 = vmatpush3.msra.mxu0 %v10395_v33  ;;  %9030 = vmatpush3.msra.mxu1 %v10428_v25 }
 0x680   :  { %8988 = vmatprep.subr.mxu0 %v12671_v0  ;;  %9031 = vmatprep.subr.mxu1 %v12671_v0 }
 0x681   :  { %8989 = vmatpush3.msra.mxu0 %v10411_v4  ;;  %9032 = vmatpush3.msra.mxu1 %v10444_v53 }
 0x682   :  { %8990 = vmatprep.subr.mxu0 %v12671_v0  ;;  %9034 = vmatmul.mubr.f32.vlgmr.msra.gmra.mxu1 %v4073_v41  ;;  %v12776_v41 = vld [vmem:[#allocation27_spill] sm:$0xff] }
 0x683   :  { %9071 = vmatprep.subr.mxu1 %v12671_v0  ;;  %8991 = vmatpush3.msra.mxu0 %v10431_v30 }
 0x684   :  { %9072 = vmatpush3.msra.mxu1 %v10235_v6  ;;  %8992 = vmatprep.subr.mxu0 %v12671_v0 }
 0x685   :  { %9073 = vmatprep.subr.mxu1 %v12671_v0  ;;  %8993 = vmatpush3.msra.mxu0 %v10447_v61 }
 0x686   :  { %9074 = vmatpush3.msra.mxu1 %v10242_v11  ;;  %8994 = vmatprep.subr.mxu0 %v12671_v0 }
 0x687   :  { %9075 = vmatprep.subr.mxu1 %v12671_v0  ;;  %8995 = vmatpush3.msra.mxu0 %v10461_v42 }
 0x688   :  { %9076 = vmatpush3.msra.mxu1 %v10249_v15  ;;  %8996 = vmatprep.subr.mxu0 %v12671_v0 }
 0x689   :  { %9077 = vmatprep.subr.mxu1 %v12671_v0  ;;  %8997 = vmatpush3.msra.mxu0 %v10475_v14 }
 0x68a   :  { %8998 = vmatprep.mubr.msk.f32.mxu0 %vm9852_vm0, %v12671_v0  ;;  %9078 = vmatpush3.msra.mxu1 %v10259_v18 }
 0x68b   :  { %8999 = vmatmul.mubr.f32.vlgmr.msra.gmra.mxu0 %v11631_v12  ;;  %9036 = vmatprep.subr.mxu0 %v12671_v0  ;;  %v12775_v12 = vld [vmem:[#allocation25_spill] sm:$0xff] }
 0x68c   :  { %9079 = vmatprep.subr.mxu1 %v12671_v0  ;;  %9037 = vmatpush3.msra.mxu0 %v10273_v23 }
 0x68d   :  { %9080 = vmatpush3.msra.mxu1 %v10270_v22  ;;  %9038 = vmatprep.subr.mxu0 %v12671_v0 }
 0x68e   :  { %9081 = vmatprep.subr.mxu1 %v12671_v0  ;;  %9039 = vmatpush3.msra.mxu0 %v10285_v28 }
 0x68f   :  { %9082 = vmatpush3.msra.mxu1 %v10282_v27  ;;  %9040 = vmatprep.subr.mxu0 %v12671_v0 }
 0x690   :  { %9083 = vmatprep.subr.mxu1 %v12671_v0  ;;  %9041 = vmatpush3.msra.mxu0 %v10299_v40 }
 0x691   :  { %9084 = vmatpush3.msra.mxu1 %v10296_v35  ;;  %9042 = vmatprep.subr.mxu0 %v12671_v0 }
 0x692   :  { %9085 = vmatprep.subr.mxu1 %v12671_v0  ;;  %9043 = vmatpush3.msra.mxu0 %v10313_v48 }
 0x693   :  { %9086 = vmatpush3.msra.mxu1 %v10310_v47  ;;  %9044 = vmatprep.subr.mxu0 %v12671_v0 }
 0x694   :  { %9087 = vmatprep.subr.mxu1 %v12671_v0  ;;  %9045 = vmatpush3.msra.mxu0 %v10329_v63 }
 0x695   :  { %9088 = vmatpush3.msra.mxu1 %v10320_v57  ;;  %9046 = vmatprep.subr.mxu0 %v12671_v0 }
 0x696   :  { %9089 = vmatprep.subr.mxu1 %v12671_v0  ;;  %9047 = vmatpush3.msra.mxu0 %v10346_v31 }
 0x697   :  { %9090 = vmatpush3.msra.mxu1 %v10337_v13  ;;  %9048 = vmatprep.subr.mxu0 %v12671_v0 }
 0x698   :  { %9091 = vmatprep.subr.mxu1 %v12671_v0  ;;  %9049 = vmatpush3.msra.mxu0 %v10362_v44 }
 0x699   :  { %9092 = vmatpush3.msra.mxu1 %v10353_v38  ;;  %9050 = vmatprep.subr.mxu0 %v12671_v0 }
 0x69a   :  { %9093 = vmatprep.subr.mxu1 %v12671_v0  ;;  %9051 = vmatpush3.msra.mxu0 %v10378_v58 }
 0x69b   :  { %9094 = vmatpush3.msra.mxu1 %v10369_v52  ;;  %9052 = vmatprep.subr.mxu0 %v12671_v0 }
 0x69c   :  { %9095 = vmatprep.subr.mxu1 %v12671_v0  ;;  %9053 = vmatpush3.msra.mxu0 %v10392_v9 }
 0x69d   :  { %9096 = vmatpush3.msra.mxu1 %v10399_v36  ;;  %9054 = vmatprep.subr.mxu0 %v12671_v0 }
 0x69e   :  { %9097 = vmatprep.subr.mxu1 %v12671_v0  ;;  %9055 = vmatpush3.msra.mxu0 %v12715_v39 }
 0x69f   :  { %9098 = vmatpush3.msra.mxu1 %v10415_v5  ;;  %9056 = vmatprep.subr.mxu0 %v12671_v0 }
 0x6a0   :  { %9099 = vmatprep.subr.mxu1 %v12671_v0  ;;  %9057 = vmatpush3.msra.mxu0 %v12760_v2 }
 0x6a1   :  { %9100 = vmatpush3.msra.mxu1 %v10428_v25  ;;  %9058 = vmatprep.subr.mxu0 %v12671_v0 }
 0x6a2   :  { %9101 = vmatprep.subr.mxu1 %v12671_v0  ;;  %9059 = vmatpush3.msra.mxu0 %v12761_v62 }
 0x6a3   :  { %9102 = vmatpush3.msra.mxu1 %v10444_v53  ;;  %9103 = vmatprep.mubr.msk.f32.mxu1 %vm9852_vm0, %v12671_v0 }
 0x6a4   :  { %9060 = vmatprep.subr.mxu0 %v12671_v0  ;;  %9104 = vmatmul.mubr.f32.vlgmr.msra.gmra.mxu1 %v11628_v43 }
 0x6a5   :  { %9061 = vmatpush3.msra.mxu0 %v12762_v7  ;;  %9068 = vmatprep.mubr.msk.f32.mxu0 %vm9852_vm0, %v12671_v0 }
 0x6a6   :  { %9062 = vmatprep.subr.mxu0 %v12671_v0  ;;  %9141 = vmatprep.subr.mxu1 %v12671_v0 }
 0x6a7   :  { %9063 = vmatpush3.msra.mxu0 %v12763_v54  ;;  %9142 = vmatpush3.msra.mxu1 %v12764_v51 }
 0x6a8   :  { %9064 = vmatprep.subr.mxu0 %v12671_v0  ;;  %9143 = vmatprep.subr.mxu1 %v12671_v0 }
 0x6a9   :  { %9065 = vmatpush3.msra.mxu0 %v12765_v21  ;;  %9144 = vmatpush3.msra.mxu1 %v12766_v3 }
 0x6aa   :  { %9066 = vmatprep.subr.mxu0 %v12671_v0  ;;  %9145 = vmatprep.subr.mxu1 %v12671_v0 }
 0x6ab   :  { %9067 = vmatpush3.msra.mxu0 %v12767_v17  ;;  %9146 = vmatpush3.msra.mxu1 %v12768_v37 }
 0x6ac   :  { %9069 = vmatmul.mubr.f32.vlgmr.msra.gmra.mxu0 %v11628_v43  ;;  %9147 = vmatprep.subr.mxu1 %v12671_v0  ;;  %v12774_v43 = vld [vmem:[#allocation23_spill] sm:$0xff] }
 0x6ad   :  { %9148 = vmatpush3.msra.mxu1 %v12769_v46  ;;  %9106 = vmatprep.subr.mxu0 %v12671_v0 }
 0x6ae   :  { %9149 = vmatprep.subr.mxu1 %v12671_v0  ;;  %9107 = vmatpush3.msra.mxu0 %v10235_v6 }
 0x6af   :  { %9150 = vmatpush3.msra.mxu1 %v12770_v34  ;;  %9108 = vmatprep.subr.mxu0 %v12671_v0 }
 0x6b0   :  { %9151 = vmatprep.subr.mxu1 %v12671_v0  ;;  %9109 = vmatpush3.msra.mxu0 %v10242_v11 }
 0x6b1   :  { %9152 = vmatpush3.msra.mxu1 %v12771_v10  ;;  %9110 = vmatprep.subr.mxu0 %v12671_v0 }
 0x6b2   :  { %9153 = vmatprep.subr.mxu1 %v12671_v0  ;;  %9111 = vmatpush3.msra.mxu0 %v10249_v15 }
 0x6b3   :  { %9154 = vmatpush3.msra.mxu1 %v12772_v50  ;;  %9112 = vmatprep.subr.mxu0 %v12671_v0 }
 0x6b4   :  { %9155 = vmatprep.subr.mxu1 %v12671_v0  ;;  %9113 = vmatpush3.msra.mxu0 %v10259_v18 }
 0x6b5   :  { %9156 = vmatpush3.msra.mxu1 %v12773_v19  ;;  %9114 = vmatprep.subr.mxu0 %v12671_v0 }
 0x6b6   :  { %9157 = vmatprep.subr.mxu1 %v12671_v0  ;;  %9115 = vmatpush3.msra.mxu0 %v10270_v22 }
 0x6b7   :  { %9158 = vmatpush3.msra.mxu1 %v12774_v43  ;;  %9116 = vmatprep.subr.mxu0 %v12671_v0 }
 0x6b8   :  { %9159 = vmatprep.subr.mxu1 %v12671_v0  ;;  %9117 = vmatpush3.msra.mxu0 %v10282_v27 }
 0x6b9   :  { %9160 = vmatpush3.msra.mxu1 %v12775_v12  ;;  %9118 = vmatprep.subr.mxu0 %v12671_v0 }
 0x6ba   :  { %9161 = vmatprep.subr.mxu1 %v12671_v0  ;;  %9119 = vmatpush3.msra.mxu0 %v10296_v35 }
 0x6bb   :  { %9162 = vmatpush3.msra.mxu1 %v12776_v41  ;;  %9120 = vmatprep.subr.mxu0 %v12671_v0  ;;  %v12779_v41 = vld [vmem:[#allocation32_spill] sm:$0xff] }
 0x6bc   :  { %9163 = vmatprep.subr.mxu1 %v12671_v0  ;;  %9121 = vmatpush3.msra.mxu0 %v10310_v47 }
 0x6bd   :  { %9164 = vmatpush3.msra.mxu1 %v12777_v59  ;;  %9122 = vmatprep.subr.mxu0 %v12671_v0  ;;  %v12780_v59 = vld [vmem:[#allocation33_spill] sm:$0xff] }
 0x6be   :  { %9165 = vmatprep.subr.mxu1 %v12671_v0  ;;  %9123 = vmatpush3.msra.mxu0 %v10320_v57 }
 0x6bf   :  { %9166 = vmatpush3.msra.mxu1 %v12778_v60  ;;  %9124 = vmatprep.subr.mxu0 %v12671_v0  ;;  %v12781_v60 = vld [vmem:[#allocation34_spill] sm:$0xff] }
 0x6c0   :  { %9167 = vmatprep.subr.mxu1 %v12671_v0  ;;  %9125 = vmatpush3.msra.mxu0 %v10337_v13 }
 0x6c1   :  { %9168 = vmatpush3.msra.mxu1 %v12779_v41  ;;  %9126 = vmatprep.subr.mxu0 %v12671_v0 }
 0x6c2   :  { %9169 = vmatprep.subr.mxu1 %v12671_v0  ;;  %9127 = vmatpush3.msra.mxu0 %v10353_v38 }
 0x6c3   :  { %9170 = vmatpush3.msra.mxu1 %v12780_v59  ;;  %9128 = vmatprep.subr.mxu0 %v12671_v0 }
 0x6c4   :  { %9171 = vmatprep.subr.mxu1 %v12671_v0  ;;  %9129 = vmatpush3.msra.mxu0 %v10369_v52 }
 0x6c5   :  { %9172 = vmatpush3.msra.mxu1 %v12781_v60  ;;  %9130 = vmatprep.subr.mxu0 %v12671_v0 }
 0x6c6   :  { %9173 = vmatprep.mubr.msk.f32.mxu1 %vm9852_vm0, %v12671_v0  ;;  %9211 = vmatprep.subr.mxu1 %v12671_v0 }
 0x6c7   :  { %9131 = vmatpush3.msra.mxu0 %v10399_v36  ;;  %9138 = vmatprep.mubr.msk.f32.mxu0 %vm9852_vm0, %v12671_v0 }
 0x6c8   :  { %9132 = vmatprep.subr.mxu0 %v12671_v0 }
 0x6c9   :  { %9133 = vmatpush3.msra.mxu0 %v10415_v5 }
 0x6ca   :  { %9134 = vmatprep.subr.mxu0 %v12671_v0 }
 0x6cb   :  { %9135 = vmatpush3.msra.mxu0 %v10428_v25 }
 0x6cc   :  { %9136 = vmatprep.subr.mxu0 %v12671_v0 }
 0x6cd   :  { %9137 = vmatpush3.msra.mxu0 %v10444_v53 }
 0x6ce   :  { %9176 = vmatprep.subr.mxu0 %v12671_v0 }
 0x722   :  { %v4228_v60 = vpop.f32.mrf.mxu1 }
 0x724   :  { %v8965_v59 = vpop.f32.mrf.mxu1 }
 0x72a   :  { %v4077_v41 = vpop.f32.mrf.mxu0 }
 0x72b   :  { %v4229_v46 = vadd.f32 %v4228_v60, %v4077_v41  ;;  %v12792_v41 = vld [vmem:[#allocation16_spill] sm:$0xff]  ;;  %v12793_v60 = vld [vmem:[#allocation17_spill] sm:$0xff] }
 0x72c   :  { %v8930_v12 = vpop.f32.mrf.mxu0 }
 0x742   :  { %v4421_v43 = vpop.f32.mrf.mxu1 }
 0x744   :  { %v9035_v19 = vpop.f32.mrf.mxu1 }
 0x74b   :  { %v4332_v50 = vpop.f32.mrf.mxu0 }
 0x74c   :  { %v4333_v17 = vadd.f32 %v4332_v50, %v4229_v46  ;;  %v12788_v46 = vld [vmem:[#allocation13_spill] sm:$0xff]  ;;  %v12790_v50 = vld [vmem:[#allocation14_spill] sm:$0xff] }
 0x74d   :  { %v9000_v10 = vpop.f32.mrf.mxu0 }
 0x74e   :  { %v4422_v3 = vadd.f32 %v4421_v43, %v4333_v17  ;;  %v12787_v17 = vld [vmem:[#allocation28_spill] sm:$0xff]  ;;  %v12791_v43 = vld [vmem:[#allocation15_spill] sm:$0xff] }
 0x764   :  { %v4627_v34 = vpop.f32.mrf.mxu1 }
 0x766   :  { %v9105_v37 = vpop.f32.mrf.mxu1 }
 0x76c   :  { %v4540_v21 = vpop.f32.mrf.mxu0 }
 0x76d   :  { %v4541_v51 = vadd.f32 %v4540_v21, %v4422_v3  ;;  %v12785_v21 = vld [vmem:[#allocation26_spill] sm:$0xff]  ;;  %v12786_v3 = vld [vmem:[#allocation12_spill] sm:$0xff] }
 0x76e   :  { %v9070_v54 = vpop.f32.mrf.mxu0 }
 0x76f   :  { %v4628_v7 = vadd.f32 %v4627_v34, %v4541_v51  ;;  %v12783_v54 = vld [vmem:[#allocation22_spill] sm:$0xff]  ;;  %v12784_v51 = vld [vmem:[#allocation24_spill] sm:$0xff] }
 0x770   :  { %v12789_v34 = vld [vmem:[#allocation30_spill] sm:$0xff] }
 0x771   :  { %v4632_v62 = vrot.slane %v4628_v7, 3  ;;  %v12782_v7 = vld [vmem:[#allocation20_spill] sm:$0xff] }
 0x773   :  { %v4634_v2 = vadd.f32 %v4632_v62, %v10744_v26 }
 0x775   :  { %9754 = vtanh.f32 %v4634_v2 }
 0x782   :  { %v9755_v59 = vpop.eup %9754 }
 0x783   :  { %v4637_v12 = vrot.slane %v9755_v59, 5  ;;  %v11845_v19 = vsel %vm5942_vm5, %v11626_v56, %v9755_v59  ;;  %v12794_v59 = vld [vmem:[#allocation19_spill] sm:$0xff] }
 0x785   :  { %v11847_v10 = vand.u32 4294901760, %v4637_v12 }
 0x787   :  { %v11850_v37 = vsub.f32 %v4637_v12, %v11847_v10  ;;  %9174 = vmatmul.mubr.f32.vlgmr.msra.gmra.mxu1 %v11847_v10  ;;  %v12795_v12 = vld [vmem:[#allocation21_spill] sm:$0xff] }
 0x788   :  { %9212 = vmatpush3.msra.mxu1 %v10235_v6  ;;  %9243 = vmatprep.mubr.msk.f32.mxu1 %vm9852_vm0, %v12671_v0 }
 0x789   :  { %9213 = vmatprep.subr.mxu1 %v12671_v0  ;;  %v4722_v2 = vand.u32 4294901760, %v11850_v37 }
 0x78a   :  { %9214 = vmatpush3.msra.mxu1 %v10242_v11 }
 0x78b   :  { %9215 = vmatprep.subr.mxu1 %v12671_v0  ;;  %v4723_v56 = vsub.f32 %v11850_v37, %v4722_v2 }
 0x78c   :  { %9216 = vmatpush3.msra.mxu1 %v10249_v15 }
 0x78d   :  { %9217 = vmatprep.subr.mxu1 %v12671_v0  ;;  %v4724_v62 = vand.u32 4294901760, %v4723_v56  ;;  %v12799_v56 = vld [vmem:[#allocation29_spill] sm:$0xff] }
 0x78e   :  { %9218 = vmatpush3.msra.mxu1 %v10259_v18 }
 0x78f   :  { %9219 = vmatprep.subr.mxu1 %v12671_v0  ;;  %9139 = vmatmul.mubr.f32.vlgmr.msra.gmra.mxu0 %v4724_v62  ;;  %v12800_v62 = vld [vmem:[#allocation31_spill] sm:$0xff] }
 0x790   :  { %9177 = vmatpush3.msra.mxu0 %v10252_v16  ;;  %9220 = vmatpush3.msra.mxu1 %v10270_v22 }
 0x791   :  { %9178 = vmatprep.subr.mxu0 %v12671_v0  ;;  %9221 = vmatprep.subr.mxu1 %v12671_v0 }
 0x792   :  { %9179 = vmatpush3.msra.mxu0 %v10262_v20  ;;  %9222 = vmatpush3.msra.mxu1 %v10282_v27 }
 0x793   :  { %9180 = vmatprep.subr.mxu0 %v12671_v0  ;;  %9223 = vmatprep.subr.mxu1 %v12671_v0 }
 0x794   :  { %9181 = vmatpush3.msra.mxu0 %v10276_v24  ;;  %9224 = vmatpush3.msra.mxu1 %v10296_v35 }
 0x795   :  { %9182 = vmatprep.subr.mxu0 %v12671_v0  ;;  %9225 = vmatprep.subr.mxu1 %v12671_v0 }
 0x796   :  { %9183 = vmatpush3.msra.mxu0 %v10288_v29  ;;  %9226 = vmatpush3.msra.mxu1 %v10310_v47 }
 0x797   :  { %9184 = vmatprep.subr.mxu0 %v12671_v0  ;;  %9227 = vmatprep.subr.mxu1 %v12671_v0 }
 0x798   :  { %9185 = vmatpush3.msra.mxu0 %v10302_v45  ;;  %9228 = vmatpush3.msra.mxu1 %v10320_v57 }
 0x799   :  { %9186 = vmatprep.subr.mxu0 %v12671_v0  ;;  %9229 = vmatprep.subr.mxu1 %v12671_v0 }
 0x79a   :  { %9187 = vmatpush3.msra.mxu0 %v10316_v55  ;;  %9230 = vmatpush3.msra.mxu1 %v10337_v13 }
 0x79b   :  { %9188 = vmatprep.subr.mxu0 %v12671_v0  ;;  %9231 = vmatprep.subr.mxu1 %v12671_v0 }
 0x79c   :  { %9189 = vmatpush3.msra.mxu0 %v10332_v8  ;;  %9232 = vmatpush3.msra.mxu1 %v10353_v38 }
 0x79d   :  { %9190 = vmatprep.subr.mxu0 %v12671_v0  ;;  %9233 = vmatprep.subr.mxu1 %v12671_v0 }
 0x79e   :  { %9191 = vmatpush3.msra.mxu0 %v10349_v32  ;;  %9234 = vmatpush3.msra.mxu1 %v10369_v52 }
 0x79f   :  { %9192 = vmatprep.subr.mxu0 %v12671_v0  ;;  %9235 = vmatprep.subr.mxu1 %v12671_v0 }
 0x7a0   :  { %9193 = vmatpush3.msra.mxu0 %v10365_v49  ;;  %9236 = vmatpush3.msra.mxu1 %v10399_v36 }
 0x7a1   :  { %9194 = vmatprep.subr.mxu0 %v12671_v0  ;;  %9237 = vmatprep.subr.mxu1 %v12671_v0 }
 0x7a2   :  { %9195 = vmatpush3.msra.mxu0 %v10381_v1  ;;  %9238 = vmatpush3.msra.mxu1 %v10415_v5 }
 0x7a3   :  { %9196 = vmatprep.subr.mxu0 %v12671_v0  ;;  %9239 = vmatprep.subr.mxu1 %v12671_v0 }
 0x7a4   :  { %9197 = vmatpush3.msra.mxu0 %v10395_v33  ;;  %9240 = vmatpush3.msra.mxu1 %v10428_v25 }
 0x7a5   :  { %9198 = vmatprep.subr.mxu0 %v12671_v0  ;;  %9241 = vmatprep.subr.mxu1 %v12671_v0 }
 0x7a6   :  { %9199 = vmatpush3.msra.mxu0 %v10411_v4  ;;  %9242 = vmatpush3.msra.mxu1 %v10444_v53 }
 0x7a7   :  { %9200 = vmatprep.subr.mxu0 %v12671_v0  ;;  %9244 = vmatmul.mubr.f32.vlgmr.msra.gmra.mxu1 %v4722_v2  ;;  %v12798_v2 = vld [vmem:[#allocation27_spill] sm:$0xff] }
 0x7a8   :  { %9281 = vmatprep.subr.mxu1 %v12671_v0  ;;  %9201 = vmatpush3.msra.mxu0 %v10431_v30 }
 0x7a9   :  { %9282 = vmatpush3.msra.mxu1 %v10235_v6  ;;  %9202 = vmatprep.subr.mxu0 %v12671_v0 }
 0x7aa   :  { %9283 = vmatprep.subr.mxu1 %v12671_v0  ;;  %9203 = vmatpush3.msra.mxu0 %v10447_v61 }
 0x7ab   :  { %9284 = vmatpush3.msra.mxu1 %v10242_v11  ;;  %9204 = vmatprep.subr.mxu0 %v12671_v0 }
 0x7ac   :  { %9285 = vmatprep.subr.mxu1 %v12671_v0  ;;  %9205 = vmatpush3.msra.mxu0 %v10461_v42 }
 0x7ad   :  { %9286 = vmatpush3.msra.mxu1 %v10249_v15  ;;  %9206 = vmatprep.subr.mxu0 %v12671_v0 }
 0x7ae   :  { %9287 = vmatprep.subr.mxu1 %v12671_v0  ;;  %9207 = vmatpush3.msra.mxu0 %v10475_v14 }
 0x7af   :  { %9208 = vmatprep.mubr.msk.f32.mxu0 %vm9852_vm0, %v12671_v0  ;;  %9288 = vmatpush3.msra.mxu1 %v10259_v18 }
 0x7b0   :  { %9209 = vmatmul.mubr.f32.vlgmr.msra.gmra.mxu0 %v11850_v37  ;;  %9246 = vmatprep.subr.mxu0 %v12671_v0  ;;  %v12797_v37 = vld [vmem:[#allocation25_spill] sm:$0xff] }
 0x7b1   :  { %9289 = vmatprep.subr.mxu1 %v12671_v0  ;;  %9247 = vmatpush3.msra.mxu0 %v10273_v23 }
 0x7b2   :  { %9290 = vmatpush3.msra.mxu1 %v10270_v22  ;;  %9248 = vmatprep.subr.mxu0 %v12671_v0 }
 0x7b3   :  { %9291 = vmatprep.subr.mxu1 %v12671_v0  ;;  %9249 = vmatpush3.msra.mxu0 %v10285_v28 }
 0x7b4   :  { %9292 = vmatpush3.msra.mxu1 %v10282_v27  ;;  %9250 = vmatprep.subr.mxu0 %v12671_v0 }
 0x7b5   :  { %9293 = vmatprep.subr.mxu1 %v12671_v0  ;;  %9251 = vmatpush3.msra.mxu0 %v10299_v40 }
 0x7b6   :  { %9294 = vmatpush3.msra.mxu1 %v10296_v35  ;;  %9252 = vmatprep.subr.mxu0 %v12671_v0 }
 0x7b7   :  { %9295 = vmatprep.subr.mxu1 %v12671_v0  ;;  %9253 = vmatpush3.msra.mxu0 %v10313_v48 }
 0x7b8   :  { %9296 = vmatpush3.msra.mxu1 %v10310_v47  ;;  %9254 = vmatprep.subr.mxu0 %v12671_v0 }
 0x7b9   :  { %9297 = vmatprep.subr.mxu1 %v12671_v0  ;;  %9255 = vmatpush3.msra.mxu0 %v10329_v63 }
 0x7ba   :  { %9298 = vmatpush3.msra.mxu1 %v10320_v57  ;;  %9256 = vmatprep.subr.mxu0 %v12671_v0 }
 0x7bb   :  { %9299 = vmatprep.subr.mxu1 %v12671_v0  ;;  %9257 = vmatpush3.msra.mxu0 %v10346_v31 }
 0x7bc   :  { %9300 = vmatpush3.msra.mxu1 %v10337_v13  ;;  %9258 = vmatprep.subr.mxu0 %v12671_v0 }
 0x7bd   :  { %9301 = vmatprep.subr.mxu1 %v12671_v0  ;;  %9259 = vmatpush3.msra.mxu0 %v10362_v44 }
 0x7be   :  { %9302 = vmatpush3.msra.mxu1 %v10353_v38  ;;  %9260 = vmatprep.subr.mxu0 %v12671_v0 }
 0x7bf   :  { %9303 = vmatprep.subr.mxu1 %v12671_v0  ;;  %9261 = vmatpush3.msra.mxu0 %v10378_v58 }
 0x7c0   :  { %9304 = vmatpush3.msra.mxu1 %v10369_v52  ;;  %9262 = vmatprep.subr.mxu0 %v12671_v0 }
 0x7c1   :  { %9305 = vmatprep.subr.mxu1 %v12671_v0  ;;  %9263 = vmatpush3.msra.mxu0 %v10392_v9 }
 0x7c2   :  { %9306 = vmatpush3.msra.mxu1 %v10399_v36  ;;  %9264 = vmatprep.subr.mxu0 %v12671_v0 }
 0x7c3   :  { %9307 = vmatprep.subr.mxu1 %v12671_v0  ;;  %9265 = vmatpush3.msra.mxu0 %v12715_v39 }
 0x7c4   :  { %9308 = vmatpush3.msra.mxu1 %v10415_v5  ;;  %9266 = vmatprep.subr.mxu0 %v12671_v0 }
 0x7c5   :  { %9309 = vmatprep.subr.mxu1 %v12671_v0  ;;  %9267 = vmatpush3.msra.mxu0 %v12782_v7 }
 0x7c6   :  { %9310 = vmatpush3.msra.mxu1 %v10428_v25  ;;  %9268 = vmatprep.subr.mxu0 %v12671_v0 }
 0x7c7   :  { %9311 = vmatprep.subr.mxu1 %v12671_v0  ;;  %9269 = vmatpush3.msra.mxu0 %v12783_v54 }
 0x7c8   :  { %9312 = vmatpush3.msra.mxu1 %v10444_v53  ;;  %9313 = vmatprep.mubr.msk.f32.mxu1 %vm9852_vm0, %v12671_v0 }
 0x7c9   :  { %9270 = vmatprep.subr.mxu0 %v12671_v0  ;;  %9314 = vmatmul.mubr.f32.vlgmr.msra.gmra.mxu1 %v11847_v10 }
 0x7ca   :  { %9271 = vmatpush3.msra.mxu0 %v12784_v51  ;;  %9278 = vmatprep.mubr.msk.f32.mxu0 %vm9852_vm0, %v12671_v0 }
 0x7cb   :  { %9272 = vmatprep.subr.mxu0 %v12671_v0  ;;  %9351 = vmatprep.subr.mxu1 %v12671_v0 }
 0x7cc   :  { %9273 = vmatpush3.msra.mxu0 %v12785_v21  ;;  %9352 = vmatpush3.msra.mxu1 %v12786_v3  ;;  %v12801_v3 = vld [vmem:[#allocation32_spill] sm:$0xff] }
 0x7cd   :  { %9274 = vmatprep.subr.mxu0 %v12671_v0  ;;  %9353 = vmatprep.subr.mxu1 %v12671_v0 }
 0x7ce   :  { %9275 = vmatpush3.msra.mxu0 %v12787_v17  ;;  %9354 = vmatpush3.msra.mxu1 %v12788_v46  ;;  %v12802_v46 = vld [vmem:[#allocation33_spill] sm:$0xff] }
 0x7cf   :  { %9276 = vmatprep.subr.mxu0 %v12671_v0  ;;  %9355 = vmatprep.subr.mxu1 %v12671_v0 }
 0x7d0   :  { %9277 = vmatpush3.msra.mxu0 %v12789_v34  ;;  %9356 = vmatpush3.msra.mxu1 %v12790_v50  ;;  %v12803_v50 = vld [vmem:[#allocation34_spill] sm:$0xff] }
 0x7d1   :  { %9279 = vmatmul.mubr.f32.vlgmr.msra.gmra.mxu0 %v11847_v10  ;;  %9357 = vmatprep.subr.mxu1 %v12671_v0  ;;  %v12796_v10 = vld [vmem:[#allocation23_spill] sm:$0xff] }
 0x7d2   :  { %9358 = vmatpush3.msra.mxu1 %v12791_v43  ;;  %9316 = vmatprep.subr.mxu0 %v12671_v0 }
 0x7d3   :  { %9359 = vmatprep.subr.mxu1 %v12671_v0  ;;  %9317 = vmatpush3.msra.mxu0 %v10235_v6 }
 0x7d4   :  { %9360 = vmatpush3.msra.mxu1 %v12792_v41  ;;  %9318 = vmatprep.subr.mxu0 %v12671_v0 }
 0x7d5   :  { %9361 = vmatprep.subr.mxu1 %v12671_v0  ;;  %9319 = vmatpush3.msra.mxu0 %v10242_v11 }
 0x7d6   :  { %9362 = vmatpush3.msra.mxu1 %v12793_v60  ;;  %9320 = vmatprep.subr.mxu0 %v12671_v0 }
 0x7d7   :  { %9363 = vmatprep.subr.mxu1 %v12671_v0  ;;  %9321 = vmatpush3.msra.mxu0 %v10249_v15 }
 0x7d8   :  { %9364 = vmatpush3.msra.mxu1 %v12794_v59  ;;  %9322 = vmatprep.subr.mxu0 %v12671_v0 }
 0x7d9   :  { %9365 = vmatprep.subr.mxu1 %v12671_v0  ;;  %9323 = vmatpush3.msra.mxu0 %v10259_v18 }
 0x7da   :  { %9366 = vmatpush3.msra.mxu1 %v12795_v12  ;;  %9324 = vmatprep.subr.mxu0 %v12671_v0 }
 0x7db   :  { %9367 = vmatprep.subr.mxu1 %v12671_v0  ;;  %9325 = vmatpush3.msra.mxu0 %v10270_v22 }
 0x7dc   :  { %9368 = vmatpush3.msra.mxu1 %v12796_v10  ;;  %9326 = vmatprep.subr.mxu0 %v12671_v0 }
 0x7dd   :  { %9369 = vmatprep.subr.mxu1 %v12671_v0  ;;  %9327 = vmatpush3.msra.mxu0 %v10282_v27 }
 0x7de   :  { %9370 = vmatpush3.msra.mxu1 %v12797_v37  ;;  %9328 = vmatprep.subr.mxu0 %v12671_v0 }
 0x7df   :  { %9371 = vmatprep.subr.mxu1 %v12671_v0  ;;  %9329 = vmatpush3.msra.mxu0 %v10296_v35 }
 0x7e0   :  { %9372 = vmatpush3.msra.mxu1 %v12798_v2  ;;  %9330 = vmatprep.subr.mxu0 %v12671_v0 }
 0x7e1   :  { %9373 = vmatprep.subr.mxu1 %v12671_v0  ;;  %9331 = vmatpush3.msra.mxu0 %v10310_v47 }
 0x7e2   :  { %9374 = vmatpush3.msra.mxu1 %v12799_v56  ;;  %9332 = vmatprep.subr.mxu0 %v12671_v0 }
 0x7e3   :  { %9375 = vmatprep.subr.mxu1 %v12671_v0  ;;  %9333 = vmatpush3.msra.mxu0 %v10320_v57 }
 0x7e4   :  { %9376 = vmatpush3.msra.mxu1 %v12800_v62  ;;  %9334 = vmatprep.subr.mxu0 %v12671_v0 }
 0x7e5   :  { %9377 = vmatprep.subr.mxu1 %v12671_v0  ;;  %9335 = vmatpush3.msra.mxu0 %v10337_v13 }
 0x7e6   :  { %9378 = vmatpush3.msra.mxu1 %v12801_v3  ;;  %9336 = vmatprep.subr.mxu0 %v12671_v0 }
 0x7e7   :  { %9379 = vmatprep.subr.mxu1 %v12671_v0  ;;  %9337 = vmatpush3.msra.mxu0 %v10353_v38 }
 0x7e8   :  { %9380 = vmatpush3.msra.mxu1 %v12802_v46  ;;  %9338 = vmatprep.subr.mxu0 %v12671_v0 }
 0x7e9   :  { %9381 = vmatprep.subr.mxu1 %v12671_v0  ;;  %9339 = vmatpush3.msra.mxu0 %v10369_v52 }
 0x7ea   :  { %9382 = vmatpush3.msra.mxu1 %v12803_v50  ;;  %9340 = vmatprep.subr.mxu0 %v12671_v0 }
 0x7eb   :  { %9383 = vmatprep.mubr.msk.f32.mxu1 %vm9852_vm0, %v12671_v0  ;;  %9421 = vmatprep.subr.mxu1 %v12671_v0 }
 0x7ec   :  { %9341 = vmatpush3.msra.mxu0 %v10399_v36  ;;  %9348 = vmatprep.mubr.msk.f32.mxu0 %vm9852_vm0, %v12671_v0 }
 0x7ed   :  { %9342 = vmatprep.subr.mxu0 %v12671_v0 }
 0x7ee   :  { %9343 = vmatpush3.msra.mxu0 %v10415_v5 }
 0x7ef   :  { %9344 = vmatprep.subr.mxu0 %v12671_v0 }
 0x7f0   :  { %9345 = vmatpush3.msra.mxu0 %v10428_v25 }
 0x7f1   :  { %9346 = vmatprep.subr.mxu0 %v12671_v0 }
 0x7f2   :  { %9347 = vmatpush3.msra.mxu0 %v10444_v53 }
 0x7f3   :  { %9386 = vmatprep.subr.mxu0 %v12671_v0 }
 0x847   :  { %v4877_v43 = vpop.f32.mrf.mxu1 }
 0x849   :  { %v9175_v41 = vpop.f32.mrf.mxu1 }
 0x84f   :  { %v4726_v60 = vpop.f32.mrf.mxu0 }
 0x850   :  { %v4878_v62 = vadd.f32 %v4877_v43, %v4726_v60 }
 0x851   :  { %v9140_v59 = vpop.f32.mrf.mxu0 }
 0x867   :  { %v5070_v12 = vpop.f32.mrf.mxu1 }
 0x869   :  { %v9245_v10 = vpop.f32.mrf.mxu1 }
 0x870   :  { %v4981_v37 = vpop.f32.mrf.mxu0 }
 0x871   :  { %v4982_v46 = vadd.f32 %v4981_v37, %v4878_v62  ;;  %v89_v62 = vld [vmem:[#allocation7 + $0x30] sm:$0xff] }
 0x872   :  { %v9210_v2 = vpop.f32.mrf.mxu0 }
 0x873   :  { %v5071_v50 = vadd.f32 %v5070_v12, %v4982_v46 }
 0x889   :  { %v5276_v56 = vpop.f32.mrf.mxu1 }
 0x88b   :  { %v9315_v3 = vpop.f32.mrf.mxu1 }
 0x891   :  { %v5189_v34 = vpop.f32.mrf.mxu0 }
 0x892   :  { %v5190_v17 = vadd.f32 %v5189_v34, %v5071_v50 }
 0x893   :  { %v9280_v21 = vpop.f32.mrf.mxu0 }
 0x894   :  { %v5277_v51 = vadd.f32 %v5276_v56, %v5190_v17  ;;  %v90_v17 = vld [vmem:[#allocation7 + $0x38] sm:$0xff] }
 0x895   :  { %v12298_v37 = vand.u32 4294901760, %v90_v17 }
 0x896   :  { %v5281_v54 = vrot.slane %v5277_v51, 2 }
 0x898   :  { %v5283_v7 = vadd.f32 %v5281_v54, %v10744_v26 }
 0x89a   :  { %9756 = vtanh.f32 %v5283_v7 }
 0x8a7   :  { %v9757_v41 = vpop.eup %9756 }
 0x8a8   :  { %v5286_v59 = vrot.slane %v9757_v41, 6  ;;  %v12064_v10 = vsel %vm5944_vm6, %v11845_v19, %v9757_v41  ;;  %v12308_v41 = vsub.f32 %v90_v17, %v12298_v37 }
 0x8aa   :  { %v12066_v2 = vand.u32 4294901760, %v5286_v59 }
 0x8ac   :  { %v12069_v43 = vsub.f32 %v5286_v59, %v12066_v2  ;;  %9384 = vmatmul.mubr.f32.vlgmr.msra.gmra.mxu1 %v12066_v2  ;;  %v12311_v59 = vand.u32 4294901760, %v89_v62 }
 0x8ad   :  { %9422 = vmatpush3.msra.mxu1 %v10235_v6  ;;  %9453 = vmatprep.mubr.msk.f32.mxu1 %vm9852_vm0, %v12671_v0 }
 0x8ae   :  { %9423 = vmatprep.subr.mxu1 %v12671_v0  ;;  %v5371_v7 = vand.u32 4294901760, %v12069_v43 }
 0x8af   :  { %9424 = vmatpush3.msra.mxu1 %v10242_v11 }
 0x8b0   :  { %9425 = vmatprep.subr.mxu1 %v12671_v0  ;;  %v5372_v19 = vsub.f32 %v12069_v43, %v5371_v7 }
 0x8b1   :  { %9426 = vmatpush3.msra.mxu1 %v10249_v15 }
 0x8b2   :  { %9427 = vmatprep.subr.mxu1 %v12671_v0  ;;  %v5373_v54 = vand.u32 4294901760, %v5372_v19  ;;  %v6103_v19 = vand.u32 4294901760, %v12308_v41 }
 0x8b3   :  { %9428 = vmatpush3.msra.mxu1 %v10259_v18 }
 0x8b4   :  { %9429 = vmatprep.subr.mxu1 %v12671_v0  ;;  %9349 = vmatmul.mubr.f32.vlgmr.msra.gmra.mxu0 %v5373_v54 }
 0x8b5   :  { %9387 = vmatpush3.msra.mxu0 %v10252_v16  ;;  %9430 = vmatpush3.msra.mxu1 %v10270_v22  ;;  %v12807_v16 = vld [vmem:[#allocation26_spill] sm:$0xff] }
 0x8b6   :  { %9388 = vmatprep.subr.mxu0 %v12671_v0  ;;  %9431 = vmatprep.subr.mxu1 %v12671_v0 }
 0x8b7   :  { %9389 = vmatpush3.msra.mxu0 %v10262_v20  ;;  %9432 = vmatpush3.msra.mxu1 %v10282_v27  ;;  %v12809_v20 = vld [vmem:[#allocation30_spill] sm:$0xff] }
 0x8b8   :  { %9390 = vmatprep.subr.mxu0 %v12671_v0  ;;  %9433 = vmatprep.subr.mxu1 %v12671_v0 }
 0x8b9   :  { %9391 = vmatpush3.msra.mxu0 %v10276_v24  ;;  %9434 = vmatpush3.msra.mxu1 %v10296_v35  ;;  %v97_v24 = vld [vmem:[#allocation7 + $0x70] sm:$0xff] }
 0x8ba   :  { %9392 = vmatprep.subr.mxu0 %v12671_v0  ;;  %9435 = vmatprep.subr.mxu1 %v12671_v0 }
 0x8bb   :  { %9393 = vmatpush3.msra.mxu0 %v10288_v29  ;;  %9436 = vmatpush3.msra.mxu1 %v10310_v47  ;;  %v96_v29 = vld [vmem:[#allocation7 + $0x68] sm:$0xff] }
 0x8bc   :  { %9394 = vmatprep.subr.mxu0 %v12671_v0  ;;  %9437 = vmatprep.subr.mxu1 %v12671_v0 }
 0x8bd   :  { %9395 = vmatpush3.msra.mxu0 %v10302_v45  ;;  %9438 = vmatpush3.msra.mxu1 %v10320_v57  ;;  %v12230_v45 = vand.u32 4294901760, %v96_v29 }
 0x8be   :  { %9396 = vmatprep.subr.mxu0 %v12671_v0  ;;  %9439 = vmatprep.subr.mxu1 %v12671_v0 }
 0x8bf   :  { %9397 = vmatpush3.msra.mxu0 %v10316_v55  ;;  %9440 = vmatpush3.msra.mxu1 %v10337_v13 }
 0x8c0   :  { %9398 = vmatprep.subr.mxu0 %v12671_v0  ;;  %9441 = vmatprep.subr.mxu1 %v12671_v0 }
 0x8c1   :  { %9399 = vmatpush3.msra.mxu0 %v10332_v8  ;;  %9442 = vmatpush3.msra.mxu1 %v10353_v38  ;;  %v94_v8 = vld [vmem:[#allocation7 + $0x58] sm:$0xff] }
 0x8c2   :  { %9400 = vmatprep.subr.mxu0 %v12671_v0  ;;  %9443 = vmatprep.subr.mxu1 %v12671_v0 }
 0x8c3   :  { %9401 = vmatpush3.msra.mxu0 %v10349_v32  ;;  %9444 = vmatpush3.msra.mxu1 %v10369_v52 }
 0x8c4   :  { %9402 = vmatprep.subr.mxu0 %v12671_v0  ;;  %9445 = vmatprep.subr.mxu1 %v12671_v0 }
 0x8c5   :  { %9403 = vmatpush3.msra.mxu0 %v10365_v49  ;;  %9446 = vmatpush3.msra.mxu1 %v10399_v36  ;;  %v93_v49 = vld [vmem:[#allocation7 + $0x50] sm:$0xff] }
 0x8c6   :  { %9404 = vmatprep.subr.mxu0 %v12671_v0  ;;  %9447 = vmatprep.subr.mxu1 %v12671_v0 }
 0x8c7   :  { %9405 = vmatpush3.msra.mxu0 %v10381_v1  ;;  %9448 = vmatpush3.msra.mxu1 %v10415_v5 }
 0x8c8   :  { %9406 = vmatprep.subr.mxu0 %v12671_v0  ;;  %9449 = vmatprep.subr.mxu1 %v12671_v0 }
 0x8c9   :  { %9407 = vmatpush3.msra.mxu0 %v10395_v33  ;;  %9450 = vmatpush3.msra.mxu1 %v10428_v25 }
 0x8ca   :  { %9408 = vmatprep.subr.mxu0 %v12671_v0  ;;  %9451 = vmatprep.subr.mxu1 %v12671_v0 }
 0x8cb   :  { %9409 = vmatpush3.msra.mxu0 %v10411_v4  ;;  %9452 = vmatpush3.msra.mxu1 %v10444_v53 }
 0x8cc   :  { %9410 = vmatprep.subr.mxu0 %v12671_v0  ;;  %9454 = vmatmul.mubr.f32.vlgmr.msra.gmra.mxu1 %v5371_v7 }
 0x8cd   :  { %9491 = vmatprep.subr.mxu1 %v12671_v0  ;;  %9411 = vmatpush3.msra.mxu0 %v10431_v30 }
 0x8ce   :  { %9492 = vmatpush3.msra.mxu1 %v10235_v6  ;;  %9412 = vmatprep.subr.mxu0 %v12671_v0  ;;  %v12804_v6 = vld [vmem:[#allocation20_spill] sm:$0xff] }
 0x8cf   :  { %9493 = vmatprep.subr.mxu1 %v12671_v0  ;;  %9413 = vmatpush3.msra.mxu0 %v10447_v61  ;;  %v91_v61 = vld [vmem:[#allocation7 + $0x40] sm:$0xff] }
 0x8d0   :  { %9494 = vmatpush3.msra.mxu1 %v10242_v11  ;;  %9414 = vmatprep.subr.mxu0 %v12671_v0  ;;  %v12805_v11 = vld [vmem:[#allocation22_spill] sm:$0xff]  ;;  %v12283_v51 = vand.u32 4294901760, %v91_v61 }
 0x8d1   :  { %9495 = vmatprep.subr.mxu1 %v12671_v0  ;;  %9415 = vmatpush3.msra.mxu0 %v10461_v42 }
 0x8d2   :  { %9496 = vmatpush3.msra.mxu1 %v10249_v15  ;;  %9416 = vmatprep.subr.mxu0 %v12671_v0  ;;  %v12806_v15 = vld [vmem:[#allocation24_spill] sm:$0xff]  ;;  %v12296_v12 = vsub.f32 %v91_v61, %v12283_v51 }
 0x8d3   :  { %9497 = vmatprep.subr.mxu1 %v12671_v0  ;;  %9417 = vmatpush3.msra.mxu0 %v10475_v14 }
 0x8d4   :  { %9418 = vmatprep.mubr.msk.f32.mxu0 %vm9852_vm0, %v12671_v0  ;;  %9498 = vmatpush3.msra.mxu1 %v10259_v18  ;;  %v12808_v18 = vld [vmem:[#allocation28_spill] sm:$0xff]  ;;  %v6096_v50 = vand.u32 4294901760, %v12296_v12 }
 0x8d5   :  { %9419 = vmatmul.mubr.f32.vlgmr.msra.gmra.mxu0 %v12069_v43  ;;  %9456 = vmatprep.subr.mxu0 %v12671_v0 }
 0x8d6   :  { %9499 = vmatprep.subr.mxu1 %v12671_v0  ;;  %9457 = vmatpush3.msra.mxu0 %v10273_v23  ;;  %v6097_v7 = vsub.f32 %v12296_v12, %v6096_v50 }
 0x8d7   :  { %9500 = vmatpush3.msra.mxu1 %v10270_v22  ;;  %9458 = vmatprep.subr.mxu0 %v12671_v0  ;;  %v98_v22 = vld [vmem:[#allocation7 + $0x78] sm:$0xff] }
 0x8d8   :  { %9501 = vmatprep.subr.mxu1 %v12671_v0  ;;  %9459 = vmatpush3.msra.mxu0 %v10285_v28  ;;  %v12217_v23 = vand.u32 4294901760, %v98_v22  ;;  %v12222_v28 = vand.u32 4294901760, %v97_v24 }
 0x8d9   :  { %9502 = vmatpush3.msra.mxu1 %v10282_v27  ;;  %9460 = vmatprep.subr.mxu0 %v12671_v0 }
 0x8da   :  { %9503 = vmatprep.subr.mxu1 %v12671_v0  ;;  %9461 = vmatpush3.msra.mxu0 %v10299_v40  ;;  %v12220_v27 = vsub.f32 %v98_v22, %v12217_v23  ;;  %v12228_v40 = vsub.f32 %v97_v24, %v12222_v28  ;;  %v86_v24 = vld [vmem:[#allocation7 + $0x18] sm:$0xff] }
 0x8db   :  { %9504 = vmatpush3.msra.mxu1 %v10296_v35  ;;  %9462 = vmatprep.subr.mxu0 %v12671_v0 }
 0x8dc   :  { %9505 = vmatprep.subr.mxu1 %v12671_v0  ;;  %9463 = vmatpush3.msra.mxu0 %v10313_v48  ;;  %v6047_v35 = vand.u32 4294901760, %v12220_v27  ;;  %v6054_v55 = vand.u32 4294901760, %v12228_v40 }
 0x8dd   :  { %9506 = vmatpush3.msra.mxu1 %v10310_v47  ;;  %9464 = vmatprep.subr.mxu0 %v12671_v0  ;;  %v95_v47 = vld [vmem:[#allocation7 + $0x60] sm:$0xff] }
 0x8de   :  { %9507 = vmatprep.subr.mxu1 %v12671_v0  ;;  %9465 = vmatpush3.msra.mxu0 %v10329_v63  ;;  %v6048_v48 = vsub.f32 %v12220_v27, %v6047_v35  ;;  %v12241_v63 = vand.u32 4294901760, %v95_v47 }
 0x8df   :  { %9508 = vmatpush3.msra.mxu1 %v10320_v57  ;;  %9466 = vmatprep.subr.mxu0 %v12671_v0  ;;  %v12239_v57 = vsub.f32 %v96_v29, %v12230_v45 }
 0x8e0   :  { %9509 = vmatprep.subr.mxu1 %v12671_v0  ;;  %9467 = vmatpush3.msra.mxu0 %v10346_v31  ;;  %v6055_v31 = vsub.f32 %v12228_v40, %v6054_v55 }
 0x8e1   :  { %9510 = vmatpush3.msra.mxu1 %v10337_v13  ;;  %9468 = vmatprep.subr.mxu0 %v12671_v0  ;;  %v6049_v13 = vand.u32 4294901760, %v6048_v48  ;;  %v6061_v32 = vand.u32 4294901760, %v12239_v57 }
 0x8e2   :  { %9511 = vmatprep.subr.mxu1 %v12671_v0  ;;  %9469 = vmatpush3.msra.mxu0 %v10362_v44  ;;  %v12253_v44 = vand.u32 4294901760, %v94_v8 }
 0x8e3   :  { %9512 = vmatpush3.msra.mxu1 %v10353_v38  ;;  %9470 = vmatprep.subr.mxu0 %v12671_v0  ;;  %v12250_v38 = vsub.f32 %v95_v47, %v12241_v63 }
 0x8e4   :  { %9513 = vmatprep.subr.mxu1 %v12671_v0  ;;  %9471 = vmatpush3.msra.mxu0 %v10378_v58  ;;  %v6062_v58 = vsub.f32 %v12239_v57, %v6061_v32  ;;  %v12264_v33 = vsub.f32 %v94_v8, %v12253_v44  ;;  %v12343_v8 = vand.u32 4294901760, %v86_v24 }
 0x8e5   :  { %9514 = vmatpush3.msra.mxu1 %v10369_v52  ;;  %9472 = vmatprep.subr.mxu0 %v12671_v0  ;;  %v6056_v52 = vand.u32 4294901760, %v6055_v31  ;;  %v6068_v1 = vand.u32 4294901760, %v12250_v38  ;;  %v84_v31 = vld [vmem:[#allocation7 + $0x8] sm:$0xff] }
 0x8e6   :  { %9515 = vmatprep.subr.mxu1 %v12671_v0  ;;  %9473 = vmatpush3.msra.mxu0 %v10392_v9  ;;  %v12260_v9 = vand.u32 4294901760, %v93_v49  ;;  %v6063_v4 = vand.u32 4294901760, %v6062_v58 }
 0x8e7   :  { %9516 = vmatpush3.msra.mxu1 %v10399_v36  ;;  %9474 = vmatprep.subr.mxu0 %v12671_v0  ;;  %v92_v36 = vld [vmem:[#allocation7 + $0x48] sm:$0xff] }
 0x8e8   :  { %9517 = vmatprep.subr.mxu1 %v12671_v0  ;;  %9475 = vmatpush3.msra.mxu0 %v12715_v39  ;;  %v12273_v30 = vand.u32 4294901760, %v92_v36 }
 0x8e9   :  { %9518 = vmatpush3.msra.mxu1 %v10415_v5  ;;  %9476 = vmatprep.subr.mxu0 %v12671_v0  ;;  %v6069_v5 = vsub.f32 %v12250_v38, %v6068_v1 }
 0x8ea   :  { %9519 = vmatprep.subr.mxu1 %v12671_v0  ;;  %9477 = vmatpush3.msra.mxu0 %v12804_v6  ;;  %v12281_v39 = vsub.f32 %v92_v36, %v12273_v30  ;;  %v12323_v6 = vsub.f32 %v89_v62, %v12311_v59  ;;  %v12351_v36 = vand.u32 4294901760, %v84_v31 }
 0x8eb   :  { %9520 = vmatpush3.msra.mxu1 %v10428_v25  ;;  %9478 = vmatprep.subr.mxu0 %v12671_v0  ;;  %v12271_v25 = vsub.f32 %v93_v49, %v12260_v9  ;;  %v6070_v42 = vand.u32 4294901760, %v6069_v5  ;;  %v83_v49 = vld [vmem:[#allocation7] sm:$0xff] }
 0x8ec   :  { %9521 = vmatprep.subr.mxu1 %v12671_v0  ;;  %9479 = vmatpush3.msra.mxu0 %v12805_v11  ;;  %v6089_v60 = vand.u32 4294901760, %v12281_v39  ;;  %v87_v11 = vld [vmem:[#allocation7 + $0x20] sm:$0xff]  ;;  %v6110_v22 = vand.u32 4294901760, %v12323_v6 }
 0x8ed   :  { %9522 = vmatpush3.msra.mxu1 %v10444_v53  ;;  %9523 = vmatprep.mubr.msk.f32.mxu1 %vm9852_vm0, %v12671_v0  ;;  %v6075_v53 = vand.u32 4294901760, %v12264_v33  ;;  %v6082_v14 = vand.u32 4294901760, %v12271_v25 }
 0x8ee   :  { %9480 = vmatprep.subr.mxu0 %v12671_v0  ;;  %9524 = vmatmul.mubr.f32.vlgmr.msra.gmra.mxu1 %v12066_v2  ;;  %v6090_v46 = vsub.f32 %v12281_v39, %v6089_v60 }
 0x8ef   :  { %9481 = vmatpush3.msra.mxu0 %v12806_v15  ;;  %9488 = vmatprep.mubr.msk.f32.mxu0 %vm9852_vm0, %v12671_v0  ;;  %v6076_v21 = vsub.f32 %v12264_v33, %v6075_v53  ;;  %v6083_v34 = vsub.f32 %v12271_v25, %v6082_v14  ;;  %v6098_v15 = vand.u32 4294901760, %v6097_v7 }
 0x8f0   :  { %9482 = vmatprep.subr.mxu0 %v12671_v0  ;;  %9561 = vmatprep.subr.mxu1 %v12671_v0  ;;  %v6091_v43 = vand.u32 4294901760, %v6090_v46 }
 0x8f1   :  { %9483 = vmatpush3.msra.mxu0 %v12807_v16  ;;  %9593 = vmatprep.mubr.msk.f32.mxu1 %vm9852_vm0, %v12671_v0  ;;  %v6077_v56 = vand.u32 4294901760, %v6076_v21  ;;  %v6084_v3 = vand.u32 4294901760, %v6083_v34  ;;  %v6104_v16 = vsub.f32 %v12308_v41, %v6103_v19  ;;  %v12369_v34 = vsub.f32 %v84_v31, %v12351_v36 }
 0x8f2   :  { %9484 = vmatprep.subr.mxu0 %v12671_v0  ;;  %9562 = vmatpush3.msra.mxu1 %v6049_v13  ;;  %v85_v13 = vld [vmem:[#allocation7 + $0x10] sm:$0xff] }
 0x8f3   :  { %9485 = vmatpush3.msra.mxu0 %v12808_v18  ;;  %9563 = vmatprep.subr.mxu1 %v12671_v0  ;;  %v6105_v29 = vand.u32 4294901760, %v6104_v16  ;;  %v12349_v58 = vand.u32 4294901760, %v85_v13 }
 0x8f4   :  { %9486 = vmatprep.subr.mxu0 %v12671_v0  ;;  %9564 = vmatpush3.msra.mxu1 %v6056_v52  ;;  %v6111_v52 = vsub.f32 %v12323_v6, %v6110_v22 }
 0x8f5   :  { %9487 = vmatpush3.msra.mxu0 %v12809_v20  ;;  %9565 = vmatprep.subr.mxu1 %v12671_v0  ;;  %v12333_v20 = vand.u32 4294901760, %v87_v11  ;;  %v12366_v17 = vsub.f32 %v85_v13, %v12349_v58 }
 0x8f6   :  { %9489 = vmatmul.mubr.f32.vlgmr.msra.gmra.mxu0 %v12066_v2  ;;  %9526 = vmatprep.subr.mxu0 %v12671_v0  ;;  %v88_v2 = vld [vmem:[#allocation7 + $0x28] sm:$0xff]  ;;  %v6112_v21 = vand.u32 4294901760, %v6111_v52 }
 0x8f7   :  { %9558 = vmatprep.mubr.msk.f32.mxu0 %vm9852_vm0, %v12671_v0  ;;  %9527 = vmatpush3.msra.mxu0 %v12217_v23  ;;  %v12319_v54 = vand.u32 4294901760, %v88_v2  ;;  %v12341_v48 = vsub.f32 %v87_v11, %v12333_v20 }
 0x8f8   :  { %9528 = vmatprep.subr.mxu0 %v12671_v0  ;;  %9566 = vmatpush3.msra.mxu1 %v6063_v4  ;;  %v12354_v4 = vand.u32 4294901760, %v83_v49 }
 0x8f9   :  { %9529 = vmatpush3.msra.mxu0 %v12222_v28  ;;  %9567 = vmatprep.subr.mxu1 %v12671_v0  ;;  %v12331_v18 = vsub.f32 %v88_v2, %v12319_v54  ;;  %v12642_v61 = vand.u32 4294901760, %v12341_v48  ;;  %v12640_v2 = vand.u32 4294901760, %v12366_v17 }
 0x8fa   :  { %9530 = vmatprep.subr.mxu0 %v12671_v0  ;;  %9568 = vmatpush3.msra.mxu1 %v6070_v42  ;;  %v12362_v42 = vsub.f32 %v86_v24, %v12343_v8 }
 0x8fb   :  { %9531 = vmatpush3.msra.mxu0 %v12230_v45  ;;  %9569 = vmatprep.subr.mxu1 %v12671_v0  ;;  %v12643_v47 = vand.u32 4294901760, %v12331_v18  ;;  %v6139_v16 = vsub.f32 %v12366_v17, %v12640_v2 }
 0x8fc   :  { %9532 = vmatprep.subr.mxu0 %v12671_v0  ;;  %9570 = vmatpush3.msra.mxu1 %v6077_v56  ;;  %v12372_v56 = vsub.f32 %v83_v49, %v12354_v4  ;;  %v12641_v46 = vand.u32 4294901760, %v12362_v42 }
 0x8fd   :  { %9533 = vmatpush3.msra.mxu0 %v12241_v63  ;;  %9571 = vmatprep.subr.mxu1 %v12671_v0  ;;  %v6118_v5 = vsub.f32 %v12331_v18, %v12643_v47  ;;  %v6140_v13 = vand.u32 4294901760, %v6139_v16 }
 0x8fe   :  { %9534 = vmatprep.subr.mxu0 %v12671_v0  ;;  %9572 = vmatpush3.msra.mxu1 %v6084_v3  ;;  %v6125_v3 = vsub.f32 %v12341_v48, %v12642_v61  ;;  %v12638_v7 = vand.u32 4294901760, %v12372_v56 }
 0x8ff   :  { %9535 = vmatpush3.msra.mxu0 %v12253_v44  ;;  %9573 = vmatprep.subr.mxu1 %v12671_v0  ;;  %v6119_v62 = vand.u32 4294901760, %v6118_v5 }
 0x900   :  { %9536 = vmatprep.subr.mxu0 %v12671_v0  ;;  %9574 = vmatpush3.msra.mxu1 %v6091_v43  ;;  %v12639_v43 = vand.u32 4294901760, %v12369_v34  ;;  %v6126_v11 = vand.u32 4294901760, %v6125_v3  ;;  %v6153_v31 = vsub.f32 %v12372_v56, %v12638_v7 }
 0x901   :  { %9537 = vmatpush3.msra.mxu0 %v12260_v9  ;;  %9575 = vmatprep.subr.mxu1 %v12671_v0 }
 0x902   :  { %9538 = vmatprep.subr.mxu0 %v12671_v0  ;;  %9576 = vmatpush3.msra.mxu1 %v6098_v15  ;;  %v6132_v15 = vsub.f32 %v12362_v42, %v12641_v46  ;;  %v6146_v24 = vsub.f32 %v12369_v34, %v12639_v43  ;;  %v6154_v52 = vand.u32 4294901760, %v6153_v31 }
 0x903   :  { %9539 = vmatpush3.msra.mxu0 %v12273_v30  ;;  %9577 = vmatprep.subr.mxu1 %v12671_v0 }
 0x904   :  { %9540 = vmatprep.subr.mxu0 %v12671_v0  ;;  %9578 = vmatpush3.msra.mxu1 %v6105_v29  ;;  %v6133_v29 = vand.u32 4294901760, %v6132_v15  ;;  %v6147_v49 = vand.u32 4294901760, %v6146_v24 }
 0x905   :  { %9541 = vmatpush3.msra.mxu0 %v12283_v51  ;;  %9579 = vmatprep.subr.mxu1 %v12671_v0 }
 0x906   :  { %9542 = vmatprep.subr.mxu0 %v12671_v0  ;;  %9580 = vmatpush3.msra.mxu1 %v6112_v21 }
 0x907   :  { %9543 = vmatpush3.msra.mxu0 %v12298_v37  ;;  %9581 = vmatprep.subr.mxu1 %v12671_v0 }
 0x908   :  { %9544 = vmatprep.subr.mxu0 %v12671_v0  ;;  %9582 = vmatpush3.msra.mxu1 %v6119_v62 }
 0x909   :  { %9545 = vmatpush3.msra.mxu0 %v12311_v59  ;;  %9583 = vmatprep.subr.mxu1 %v12671_v0 }
 0x90a   :  { %9546 = vmatprep.subr.mxu0 %v12671_v0  ;;  %9584 = vmatpush3.msra.mxu1 %v6126_v11 }
 0x90b   :  { %9547 = vmatpush3.msra.mxu0 %v12319_v54  ;;  %9585 = vmatprep.subr.mxu1 %v12671_v0 }
 0x90c   :  { %9548 = vmatprep.subr.mxu0 %v12671_v0  ;;  %9586 = vmatpush3.msra.mxu1 %v6133_v29 }
 0x90d   :  { %9549 = vmatpush3.msra.mxu0 %v12333_v20  ;;  %9587 = vmatprep.subr.mxu1 %v12671_v0 }
 0x90e   :  { %9550 = vmatprep.subr.mxu0 %v12671_v0  ;;  %9588 = vmatpush3.msra.mxu1 %v6140_v13 }
 0x90f   :  { %9551 = vmatpush3.msra.mxu0 %v12343_v8  ;;  %9589 = vmatprep.subr.mxu1 %v12671_v0 }
 0x910   :  { %9552 = vmatprep.subr.mxu0 %v12671_v0  ;;  %9590 = vmatpush3.msra.mxu1 %v6147_v49 }
 0x911   :  { %9553 = vmatpush3.msra.mxu0 %v12349_v58  ;;  %9591 = vmatprep.subr.mxu1 %v12671_v0 }
 0x912   :  { %9554 = vmatprep.subr.mxu0 %v12671_v0  ;;  %9592 = vmatpush3.msra.mxu1 %v6154_v52 }
 0x913   :  { %9555 = vmatpush3.msra.mxu0 %v12351_v36  ;;  %9631 = vmatprep.subr.mxu1 %v12671_v0 }
 0x914   :  { %9556 = vmatprep.subr.mxu0 %v12671_v0 }
 0x915   :  { %9557 = vmatpush3.msra.mxu0 %v12354_v4 }
 0x916   :  { %9596 = vmatprep.subr.mxu0 %v12671_v0 }
 0x96c   :  { %v5526_v5 = vpop.f32.mrf.mxu1 }
 0x96e   :  { %v9385_v21 = vpop.f32.mrf.mxu1 }
 0x974   :  { %v5375_v62 = vpop.f32.mrf.mxu0 }
 0x975   :  { %v5527_v7 = vadd.f32 %v5526_v5, %v5375_v62 }
 0x976   :  { %v9350_v3 = vpop.f32.mrf.mxu0 }
 0x98c   :  { %v5719_v11 = vpop.f32.mrf.mxu1 }
 0x98e   :  { %v9455_v15 = vpop.f32.mrf.mxu1 }
 0x995   :  { %v5630_v16 = vpop.f32.mrf.mxu0 }
 0x996   :  { %v5631_v31 = vadd.f32 %v5630_v16, %v5527_v7 }
 0x997   :  { %v9420_v24 = vpop.f32.mrf.mxu0 }
 0x998   :  { %v5720_v43 = vadd.f32 %v5719_v11, %v5631_v31 }
 0x9ae   :  { %v5925_v29 = vpop.f32.mrf.mxu1 }
 0x9b0   :  { %v9525_v13 = vpop.f32.mrf.mxu1 }
 0x9b6   :  { %v5838_v2 = vpop.f32.mrf.mxu0 }
 0x9b7   :  { %v5839_v49 = vadd.f32 %v5838_v2, %v5720_v43 }
 0x9b8   :  { %v9490_v46 = vpop.f32.mrf.mxu0 }
 0x9b9   :  { %v5926_v61 = vadd.f32 %v5925_v29, %v5839_v49 }
 0x9bb   :  { %v5930_v52 = vrot.slane %v5926_v61, 1 }
 0x9bd   :  { %v5932_v47 = vadd.f32 %v5930_v52, %v10744_v26 }
 0x9bf   :  { %9758 = vtanh.f32 %v5932_v47 }
 0x9cc   :  { %v9759_v21 = vpop.eup %9758 }
 0x9cd   :  { %v5951_v3 = vrot.slane %v9759_v21, 7  ;;  %v5947_v15 = vsel %vm5946_vm7, %v12064_v10, %v9759_v21 }
 0x9ce   :  { %5948 = vst [vmem:[#allocation8] sm:$0xff] %v5947_v15 }
 0x9cf   :  { %v12411_v24 = vand.u32 4294901760, %v5951_v3 }
 0x9d1   :  { %v12414_v5 = vsub.f32 %v5951_v3, %v12411_v24  ;;  %9594 = vmatmul.mubr.f32.vlgmr.msra.gmra.mxu1 %v12411_v24 }
 0x9d2   :  { %9632 = vmatpush3.msra.mxu1 %v12217_v23  ;;  %9663 = vmatprep.mubr.msk.f32.mxu1 %vm9852_vm0, %v12671_v0 }
 0x9d3   :  { %9633 = vmatprep.subr.mxu1 %v12671_v0  ;;  %v6036_v26 = vand.u32 4294901760, %v12414_v5 }
 0x9d4   :  { %9634 = vmatpush3.msra.mxu1 %v12222_v28 }
 0x9d5   :  { %9635 = vmatprep.subr.mxu1 %v12671_v0  ;;  %v6037_v10 = vsub.f32 %v12414_v5, %v6036_v26 }
 0x9d6   :  { %9636 = vmatpush3.msra.mxu1 %v12230_v45 }
 0x9d7   :  { %9637 = vmatprep.subr.mxu1 %v12671_v0  ;;  %v6038_v47 = vand.u32 4294901760, %v6037_v10 }
 0x9d8   :  { %9638 = vmatpush3.msra.mxu1 %v12241_v63 }
 0x9d9   :  { %9639 = vmatprep.subr.mxu1 %v12671_v0  ;;  %9559 = vmatmul.mubr.f32.vlgmr.msra.gmra.mxu0 %v6038_v47 }
 0x9da   :  { %9597 = vmatpush3.msra.mxu0 %v12220_v27  ;;  %9640 = vmatpush3.msra.mxu1 %v12253_v44  ;;  %v12811_v27 = vand.u32 4294901760, %v12341_v48 }
 0x9db   :  { %9598 = vmatprep.subr.mxu0 %v12671_v0  ;;  %9641 = vmatprep.subr.mxu1 %v12671_v0 }
 0x9dc   :  { %9599 = vmatpush3.msra.mxu0 %v12228_v40  ;;  %9642 = vmatpush3.msra.mxu1 %v12260_v9  ;;  %v12814_v40 = vand.u32 4294901760, %v12369_v34 }
 0x9dd   :  { %9600 = vmatprep.subr.mxu0 %v12671_v0  ;;  %9643 = vmatprep.subr.mxu1 %v12671_v0 }
 0x9de   :  { %9601 = vmatpush3.msra.mxu0 %v12239_v57  ;;  %9644 = vmatpush3.msra.mxu1 %v12273_v30 }
 0x9df   :  { %9602 = vmatprep.subr.mxu0 %v12671_v0  ;;  %9645 = vmatprep.subr.mxu1 %v12671_v0 }
 0x9e0   :  { %9603 = vmatpush3.msra.mxu0 %v12250_v38  ;;  %9646 = vmatpush3.msra.mxu1 %v12283_v51 }
 0x9e1   :  { %9604 = vmatprep.subr.mxu0 %v12671_v0  ;;  %9647 = vmatprep.subr.mxu1 %v12671_v0 }
 0x9e2   :  { %9605 = vmatpush3.msra.mxu0 %v12264_v33  ;;  %9648 = vmatpush3.msra.mxu1 %v12298_v37 }
 0x9e3   :  { %9606 = vmatprep.subr.mxu0 %v12671_v0  ;;  %9649 = vmatprep.subr.mxu1 %v12671_v0 }
 0x9e4   :  { %9607 = vmatpush3.msra.mxu0 %v12271_v25  ;;  %9650 = vmatpush3.msra.mxu1 %v12311_v59 }
 0x9e5   :  { %9608 = vmatprep.subr.mxu0 %v12671_v0  ;;  %9651 = vmatprep.subr.mxu1 %v12671_v0 }
 0x9e6   :  { %9609 = vmatpush3.msra.mxu0 %v12281_v39  ;;  %9652 = vmatpush3.msra.mxu1 %v12319_v54 }
 0x9e7   :  { %9610 = vmatprep.subr.mxu0 %v12671_v0  ;;  %9653 = vmatprep.subr.mxu1 %v12671_v0 }
 0x9e8   :  { %9611 = vmatpush3.msra.mxu0 %v12296_v12  ;;  %9654 = vmatpush3.msra.mxu1 %v12333_v20 }
 0x9e9   :  { %9612 = vmatprep.subr.mxu0 %v12671_v0  ;;  %9655 = vmatprep.subr.mxu1 %v12671_v0 }
 0x9ea   :  { %9613 = vmatpush3.msra.mxu0 %v12308_v41  ;;  %9656 = vmatpush3.msra.mxu1 %v12343_v8 }
 0x9eb   :  { %9614 = vmatprep.subr.mxu0 %v12671_v0  ;;  %9657 = vmatprep.subr.mxu1 %v12671_v0 }
 0x9ec   :  { %9615 = vmatpush3.msra.mxu0 %v12323_v6  ;;  %9658 = vmatpush3.msra.mxu1 %v12349_v58 }
 0x9ed   :  { %9616 = vmatprep.subr.mxu0 %v12671_v0  ;;  %9659 = vmatprep.subr.mxu1 %v12671_v0 }
 0x9ee   :  { %9617 = vmatpush3.msra.mxu0 %v12331_v18  ;;  %9660 = vmatpush3.msra.mxu1 %v12351_v36 }
 0x9ef   :  { %9618 = vmatprep.subr.mxu0 %v12671_v0  ;;  %9661 = vmatprep.subr.mxu1 %v12671_v0 }
 0x9f0   :  { %9619 = vmatpush3.msra.mxu0 %v12341_v48  ;;  %9662 = vmatpush3.msra.mxu1 %v12354_v4 }
 0x9f1   :  { %9620 = vmatprep.subr.mxu0 %v12671_v0  ;;  %9664 = vmatmul.mubr.f32.vlgmr.msra.gmra.mxu1 %v6036_v26 }
 0x9f2   :  { %9701 = vmatprep.subr.mxu1 %v12671_v0  ;;  %9621 = vmatpush3.msra.mxu0 %v12362_v42 }
 0x9f3   :  { %9702 = vmatpush3.msra.mxu1 %v12217_v23  ;;  %9622 = vmatprep.subr.mxu0 %v12671_v0  ;;  %v12810_v23 = vand.u32 4294901760, %v12331_v18 }
 0x9f4   :  { %9703 = vmatprep.subr.mxu1 %v12671_v0  ;;  %9623 = vmatpush3.msra.mxu0 %v12366_v17 }
 0x9f5   :  { %9704 = vmatpush3.msra.mxu1 %v12222_v28  ;;  %9624 = vmatprep.subr.mxu0 %v12671_v0  ;;  %v12812_v28 = vand.u32 4294901760, %v12362_v42 }
 0x9f6   :  { %9705 = vmatprep.subr.mxu1 %v12671_v0  ;;  %9625 = vmatpush3.msra.mxu0 %v12369_v34 }
 0x9f7   :  { %9706 = vmatpush3.msra.mxu1 %v12230_v45  ;;  %9626 = vmatprep.subr.mxu0 %v12671_v0  ;;  %v12815_v45 = vand.u32 4294901760, %v12372_v56 }
 0x9f8   :  { %9707 = vmatprep.subr.mxu1 %v12671_v0  ;;  %9627 = vmatpush3.msra.mxu0 %v12372_v56 }
 0x9f9   :  { %9628 = vmatprep.mubr.msk.f32.mxu0 %vm9852_vm0, %v12671_v0  ;;  %9708 = vmatpush3.msra.mxu1 %v12241_v63 }
 0x9fa   :  { %9629 = vmatmul.mubr.f32.vlgmr.msra.gmra.mxu0 %v12414_v5  ;;  %9666 = vmatprep.subr.mxu0 %v12671_v0 }
 0x9fb   :  { %9709 = vmatprep.subr.mxu1 %v12671_v0  ;;  %9667 = vmatpush3.msra.mxu0 %v6047_v35  ;;  %v12813_v35 = vand.u32 4294901760, %v12366_v17 }
 0x9fc   :  { %9710 = vmatpush3.msra.mxu1 %v12253_v44  ;;  %9668 = vmatprep.subr.mxu0 %v12671_v0 }
 0x9fd   :  { %9711 = vmatprep.subr.mxu1 %v12671_v0  ;;  %9669 = vmatpush3.msra.mxu0 %v6054_v55 }
 0x9fe   :  { %9712 = vmatpush3.msra.mxu1 %v12260_v9  ;;  %9670 = vmatprep.subr.mxu0 %v12671_v0 }
 0x9ff   :  { %9713 = vmatprep.subr.mxu1 %v12671_v0  ;;  %9671 = vmatpush3.msra.mxu0 %v6061_v32 }
 0xa00   :  { %9714 = vmatpush3.msra.mxu1 %v12273_v30  ;;  %9672 = vmatprep.subr.mxu0 %v12671_v0 }
 0xa01   :  { %9715 = vmatprep.subr.mxu1 %v12671_v0  ;;  %9673 = vmatpush3.msra.mxu0 %v6068_v1 }
 0xa02   :  { %9716 = vmatpush3.msra.mxu1 %v12283_v51  ;;  %9674 = vmatprep.subr.mxu0 %v12671_v0 }
 0xa03   :  { %9717 = vmatprep.subr.mxu1 %v12671_v0  ;;  %9675 = vmatpush3.msra.mxu0 %v6075_v53 }
 0xa04   :  { %9718 = vmatpush3.msra.mxu1 %v12298_v37  ;;  %9676 = vmatprep.subr.mxu0 %v12671_v0 }
 0xa05   :  { %9719 = vmatprep.subr.mxu1 %v12671_v0  ;;  %9677 = vmatpush3.msra.mxu0 %v6082_v14 }
 0xa06   :  { %9720 = vmatpush3.msra.mxu1 %v12311_v59  ;;  %9678 = vmatprep.subr.mxu0 %v12671_v0 }
 0xa07   :  { %9721 = vmatprep.subr.mxu1 %v12671_v0  ;;  %9679 = vmatpush3.msra.mxu0 %v6089_v60 }
 0xa08   :  { %9722 = vmatpush3.msra.mxu1 %v12319_v54  ;;  %9680 = vmatprep.subr.mxu0 %v12671_v0 }
 0xa09   :  { %9723 = vmatprep.subr.mxu1 %v12671_v0  ;;  %9681 = vmatpush3.msra.mxu0 %v6096_v50 }
 0xa0a   :  { %9724 = vmatpush3.msra.mxu1 %v12333_v20  ;;  %9682 = vmatprep.subr.mxu0 %v12671_v0 }
 0xa0b   :  { %9725 = vmatprep.subr.mxu1 %v12671_v0  ;;  %9683 = vmatpush3.msra.mxu0 %v6103_v19 }
 0xa0c   :  { %9726 = vmatpush3.msra.mxu1 %v12343_v8  ;;  %9684 = vmatprep.subr.mxu0 %v12671_v0 }
 0xa0d   :  { %9727 = vmatprep.subr.mxu1 %v12671_v0  ;;  %9685 = vmatpush3.msra.mxu0 %v6110_v22 }
 0xa0e   :  { %9728 = vmatpush3.msra.mxu1 %v12349_v58  ;;  %9686 = vmatprep.subr.mxu0 %v12671_v0 }
 0xa0f   :  { %9729 = vmatprep.subr.mxu1 %v12671_v0  ;;  %9687 = vmatpush3.msra.mxu0 %v12810_v23 }
 0xa10   :  { %9730 = vmatpush3.msra.mxu1 %v12351_v36  ;;  %9688 = vmatprep.subr.mxu0 %v12671_v0 }
 0xa11   :  { %9731 = vmatprep.subr.mxu1 %v12671_v0  ;;  %9689 = vmatpush3.msra.mxu0 %v12811_v27 }
 0xa12   :  { %9732 = vmatpush3.msra.mxu1 %v12354_v4  ;;  %9733 = vmatprep.mubr.msk.f32.mxu1 %vm9852_vm0, %v12671_v0 }
 0xa13   :  { %9690 = vmatprep.subr.mxu0 %v12671_v0  ;;  %9734 = vmatmul.mubr.f32.vlgmr.msra.gmra.mxu1 %v12411_v24 }
 0xa14   :  { %9691 = vmatpush3.msra.mxu0 %v12812_v28  ;;  %9698 = vmatprep.mubr.msk.f32.mxu0 %vm9852_vm0, %v12671_v0 }
 0xa15   :  { %9692 = vmatprep.subr.mxu0 %v12671_v0 }
 0xa16   :  { %9693 = vmatpush3.msra.mxu0 %v12813_v35 }
 0xa17   :  { %9694 = vmatprep.subr.mxu0 %v12671_v0 }
 0xa18   :  { %9695 = vmatpush3.msra.mxu0 %v12814_v40 }
 0xa19   :  { %9696 = vmatprep.subr.mxu0 %v12671_v0 }
 0xa1a   :  { %9697 = vmatpush3.msra.mxu0 %v12815_v45 }
 0xa1b   :  { %9699 = vmatmul.mubr.f32.vlgmr.msra.gmra.mxu0 %v12411_v24 }
 0xa1c   :  { %9831 = shalt.err (!%p9828_p5)
}
 0xa1d   :  { %6604 = dma.vmem_to_hbm [thread:$0]  %s6602_s18, 128, %s12587_s6, [#allocation4]   ;;  %v5949_v9 = vld [vmem:[%s12586_s5] sm:$0x1] }
 0xa91   :  { %v6191_v0 = vpop.f32.mrf.mxu1 }
 0xa93   :  { %v9595_v55 = vpop.f32.mrf.mxu1 }
 0xa99   :  { %v6040_v57 = vpop.f32.mrf.mxu0 }
 0xa9a   :  { %v6041_v33 = vadd.f32 %v6040_v57, %v5949_v9 }
 0xa9b   :  { %v9560_v63 = vpop.f32.mrf.mxu0 }
 0xa9c   :  { %v6192_v30 = vadd.f32 %v6191_v0, %v6041_v33 }
 0xab1   :  { %v6384_v32 = vpop.f32.mrf.mxu1 }
 0xab3   :  { %v9665_v38 = vpop.f32.mrf.mxu1 }
 0xaba   :  { %v6295_v44 = vpop.f32.mrf.mxu0 }
 0xabb   :  { %v6296_v14 = vadd.f32 %v6295_v44, %v6192_v30 }
 0xabc   :  { %v9630_v1 = vpop.f32.mrf.mxu0 }
 0xabd   :  { %v6385_v39 = vadd.f32 %v6384_v32, %v6296_v14 }
 0xad3   :  { %v6590_v25 = vpop.f32.mrf.mxu1 }
 0xad5   :  { %v9735_v53 = vpop.f32.mrf.mxu1 }
 0xadb   :  { %v6503_v51 = vpop.f32.mrf.mxu0 }
 0xadc   :  { %v6504_v60 = vadd.f32 %v6503_v51, %v6385_v39 }
 0xadd   :  { %v9700_v12 = vpop.f32.mrf.mxu0 }
 0xade   :  { %v6591_v37 = vadd.f32 %v6590_v25, %v6504_v60 }
 0xae0   :  { %6594 = vst [vmem:[%s12588_s7] sm:$0x1] %v6591_v37 }
 0xae1   :  { %9844 = dma.done.wait [#allocation4], 128  }
 0xae2   :  { %9845 = vsyncadd [#allocation4], 4294967168 }
 0xae3   :  { %6612 = vsyncpa [#allocation3], 1 }
 0xae4   :  { %6613 = vsyncpa [#allocation6], 1 }
 0xae5   :  { %6614 = vsyncpa [#allocation4], 1 }

</bundles_post_ra>
